<compile_context>
chip_gen: v6e
topology: v6e:2x2x1
jax: 0.10.0
libtpu: 0.0.40
codegen_flags: <defaults>
</compile_context>

<pallas_src>
import jax
import jax.numpy as jnp
from jax.experimental import pallas as pl
from jax.experimental.pallas import tpu as pltpu


def _channel_mixing_kernel(x_ref, muk_ref, mur_ref,
                           wk_ref, wv_ref, wr_ref, o_ref, carry_ref):
    t = pl.program_id(1)

    # Hidden state is cleared at sequence start -> previous token at t=0 is 0.
    @pl.when(t == 0)
    def _():
        carry_ref[...] = jnp.zeros_like(carry_ref)

    x = x_ref[0]                              # (tq, D), input dtype (e.g. bf16)
    x32 = x.astype(jnp.float32)

    # Token shift within the tile on the XLU: rolled[i] = x32[i-1] (circular);
    # row 0 is replaced by the carried last row of the previous time-tile.
    rolled = pltpu.roll(x32, shift=1, axis=0)                        # (tq, D)
    row = jax.lax.broadcasted_iota(jnp.int32, rolled.shape, 0)
    xp32 = jnp.where(row == 0, carry_ref[...], rolled)

    # Carry this tile's last token for the next time-tile (read-before-write
    # order above is preserved by program order).
    carry_ref[...] = x32[-1:, :]

    muk = muk_ref[...]                        # (1, D) f32
    mur = mur_ref[...]                        # (1, D) f32

    # PreviousMixing in f32 on the VPU: xp + mu * (x - xp).
    delta = x32 - xp32
    xk = xp32 + muk * delta
    xr = xp32 + mur * delta

    # MXU matmuls with narrow (weight-dtype) operands, f32 accumulation.
    k = jnp.dot(xk.astype(wk_ref.dtype), wk_ref[...],
                preferred_element_type=jnp.float32)                  # (tq, H)
    k = jnp.maximum(k, 0.0)
    k = k * k
    vk = jnp.dot(k.astype(wv_ref.dtype), wv_ref[...],
                 preferred_element_type=jnp.float32)                 # (tq, D)

    r = jnp.dot(xr.astype(wr_ref.dtype), wr_ref[...],
                preferred_element_type=jnp.float32)                  # (tq, D)
    r = jax.nn.sigmoid(r)

    o_ref[0] = (r * vk).astype(o_ref.dtype)


def channel_mixing(x, mu_k, mu_r, wk_t, wv_t, wr_t, *, tq=256):
    """x: (B, T, D); mu_*: (D,) f32; wk_t: (D, H); wv_t: (H, D); wr_t: (D, D)."""
    B, T, D = x.shape
    H = wk_t.shape[1]
    tq = min(tq, T)
    assert T % tq == 0, "T must be a multiple of the time tile"
    assert tq % 8 == 0, "time tile must be a multiple of 8 sublanes"

    muk2 = mu_k.astype(jnp.float32).reshape(1, D)
    mur2 = mu_r.astype(jnp.float32).reshape(1, D)

    def nbytes(shape, dtype):
        n = 1
        for s in shape:
            n *= int(s)
        return n * jnp.dtype(dtype).itemsize

    # VMEM budget: single-buffered resident weights/mu + double-buffered
    # (tq, D) x/out tiles + the (tq, H) hidden intermediate, with headroom.
    resident = (nbytes((D, H), wk_t.dtype) + nbytes((H, D), wv_t.dtype)
                + nbytes((D, D), wr_t.dtype) + 3 * nbytes((1, D), jnp.float32))
    streamed = nbytes((tq, D), x.dtype) + nbytes((tq, D), x.dtype)
    hidden_tmp = nbytes((tq, H), jnp.float32)
    needed = resident + 2 * streamed + hidden_tmp + (8 << 20)

    # Generation-aware cap: physical VMEM minus headroom (v5e/v6e: 128 MiB,
    # v7x: 64 MiB), instead of a hard-coded 64 MiB ceiling.
    try:
        vmem_cap = int(pltpu.get_tpu_info().vmem_capacity_bytes)
    except Exception:
        vmem_cap = 128 << 20
    cap = max(32 << 20, vmem_cap - (16 << 20))
    vmem_limit = int(min(cap, max(32 << 20, needed)))

    def build(single_buffer_resident):
        res_kwargs = (dict(pipeline_mode=pl.Buffered(1))
                      if single_buffer_resident else {})
        return pl.pallas_call(
            _channel_mixing_kernel,
            out_shape=jax.ShapeDtypeStruct((B, T, D), x.dtype),
            grid_spec=pltpu.PrefetchScalarGridSpec(
                num_scalar_prefetch=0,
                grid=(B, T // tq),
                in_specs=[
                    pl.BlockSpec((1, tq, D), lambda b, t: (b, t, 0)),   # x tile
                    pl.BlockSpec((1, D), lambda b, t: (0, 0), **res_kwargs),  # mu_k
                    pl.BlockSpec((1, D), lambda b, t: (0, 0), **res_kwargs),  # mu_r
                    pl.BlockSpec((D, H), lambda b, t: (0, 0), **res_kwargs),  # Wk^T
                    pl.BlockSpec((H, D), lambda b, t: (0, 0), **res_kwargs),  # Wv^T
                    pl.BlockSpec((D, D), lambda b, t: (0, 0), **res_kwargs),  # Wr^T
                ],
                out_specs=pl.BlockSpec((1, tq, D), lambda b, t: (b, t, 0)),
                scratch_shapes=[pltpu.VMEM((1, D), jnp.float32)],      # token carry
            ),
            compiler_params=pltpu.CompilerParams(
                dimension_semantics=("parallel", "arbitrary"),
                vmem_limit_bytes=vmem_limit,
            ),
        )

    try:
        return build(True)(x, muk2, mur2, wk_t, wv_t, wr_t)
    except Exception:
        # Fallback: default double-buffering if Buffered(1) is unavailable.
        return build(False)(x, muk2, mur2, wk_t, wv_t, wr_t)


def _reference(x, mu_k, mu_r, wk_t, wv_t, wr_t):
    """Mirrors the kernel numerics: f32 mixing/elementwise, weight-dtype matmuls."""
    x32 = x.astype(jnp.float32)
    xp32 = jnp.concatenate(
        [jnp.zeros_like(x32[:, :1]), x32[:, :-1]], axis=1)
    xk = mu_k * x32 + (1.0 - mu_k) * xp32
    xr = mu_r * x32 + (1.0 - mu_r) * xp32
    k = jnp.dot(xk.astype(wk_t.dtype), wk_t, preferred_element_type=jnp.float32)
    k = jnp.maximum(k, 0.0) ** 2
    vk = jnp.dot(k.astype(wv_t.dtype), wv_t, preferred_element_type=jnp.float32)
    r = jax.nn.sigmoid(
        jnp.dot(xr.astype(wr_t.dtype), wr_t, preferred_element_type=jnp.float32))
    return (r * vk).astype(x.dtype)


if __name__ == "__main__":
    B, T, D = 2, 512, 128          # lane-dense D (multiple of 128)
    HF = 4
    H = D * HF

    key = jax.random.PRNGKey(0)
    kx, kk, kv, kr, kmk, kmr = jax.random.split(key, 6)

    # bf16 activations/weights (MXU-friendly); f32 mixing coefficients.
    x = jax.random.normal(kx, (B, T, D), dtype=jnp.float32).astype(jnp.bfloat16)
    wk_t = (jax.random.normal(kk, (D, H), dtype=jnp.float32)
            / jnp.sqrt(D)).astype(jnp.bfloat16)                       # Wk.weight.T
    wv_t = (jax.random.normal(kv, (H, D), dtype=jnp.float32)
            / jnp.sqrt(H)).astype(jnp.bfloat16)                       # Wv.weight.T
    wr_t = (jax.random.normal(kr, (D, D), dtype=jnp.float32)
            / jnp.sqrt(D)).astype(jnp.bfloat16)                       # Wr.weight.T
    mu_k = jax.random.uniform(kmk, (D,), dtype=jnp.float32)           # PreviousMixing
    mu_r = jax.random.uniform(kmr, (D,), dtype=jnp.float32)

    out = channel_mixing(x, mu_k, mu_r, wk_t, wv_t, wr_t, tq=256)
    out = jax.block_until_ready(out)

    ref = _reference(x, mu_k, mu_r, wk_t, wv_t, wr_t)
    assert out.shape == (B, T, D)
    assert jnp.allclose(out.astype(jnp.float32), ref.astype(jnp.float32),
                        atol=3e-2, rtol=3e-2), "mismatch vs reference"

    print("KERNEL_OK")
</pallas_src>

<mosaic_0001>
module attributes {stable_mosaic.version = 11 : i64} {
  func.func @_channel_mixing_kernel(%arg0: i32, %arg1: i32, %arg2: memref<1x256x128xbf16, #tpu.memory_space<vmem>>, %arg3: memref<1x128xf32, #tpu.memory_space<vmem>>, %arg4: memref<1x128xf32, #tpu.memory_space<vmem>>, %arg5: memref<128x512xbf16, #tpu.memory_space<vmem>>, %arg6: memref<512x128xbf16, #tpu.memory_space<vmem>>, %arg7: memref<128x128xbf16, #tpu.memory_space<vmem>>, %arg8: memref<1x256x128xbf16, #tpu.memory_space<vmem>>, %arg9: memref<1x128xf32, #tpu.memory_space<vmem>>) attributes {dimension_semantics = [#tpu.dimension_semantics<parallel>, #tpu.dimension_semantics<arbitrary>], iteration_bounds = array<i64: 2, 2>, scalar_prefetch = 0 : i64, scratch_operands = 1 : i64, tpu.core_type = #tpu.core_type<tc>, window_params = [{transform_indices = @transform_0, window_bounds = array<i64: 1, 256, 128>}, {pipeline_mode = #tpu.pipeline_mode<synchronous>, transform_indices = @transform_1, window_bounds = array<i64: 1, 128>}, {pipeline_mode = #tpu.pipeline_mode<synchronous>, transform_indices = @transform_2, window_bounds = array<i64: 1, 128>}, {pipeline_mode = #tpu.pipeline_mode<synchronous>, transform_indices = @transform_3, window_bounds = array<i64: 128, 512>}, {pipeline_mode = #tpu.pipeline_mode<synchronous>, transform_indices = @transform_4, window_bounds = array<i64: 512, 128>}, {pipeline_mode = #tpu.pipeline_mode<synchronous>, transform_indices = @transform_5, window_bounds = array<i64: 128, 128>}, {transform_indices = @transform_6, window_bounds = array<i64: 1, 256, 128>}]} {
    %c0_i32 = arith.constant 0 : i32
    %0 = arith.cmpi eq, %arg1, %c0_i32 : i32
    %1 = arith.extui %0 : i1 to i32
    %c0_i32_0 = arith.constant 0 : i32
    %2 = arith.cmpi ne, %1, %c0_i32_0 : i32
    scf.if %2 {
      %cst_25 = arith.constant 0.000000e+00 : f32
      %47 = vector.broadcast %cst_25 : f32 to vector<1x128xf32>
      %c0_26 = arith.constant 0 : index
      %c0_27 = arith.constant 0 : index
      %48 = vector.load %arg9[%c0_26, %c0_27] : memref<1x128xf32, #tpu.memory_space<vmem>>, vector<1x128xf32>
      tpu.vector_store %arg9[%c0_26, %c0_27], %47 {strides = array<i32>} : memref<1x128xf32, #tpu.memory_space<vmem>>, vector<1x128xf32>,
    } else {
    }
    %c0 = arith.constant 0 : index
    %c0_1 = arith.constant 0 : index
    %c0_2 = arith.constant 0 : index
    %3 = vector.load %arg2[%c0, %c0_1, %c0_2] : memref<1x256x128xbf16, #tpu.memory_space<vmem>>, vector<1x256x128xbf16>
    %4 = vector.shape_cast %3 : vector<1x256x128xbf16> to vector<256x128xbf16>
    %5 = arith.extf %4 : vector<256x128xbf16> to vector<256x128xf32>
    %c1_i32 = arith.constant 1 : i32
    %6 = tpu.dynamic_rotate %5 by %c1_i32 dim 0 : vector<256x128xf32>, i32 -> vector<256x128xf32>
    %7 = tpu.iota {dimensions = array<i32: 0>} : vector<256x128xi32>
    %c0_i32_3 = arith.constant 0 : i32
    %8 = vector.broadcast %c0_i32_3 : i32 to vector<256x128xi32>
    %9 = arith.cmpi eq, %7, %8 : vector<256x128xi32>
    %c0_4 = arith.constant 0 : index
    %c0_5 = arith.constant 0 : index
    %10 = vector.load %arg9[%c0_4, %c0_5] : memref<1x128xf32, #tpu.memory_space<vmem>>, vector<1x128xf32>
    %11 = vector.shape_cast %10 : vector<1x128xf32> to vector<1x128xf32>
    %12 = vector.broadcast %11 : vector<1x128xf32> to vector<256x128xf32>
    %13 = arith.select %9, %12, %6 : vector<256x128xi1>, vector<256x128xf32>
    %14 = vector.extract_strided_slice %5 {offsets = [255, 0], sizes = [1, 128], strides = [1, 1]} : vector<256x128xf32> to vector<1x128xf32>
    %c0_6 = arith.constant 0 : index
    %c0_7 = arith.constant 0 : index
    %15 = vector.load %arg9[%c0_6, %c0_7] : memref<1x128xf32, #tpu.memory_space<vmem>>, vector<1x128xf32>
    tpu.vector_store %arg9[%c0_6, %c0_7], %14 {strides = array<i32>} : memref<1x128xf32, #tpu.memory_space<vmem>>, vector<1x128xf32>,
    %c0_8 = arith.constant 0 : index
    %c0_9 = arith.constant 0 : index
    %16 = vector.load %arg3[%c0_8, %c0_9] : memref<1x128xf32, #tpu.memory_space<vmem>>, vector<1x128xf32>
    %c0_10 = arith.constant 0 : index
    %c0_11 = arith.constant 0 : index
    %17 = vector.load %arg4[%c0_10, %c0_11] : memref<1x128xf32, #tpu.memory_space<vmem>>, vector<1x128xf32>
    %18 = arith.subf %5, %13 : vector<256x128xf32>
    %19 = vector.broadcast %16 : vector<1x128xf32> to vector<256x128xf32>
    %20 = arith.mulf %19, %18 : vector<256x128xf32>
    %21 = arith.addf %13, %20 : vector<256x128xf32>
    %22 = vector.broadcast %17 : vector<1x128xf32> to vector<256x128xf32>
    %23 = arith.mulf %22, %18 : vector<256x128xf32>
    %24 = arith.addf %13, %23 : vector<256x128xf32>
    %25 = arith.truncf %21 : vector<256x128xf32> to vector<256x128xbf16>
    %c0_12 = arith.constant 0 : index
    %c0_13 = arith.constant 0 : index
    %26 = vector.load %arg5[%c0_12, %c0_13] : memref<128x512xbf16, #tpu.memory_space<vmem>>, vector<128x512xbf16>
    %cst = arith.constant dense<0.000000e+00> : vector<256x512xf32>
    %27 = tpu.matmul %25, %26, %cst {dimension_numbers = #tpu.dot_dimension_numbers<[1], [0], [0], [1], [0, 0, 1, 1], [], []>} : vector<256x128xbf16>, vector<128x512xbf16>, vector<256x512xf32> -> vector<256x512xf32>
    %cst_14 = arith.constant 0.000000e+00 : f32
    %28 = vector.broadcast %cst_14 : f32 to vector<256x512xf32>
    %29 = arith.maximumf %27, %28 : vector<256x512xf32>
    %30 = arith.mulf %29, %29 : vector<256x512xf32>
    %31 = arith.truncf %30 : vector<256x512xf32> to vector<256x512xbf16>
    %c0_15 = arith.constant 0 : index
    %c0_16 = arith.constant 0 : index
    %32 = vector.load %arg6[%c0_15, %c0_16] : memref<512x128xbf16, #tpu.memory_space<vmem>>, vector<512x128xbf16>
    %cst_17 = arith.constant dense<0.000000e+00> : vector<256x128xf32>
    %33 = tpu.matmul %31, %32, %cst_17 {dimension_numbers = #tpu.dot_dimension_numbers<[1], [0], [0], [1], [0, 0, 1, 1], [], []>} : vector<256x512xbf16>, vector<512x128xbf16>, vector<256x128xf32> -> vector<256x128xf32>
    %34 = arith.truncf %24 : vector<256x128xf32> to vector<256x128xbf16>
    %c0_18 = arith.constant 0 : index
    %c0_19 = arith.constant 0 : index
    %35 = vector.load %arg7[%c0_18, %c0_19] : memref<128x128xbf16, #tpu.memory_space<vmem>>, vector<128x128xbf16>
    %cst_20 = arith.constant dense<0.000000e+00> : vector<256x128xf32>
    %36 = tpu.matmul %34, %35, %cst_20 {dimension_numbers = #tpu.dot_dimension_numbers<[1], [0], [0], [1], [0, 0, 1, 1], [], []>} : vector<256x128xbf16>, vector<128x128xbf16>, vector<256x128xf32> -> vector<256x128xf32>
    %37 = arith.negf %36 : vector<256x128xf32>
    %38 = math.exp %37 : vector<256x128xf32>
    %cst_21 = arith.constant 1.000000e+00 : f32
    %39 = vector.broadcast %cst_21 : f32 to vector<256x128xf32>
    %40 = arith.addf %39, %38 : vector<256x128xf32>
    %41 = arith.divf %39, %40 : vector<256x128xf32>
    %42 = arith.mulf %41, %33 : vector<256x128xf32>
    %43 = arith.truncf %42 : vector<256x128xf32> to vector<256x128xbf16>
    %c0_22 = arith.constant 0 : index
    %c0_23 = arith.constant 0 : index
    %c0_24 = arith.constant 0 : index
    %44 = vector.load %arg8[%c0_22, %c0_23, %c0_24] : memref<1x256x128xbf16, #tpu.memory_space<vmem>>, vector<1x256x128xbf16>
    %45 = vector.shape_cast %44 : vector<1x256x128xbf16> to vector<256x128xbf16>
    %46 = vector.shape_cast %43 : vector<256x128xbf16> to vector<1x256x128xbf16>
    tpu.vector_store %arg8[%c0_22, %c0_23, %c0_24], %46 {strides = array<i32>} : memref<1x256x128xbf16, #tpu.memory_space<vmem>>, vector<1x256x128xbf16>,
    return
  }
  func.func @transform_0(%arg0: i32, %arg1: i32) -> (i32, i32, i32) {
    %c0_i32 = arith.constant 0 : i32
    %c0_i32_0 = arith.constant 0 : i32
    return %arg0, %arg1, %c0_i32 : i32, i32, i32
  }
  func.func @transform_1(%arg0: i32, %arg1: i32) -> (i32, i32) {
    %c0_i32 = arith.constant 0 : i32
    %c0_i32_0 = arith.constant 0 : i32
    %c0_i32_1 = arith.constant 0 : i32
    return %c0_i32, %c0_i32_0 : i32, i32
  }
  func.func @transform_2(%arg0: i32, %arg1: i32) -> (i32, i32) {
    %c0_i32 = arith.constant 0 : i32
    %c0_i32_0 = arith.constant 0 : i32
    %c0_i32_1 = arith.constant 0 : i32
    return %c0_i32, %c0_i32_0 : i32, i32
  }
  func.func @transform_3(%arg0: i32, %arg1: i32) -> (i32, i32) {
    %c0_i32 = arith.constant 0 : i32
    %c0_i32_0 = arith.constant 0 : i32
    %c0_i32_1 = arith.constant 0 : i32
    return %c0_i32, %c0_i32_0 : i32, i32
  }
  func.func @transform_4(%arg0: i32, %arg1: i32) -> (i32, i32) {
    %c0_i32 = arith.constant 0 : i32
    %c0_i32_0 = arith.constant 0 : i32
    %c0_i32_1 = arith.constant 0 : i32
    return %c0_i32, %c0_i32_0 : i32, i32
  }
  func.func @transform_5(%arg0: i32, %arg1: i32) -> (i32, i32) {
    %c0_i32 = arith.constant 0 : i32
    %c0_i32_0 = arith.constant 0 : i32
    %c0_i32_1 = arith.constant 0 : i32
    return %c0_i32, %c0_i32_0 : i32, i32
  }
  func.func @transform_6(%arg0: i32, %arg1: i32) -> (i32, i32, i32) {
    %c0_i32 = arith.constant 0 : i32
    %c0_i32_0 = arith.constant 0 : i32
    return %arg0, %arg1, %c0_i32 : i32, i32, i32
  }
}

module attributes {stable_mosaic.version = 11 : i64} {
  func.func @_channel_mixing_kernel(%arg0: i32, %arg1: i32, %arg2: memref<1x256x128xbf16, #tpu.memory_space<vmem>>, %arg3: memref<1x128xf32, #tpu.memory_space<vmem>>, %arg4: memref<1x128xf32, #tpu.memory_space<vmem>>, %arg5: memref<128x512xbf16, #tpu.memory_space<vmem>>, %arg6: memref<512x128xbf16, #tpu.memory_space<vmem>>, %arg7: memref<128x128xbf16, #tpu.memory_space<vmem>>, %arg8: memref<1x256x128xbf16, #tpu.memory_space<vmem>>, %arg9: memref<1x128xf32, #tpu.memory_space<vmem>>) attributes {dimension_semantics = [#tpu.dimension_semantics<parallel>, #tpu.dimension_semantics<arbitrary>], iteration_bounds = array<i64: 2, 2>, scalar_prefetch = 0 : i64, scratch_operands = 1 : i64, tpu.core_type = #tpu.core_type<tc>, window_params = [{transform_indices = @transform_0, window_bounds = array<i64: 1, 256, 128>}, {pipeline_mode = #tpu.pipeline_mode<synchronous>, transform_indices = @transform_1, window_bounds = array<i64: 1, 128>}, {pipeline_mode = #tpu.pipeline_mode<synchronous>, transform_indices = @transform_2, window_bounds = array<i64: 1, 128>}, {pipeline_mode = #tpu.pipeline_mode<synchronous>, transform_indices = @transform_3, window_bounds = array<i64: 128, 512>}, {pipeline_mode = #tpu.pipeline_mode<synchronous>, transform_indices = @transform_4, window_bounds = array<i64: 512, 128>}, {pipeline_mode = #tpu.pipeline_mode<synchronous>, transform_indices = @transform_5, window_bounds = array<i64: 128, 128>}, {transform_indices = @transform_6, window_bounds = array<i64: 1, 256, 128>}]} {
    %c0_i32 = arith.constant 0 : i32
    %0 = arith.cmpi eq, %arg1, %c0_i32 : i32
    %1 = arith.extui %0 : i1 to i32
    %c0_i32_0 = arith.constant 0 : i32
    %2 = arith.cmpi ne, %1, %c0_i32_0 : i32
    scf.if %2 {
      %cst_25 = arith.constant 0.000000e+00 : f32
      %47 = vector.broadcast %cst_25 : f32 to vector<1x128xf32>
      %c0_26 = arith.constant 0 : index
      %c0_27 = arith.constant 0 : index
      %48 = vector.load %arg9[%c0_26, %c0_27] : memref<1x128xf32, #tpu.memory_space<vmem>>, vector<1x128xf32>
      tpu.vector_store %arg9[%c0_26, %c0_27], %47 {strides = array<i32>} : memref<1x128xf32, #tpu.memory_space<vmem>>, vector<1x128xf32>,
    } else {
    }
    %c0 = arith.constant 0 : index
    %c0_1 = arith.constant 0 : index
    %c0_2 = arith.constant 0 : index
    %3 = vector.load %arg2[%c0, %c0_1, %c0_2] : memref<1x256x128xbf16, #tpu.memory_space<vmem>>, vector<1x256x128xbf16>
    %4 = vector.shape_cast %3 : vector<1x256x128xbf16> to vector<256x128xbf16>
    %5 = arith.extf %4 : vector<256x128xbf16> to vector<256x128xf32>
    %c1_i32 = arith.constant 1 : i32
    %6 = tpu.dynamic_rotate %5 by %c1_i32 dim 0 : vector<256x128xf32>, i32 -> vector<256x128xf32>
    %7 = tpu.iota {dimensions = array<i32: 0>} : vector<256x128xi32>
    %c0_i32_3 = arith.constant 0 : i32
    %8 = vector.broadcast %c0_i32_3 : i32 to vector<256x128xi32>
    %9 = arith.cmpi eq, %7, %8 : vector<256x128xi32>
    %c0_4 = arith.constant 0 : index
    %c0_5 = arith.constant 0 : index
    %10 = vector.load %arg9[%c0_4, %c0_5] : memref<1x128xf32, #tpu.memory_space<vmem>>, vector<1x128xf32>
    %11 = vector.shape_cast %10 : vector<1x128xf32> to vector<1x128xf32>
    %12 = vector.broadcast %11 : vector<1x128xf32> to vector<256x128xf32>
    %13 = arith.select %9, %12, %6 : vector<256x128xi1>, vector<256x128xf32>
    %14 = vector.extract_strided_slice %5 {offsets = [255, 0], sizes = [1, 128], strides = [1, 1]} : vector<256x128xf32> to vector<1x128xf32>
    %c0_6 = arith.constant 0 : index
    %c0_7 = arith.constant 0 : index
    %15 = vector.load %arg9[%c0_6, %c0_7] : memref<1x128xf32, #tpu.memory_space<vmem>>, vector<1x128xf32>
    tpu.vector_store %arg9[%c0_6, %c0_7], %14 {strides = array<i32>} : memref<1x128xf32, #tpu.memory_space<vmem>>, vector<1x128xf32>,
    %c0_8 = arith.constant 0 : index
    %c0_9 = arith.constant 0 : index
    %16 = vector.load %arg3[%c0_8, %c0_9] : memref<1x128xf32, #tpu.memory_space<vmem>>, vector<1x128xf32>
    %c0_10 = arith.constant 0 : index
    %c0_11 = arith.constant 0 : index
    %17 = vector.load %arg4[%c0_10, %c0_11] : memref<1x128xf32, #tpu.memory_space<vmem>>, vector<1x128xf32>
    %18 = arith.subf %5, %13 : vector<256x128xf32>
    %19 = vector.broadcast %16 : vector<1x128xf32> to vector<256x128xf32>
    %20 = arith.mulf %19, %18 : vector<256x128xf32>
    %21 = arith.addf %13, %20 : vector<256x128xf32>
    %22 = vector.broadcast %17 : vector<1x128xf32> to vector<256x128xf32>
    %23 = arith.mulf %22, %18 : vector<256x128xf32>
    %24 = arith.addf %13, %23 : vector<256x128xf32>
    %25 = arith.truncf %21 : vector<256x128xf32> to vector<256x128xbf16>
    %c0_12 = arith.constant 0 : index
    %c0_13 = arith.constant 0 : index
    %26 = vector.load %arg5[%c0_12, %c0_13] : memref<128x512xbf16, #tpu.memory_space<vmem>>, vector<128x512xbf16>
    %cst = arith.constant dense<0.000000e+00> : vector<256x512xf32>
    %27 = tpu.matmul %25, %26, %cst {dimension_numbers = #tpu.dot_dimension_numbers<[1], [0], [0], [1], [0, 0, 1, 1], [], []>} : vector<256x128xbf16>, vector<128x512xbf16>, vector<256x512xf32> -> vector<256x512xf32>
    %cst_14 = arith.constant 0.000000e+00 : f32
    %28 = vector.broadcast %cst_14 : f32 to vector<256x512xf32>
    %29 = arith.maximumf %27, %28 : vector<256x512xf32>
    %30 = arith.mulf %29, %29 : vector<256x512xf32>
    %31 = arith.truncf %30 : vector<256x512xf32> to vector<256x512xbf16>
    %c0_15 = arith.constant 0 : index
    %c0_16 = arith.constant 0 : index
    %32 = vector.load %arg6[%c0_15, %c0_16] : memref<512x128xbf16, #tpu.memory_space<vmem>>, vector<512x128xbf16>
    %cst_17 = arith.constant dense<0.000000e+00> : vector<256x128xf32>
    %33 = tpu.matmul %31, %32, %cst_17 {dimension_numbers = #tpu.dot_dimension_numbers<[1], [0], [0], [1], [0, 0, 1, 1], [], []>} : vector<256x512xbf16>, vector<512x128xbf16>, vector<256x128xf32> -> vector<256x128xf32>
    %34 = arith.truncf %24 : vector<256x128xf32> to vector<256x128xbf16>
    %c0_18 = arith.constant 0 : index
    %c0_19 = arith.constant 0 : index
    %35 = vector.load %arg7[%c0_18, %c0_19] : memref<128x128xbf16, #tpu.memory_space<vmem>>, vector<128x128xbf16>
    %cst_20 = arith.constant dense<0.000000e+00> : vector<256x128xf32>
    %36 = tpu.matmul %34, %35, %cst_20 {dimension_numbers = #tpu.dot_dimension_numbers<[1], [0], [0], [1], [0, 0, 1, 1], [], []>} : vector<256x128xbf16>, vector<128x128xbf16>, vector<256x128xf32> -> vector<256x128xf32>
    %37 = arith.negf %36 : vector<256x128xf32>
    %38 = math.exp %37 : vector<256x128xf32>
    %cst_21 = arith.constant 1.000000e+00 : f32
    %39 = vector.broadcast %cst_21 : f32 to vector<256x128xf32>
    %40 = arith.addf %39, %38 : vector<256x128xf32>
    %41 = arith.divf %39, %40 : vector<256x128xf32>
    %42 = arith.mulf %41, %33 : vector<256x128xf32>
    %43 = arith.truncf %42 : vector<256x128xf32> to vector<256x128xbf16>
    %c0_22 = arith.constant 0 : index
    %c0_23 = arith.constant 0 : index
    %c0_24 = arith.constant 0 : index
    %44 = vector.load %arg8[%c0_22, %c0_23, %c0_24] : memref<1x256x128xbf16, #tpu.memory_space<vmem>>, vector<1x256x128xbf16>
    %45 = vector.shape_cast %44 : vector<1x256x128xbf16> to vector<256x128xbf16>
    %46 = vector.shape_cast %43 : vector<256x128xbf16> to vector<1x256x128xbf16>
    tpu.vector_store %arg8[%c0_22, %c0_23, %c0_24], %46 {strides = array<i32>} : memref<1x256x128xbf16, #tpu.memory_space<vmem>>, vector<1x256x128xbf16>,
    return
  }
  func.func @transform_0(%arg0: i32, %arg1: i32) -> (i32, i32, i32) {
    %c0_i32 = arith.constant 0 : i32
    %c0_i32_0 = arith.constant 0 : i32
    return %arg0, %arg1, %c0_i32 : i32, i32, i32
  }
  func.func @transform_1(%arg0: i32, %arg1: i32) -> (i32, i32) {
    %c0_i32 = arith.constant 0 : i32
    %c0_i32_0 = arith.constant 0 : i32
    %c0_i32_1 = arith.constant 0 : i32
    return %c0_i32, %c0_i32_0 : i32, i32
  }
  func.func @transform_2(%arg0: i32, %arg1: i32) -> (i32, i32) {
    %c0_i32 = arith.constant 0 : i32
    %c0_i32_0 = arith.constant 0 : i32
    %c0_i32_1 = arith.constant 0 : i32
    return %c0_i32, %c0_i32_0 : i32, i32
  }
  func.func @transform_3(%arg0: i32, %arg1: i32) -> (i32, i32) {
    %c0_i32 = arith.constant 0 : i32
    %c0_i32_0 = arith.constant 0 : i32
    %c0_i32_1 = arith.constant 0 : i32
    return %c0_i32, %c0_i32_0 : i32, i32
  }
  func.func @transform_4(%arg0: i32, %arg1: i32) -> (i32, i32) {
    %c0_i32 = arith.constant 0 : i32
    %c0_i32_0 = arith.constant 0 : i32
    %c0_i32_1 = arith.constant 0 : i32
    return %c0_i32, %c0_i32_0 : i32, i32
  }
  func.func @transform_5(%arg0: i32, %arg1: i32) -> (i32, i32) {
    %c0_i32 = arith.constant 0 : i32
    %c0_i32_0 = arith.constant 0 : i32
    %c0_i32_1 = arith.constant 0 : i32
    return %c0_i32, %c0_i32_0 : i32, i32
  }
  func.func @transform_6(%arg0: i32, %arg1: i32) -> (i32, i32, i32) {
    %c0_i32 = arith.constant 0 : i32
    %c0_i32_0 = arith.constant 0 : i32
    return %arg0, %arg1, %c0_i32 : i32, i32, i32
  }
}

</mosaic_0001>

<bundles_post_ra>
// kernel: tpu_custom_call.1
= control target key start
LH: loop header
LB: loop body
LE: loop exit
PB: predicated region body
PF: predicated region fallthrough
CT: control target
= control target key end

     0   :  { %s5447_s0 = inlined_call_operand.hbm [shape: bf16[2,512,128], index: 0, kind: input, shape index: {}]   ;;  %s5448_s1 = inlined_call_operand.vmem [shape: f32[1,128], index: 1, kind: input, shape index: {}]   ;;  %s5449_s2 = inlined_call_operand.vmem [shape: f32[1,128], index: 2, kind: input, shape index: {}]   ;;  %s5450_s3 = inlined_call_operand.hbm [shape: bf16[128,512], index: 3, kind: input, shape index: {}]   ;;  %s5451_s4 = inlined_call_operand.hbm [shape: bf16[512,128], index: 4, kind: input, shape index: {}]   ;;  %s5452_s5 = inlined_call_operand.hbm [shape: bf16[128,128], index: 5, kind: input, shape index: {}]   ;;  %s5453_s6 = inlined_call_operand.hbm [shape: bf16[2,512,128], index: 6, kind: output, shape index: {}]  }
   0x1   :  { %5510 = sst [smem:[#allocation62_spill]] %s5450_s3 }
   0x2   :  { %5511 = sst [smem:[#allocation63_spill]] %s5451_s4 }
   0x3   :  { %5512 = sst [smem:[#allocation64_spill]] %s5452_s5 }
   0x4   :  { %5513 = sst [smem:[#allocation65_spill]] %s5453_s6 }
   0x5   :  { %11 = vsyncpa [#allocation4], 0 }
   0x6   :  { %13 = vsyncpa [#allocation4 + $0x1], 0 }
   0x7   :  { %14 = vsyncpa [#allocation7], 0 }
   0x8   :  { %15 = vsyncpa [#allocation10], 0 }
   0x9   :  { %16 = vsyncpa [#allocation5], 0 }
   0xa   :  { %18 = vsyncpa [#allocation5 + $0x1], 0  ;;  %s4275_s21 = smov 0   ;;  %s4277_s22 = smov 0  }
   0xb   :  { %s4279_s23 = smov 0   ;;  %s4281_s24 = smov 0  }
   0xc   :  { %s4283_s25 = smov 0   ;;  %s4285_s26 = smov 0  }
   0xd   :  { %s4287_s27 = smov 0   ;;  %s4289_s28 = smov 0  }
   0xe LB: > { %5514 = sst [smem:[#allocation16_spill]] %s4197_s21  ;;  %s3000_s29 = sadd.s32 4294967295, %s4225_s28   ;;  %s4225_s28 = sphi %s4289_s28, %s24_s28   ;;  %s4221_s27 = sphi %s4287_s27, %s5700_s27   ;;  %s4217_s26 = sphi %s4285_s26, %s5695_s26   ;;  %s4213_s25 = sphi %s4283_s25, %s5699_s25   ;;  %s4209_s24 = sphi %s4281_s24, %s5694_s24   ;;  %s4205_s23 = sphi %s4279_s23, %s5698_s23   ;;  %s4201_s22 = sphi %s4277_s22, %s5697_s22   ;;  %s4197_s21 = sphi %s4275_s21, %s5696_s21  }
   0xf   : > { %5515 = sst [smem:[#allocation17_spill]] %s4217_s26  ;;  %s3001_s30 = sadd.s32 4294967294, %s4225_s28  }
  0x10   : > { %p58_p0 = scmp.ne.s32.totalorder %s4201_s22, %s4197_s21  ;;  %p4319_p1 = scmp.eq.s32.totalorder %s3000_s29, 0 }
  0x11   : > { %p4323_p2 = scmp.eq.s32.totalorder %s3000_s29, 3  ;;  %p195_p3 = scmp.eq.s32.totalorder %s3001_s30, 3 }
  0x12   : > { %s5516_s7 = scalar_select %p4319_p1, 1, 0 }
  0x13   : > { %p4329_p4 = por %p4319_p1, %p58_p0  ;;  %p3002_p5 = scmp.ge.s32.totalorder %s4225_s28, 1 }
  0x14   : > { %p4334_p6 = por %p195_p3, %p58_p0  ;;  %p202_p7 = scmp.lt.s32.totalorder %s4225_s28, 5 }
  0x15   : > { %s5518_s9 = scalar_select %p4329_p4, 1, 0 }
  0x16   : > { %s5519_s10 = scalar_select %p4334_p6, 1, 0 }
  0x17   : > { %p4339_p8 = pnand %p3002_p5, %p202_p7  ;;  %s4227_s12 = smov [#allocation6]  }
  0x18   : > { %5520 = sst [smem:[#allocation18_spill]] %s5519_s10  ;;  %s220_s13 = sshll.u32 %s4227_s12, 4  ;;  %s221_s13 = int_to_ptr.vmem [resolvable:$true] %s220_s13 }
  0x19   : > { %p3697_p9 = pneg %p4339_p8  ;;  %s4228_s15 = smov [#allocation8]  }
  0x1a   : > { %s233_s16 = sshll.u32 %s4228_s15, 4  ;;  %s4026_s17 = scalar_lea.vmem %s221_s13, 4096  ;;  %s234_s16 = int_to_ptr.vmem [resolvable:$true] %s233_s16 }
  0x1b   : > { %p4347_p10 = pnand %p3697_p9, %p4319_p1  ;;  %p4027_p12 = scmp.ne.s32.totalorder %s221_s13, %s4026_s17 }
  0x1c   : > { %p4034_p3 = scmp.lt.s32.totalorder %s221_s13, %s221_s13  ;;  %p4035_p5 = scmp.lt.s32.totalorder %s4026_s17, %s4026_s17 }
  0x1d   : > { %p4017_p11 = pneg %p4347_p10 }
  0x1e   : > { %p4036_p7 = por %p4035_p5, %p4034_p3 }
  0x1f   : > { %p4029_p13 = pnand %p4027_p12, %p4017_p11 }
  0x21   : > { %p4030_p0 = pneg %p4029_p13 }
  0x23   : > { %p4037_p9 = pnand %p4036_p7, %p4030_p0 }
  0x25   : > { %4040 = shalt.err (!%p4037_p9)
}
  0x26   : > { %s4229_s18 = smov 256   ;;  %s4230_s19 = smov 16  }
  0x27   : > { %s5523_s3 = sld [smem:[#allocation62_spill]]  ;;  %s4052_s30 = scalar_lea.vmem %s234_s16, 4096 }
  0x28   : > { %p4053_p6 = scmp.ne.s32.totalorder %s234_s16, %s4052_s30  ;;  %p4060_p1 = scmp.lt.s32.totalorder %s234_s16, %s234_s16 }
  0x29   : > { %p4061_p4 = scmp.lt.s32.totalorder %s4052_s30, %s4052_s30 }
  0x2a   : > { %p4055_p12 = pnand %p4053_p6, %p4017_p11 }
  0x2b   : > { %p4062_p3 = por %p4061_p4, %p4060_p1 }
  0x2c   : > { %p4056_p13 = pneg %p4055_p12 }
  0x2d   : > { %3700 = dma.hbm_to_vmem [thread:$0]  (!%p4347_p10), %s5523_s3, 4096, %s221_s13, [#allocation7], %s4229_s18, %s4229_s18, %s4230_s19  }
  0x2e   : > { %p4063_p0 = pnand %p4062_p3, %p4056_p13 }
  0x30   : > { %4066 = shalt.err (!%p4063_p0)
}
  0x31   : > { %s5457_s12 = smov 64   ;;  %s5458_s15 = smov 4  }
  0x32   : > { %s5524_s4 = sld [smem:[#allocation63_spill]]  ;;  %s4233_s18 = smov [#allocation9]  }
  0x33   : > { %s246_s19 = sshll.u32 %s4233_s18, 4  ;;  %s247_s19 = int_to_ptr.vmem [resolvable:$true] %s246_s19 }
  0x34   : > { %s4078_s20 = scalar_lea.vmem %s247_s19, 1024  ;;  %p4086_p5 = scmp.lt.s32.totalorder %s247_s19, %s247_s19 }
  0x35   : > { %p4079_p6 = scmp.ne.s32.totalorder %s247_s19, %s4078_s20  ;;  %p4087_p7 = scmp.lt.s32.totalorder %s4078_s20, %s4078_s20 }
  0x37   : > { %p4081_p1 = pnand %p4079_p6, %p4017_p11  ;;  %p4088_p9 = por %p4087_p7, %p4086_p5 }
  0x38   : > { %3703 = dma.hbm_to_vmem [thread:$0]  (!%p4347_p10), %s5524_s4, 4096, %s234_s16, [#allocation7], %s5457_s12, %s5457_s12, %s5458_s15  }
  0x39   : > { %p4082_p4 = pneg %p4081_p1 }
  0x3b   : > { %p4089_p12 = pnand %p4088_p9, %p4082_p4 }
  0x3d   : > { %4092 = shalt.err (!%p4089_p12)
}
  0x3e   : > { %s5525_s5 = sld [smem:[#allocation64_spill]]  ;;  %s33_s14 = sadd.s32 1, %s4217_s26 }
  0x3f   : > { %p34_p11 = scmp.ge.s32.totalorder %s33_s14, 2  ;;  %s36_s30 = sadd.s32 1, %s4221_s27 }
  0x40   : > { %s45_s13 = sadd.s32 1, %s4205_s23  ;;  %p52_p13 = scmp.ne.s32.totalorder %s4205_s23, %s4201_s22 }
  0x41   : > { %s5702_s14 = smov (%p34_p11, %s33_s14), 0  ;;  %s5704_s30 = smov (!%p34_p11, %s36_s30), %s4221_s27 }
  0x42   : > { %5526 = sst [smem:[#allocation19_spill]] %s5702_s14  ;;  %s41_s17 = ssub.s32 %s4217_s26, %s5702_s14 }
  0x43   : > { %p53_p3 = scmp.eq.s32.totalorder %s4225_s28, 0  ;;  %p38_p0 = scmp.ge.s32.totalorder %s5704_s30, 2 }
  0x44   : > { %3706 = dma.hbm_to_vmem [thread:$0]  (!%p4347_p10), %s5525_s5, 1024, %s247_s19, [#allocation10], %s5457_s12, %s5457_s12, %s5458_s15  }
  0x45   : > { %p4396_p6 = por %p4323_p2, %p52_p13  ;;  %p4400_p10 = por %p53_p3, %p52_p13 }
  0x46   : > { %p3718_p1 = scmp.lt.s32.totalorder %s4225_s28, 4  ;;  %s5706_s30 = smov (%p38_p0, %s5704_s30), 0 }
  0x47   : > { %s260_s20 = sand.u32 1, %s4205_s23   ;;  %s3008_s16 = sshll.u32 %s4217_s26, 5 }
  0x48   : > { %s40_s29 = ssub.s32 %s4221_s27, %s5706_s30  ;;  %s3007_s15 = sshll.u32 %s260_s20, 7 }
  0x49   : > { %s42_s12 = sor.u32 %s41_s17, %s40_s29  ;;  %s3009_s8 = sshll.u32 %s4221_s27, 6 }
  0x4a   : > { %p43_p4 = scmp.eq.s32.totalorder %s42_s12, 0  ;;  %s264_s3 = scalar_lea.vmem [#allocation3], %s3007_s15 }
  0x4b   : > { %s273_s4 = sshll.u32 %s264_s3, 4  ;;  %s270_s14 = sadd.s32 %s3009_s8, %s3008_s16  ;;  %s274_s4 = int_to_ptr.vmem [resolvable:$true] %s273_s4 }
  0x4c   : > { %s4413_s5 = scalar_select %p43_p4, %s4205_s23, %s45_s13  }
  0x4d   : > { %s3010_s10 = sshll.u32 %s270_s14, 6  ;;  %p4419_p2 = pnand %p3718_p1, %p4400_p10 }
  0x4e   : > { %s272_s17 = scalar_lea.hbm %s5447_s0, %s3010_s10  ;;  %s261_s12 = scalar_lea.sflag [#allocation4], %s260_s20 }
  0x4f   : > { %p4095_p5 = pneg %p4419_p2  ;;  %s4106_s3 = scalar_lea.vmem %s274_s4, 2048 }
  0x50   : > { %p4107_p7 = scmp.ne.s32.totalorder %s274_s4, %s4106_s3  ;;  %s4234_s15 = smov [#allocation3]  }
  0x51   : > { %s4111_s14 = sshll.u32 %s4234_s15, 4  ;;  %s4112_s14 = int_to_ptr.vmem [resolvable:$false] %s4111_s14 }
  0x52   : > { %p4109_p9 = pnand %p4107_p7, %p4095_p5  ;;  %s4113_s13 = scalar_lea.vmem %s4112_s14, 4096 }
  0x53   : > { %p4114_p11 = scmp.lt.s32.totalorder %s274_s4, %s4112_s14  ;;  %p4115_p13 = scmp.lt.s32.totalorder %s4113_s13, %s4106_s3 }
  0x54   : > { %p4110_p12 = pneg %p4109_p9 }
  0x55   : > { %p4116_p3 = por %p4115_p13, %p4114_p11 }
  0x57   : > { %p4117_p0 = pnand %p4116_p3, %p4110_p12 }
  0x59   : > { %4120 = shalt.err (!%p4117_p0)
}
  0x5a   : > { %s5530_s6 = smov 4   ;;  %s5531_s26 = smov 64  }
  0x5b   : > { %3710 = dma.hbm_to_vmem [thread:$0]  (!%p4419_p2), %s272_s17, 2048, %s274_s4, %s261_s12, %s5531_s26, %s5531_s26, %s5530_s6  }
  0x5c   : > { %285 = sbr.rel (%p4339_p8) target bundleno = 789 (0x315), region = 44 }
  0x61   : > { %s4436_s10 = sand.u32 1, %s4201_s22   ;;  %p5532_p10 = scmp.ne.s32.totalorder %s5518_s9, 0 }
  0x62   : > { %s3012_s19 = sshll.u32 %s4436_s10, 7  ;;  %s288_s20 = scalar_lea.sflag [#allocation4], %s4436_s10 }
  0x63   : > { %s4440_s16 = scalar_lea.vmem [#allocation3], %s3012_s19 }
  0x64   : > { %4180 = dma.done.wait (%p5532_p10), %s288_s20, 2048  }
  0x65   : > { %4182 = vsyncadd (%p5532_p10), %s288_s20, 4294965248  ;;  %p5533_p1 = scmp.ne.s32.totalorder %s5516_s7, 0 }
  0x67   : > { %4184 = dma.done.wait (%p5533_p1), [#allocation7], 8192  }
  0x68   : > { %4186 = vsyncadd (%p5533_p1), [#allocation7], 4294959104 }
  0x69   : > { %4188 = dma.done.wait (%p5533_p1), [#allocation10], 1024  }
  0x6a   : > { %4190 = vsyncadd (%p5533_p1), [#allocation10], 4294966272  ;;  %s4454_s4 = scalar_lea.vmem [#allocation11], %s3012_s19  ;;  %p3017_p8 = scmp.ne.s32.totalorder %s4209_s24, 0 }
  0x6c   : > { %338 = sbr.rel (%p3017_p8) target bundleno = 115 (0x73), region = 64 }
  0x71   : > { %v4235_v0 = vmov 0.0  }
  0x72   : > { %339 = vst [vmem:[#allocation2] sm:$0x1] %v4235_v0 }
  0x73 PF: > { %v3798_v1 = vld [vmem:[#allocation6 + $0xe4] ss:$16 sps:$4 sm:$0xff]   ;;  %v3800_v2 = vld [vmem:[#allocation6 + $0xe0] ss:$16 sps:$4 sm:$0xff]   ;;  %v5468_v3 = vmov 0   ;;  %v436_v7 = vlaneseq  ;;  %v4463_v16 = vld [vmem:[%s4440_s16 + $0x78] sm:$0xff]  }
  0x74   : > { %988 = vmatprep.mubr.bf16.mxu0 %v5468_v3  ;;  %1108 = vmatprep.mubr.bf16.mxu1 %v5468_v3  ;;  %v3801_v4 = vld [vmem:[#allocation6 + $0xc4] ss:$16 sps:$4 sm:$0xff]   ;;  %v3803_v5 = vld [vmem:[#allocation6 + $0xc0] ss:$16 sps:$4 sm:$0xff]   ;;  %v4466_v17 = vunpack.c.h.bf16 %v4463_v16  ;;  %v4470_v18 = vld [vmem:[%s4440_s16 + $0x58] sm:$0xff]   ;;  %s3158_s17 = sshll.u32 %s4209_s24, 5 }
  0x75   : > { %956 = vmatprep.subr.bf16.mxu0 %v3798_v1  ;;  %3665 = vmatprep.subr.bf16.mxu1 %v3798_v1  ;;  %v3804_v6 = vld [vmem:[#allocation6 + $0xa4] ss:$16 sps:$4 sm:$0xff]   ;;  %v3806_v8 = vld [vmem:[#allocation6 + $0xa0] ss:$16 sps:$4 sm:$0xff]   ;;  %v4459_v10 = vshrl.u32 %v436_v7, 7  ;;  %v5464_v23 = vunpack.c.h.bf16 %v4470_v18  ;;  %v3339_v31 = vld [vmem:[%s4440_s16 + $0x8] sm:$0xff]  }
  0x76   : > { %957 = vmatpush1.bf16.msra.mxu0 %v3800_v2  ;;  %3673 = vmatpush1.bf16.msra.mxu1 %v3800_v2  ;;  %v3807_v9 = vld [vmem:[#allocation6 + $0x84] ss:$16 sps:$4 sm:$0xff]   ;;  %v3809_v12 = vld [vmem:[#allocation6 + $0x80] ss:$16 sps:$4 sm:$0xff]   ;;  %v435_v25 = vrot.slane %v4466_v17, 7  ;;  %v3351_v32 = vld [vmem:[%s4440_s16 + $0x68] sm:$0xff]   ;;  %v3201_v37 = vunpack.c.l.bf16 %v3339_v31  ;;  %v3202_v41 = vunpack.c.h.bf16 %v3339_v31 }
  0x77   : > { %958 = vmatprep.subr.bf16.mxu0 %v3801_v4  ;;  %3666 = vmatprep.subr.bf16.mxu1 %v3801_v4  ;;  %v3196_v11 = vld [vmem:[%s4440_s16] sm:$0xff]   ;;  %vm438_vm0 = vcmp.lt.s32.totalorder %v4459_v10, 1  ;;  %vm502_vm1 = vcmp.eq.s32.totalorder %v4459_v10, 0  ;;  %v4483_v29 = vrot.slane %v5464_v23, 7  ;;  %v4501_v39 = vld [vmem:[%s5448_s1] ss:$0 sm:$0xff]  ;;  %v3249_v42 = vunpack.c.l.bf16 %v3351_v32 }
  0x78   : > { %v3810_v13 = vld [vmem:[#allocation6 + $0x64] ss:$16 sps:$4 sm:$0xff]   ;;  %v3197_v14 = vunpack.c.l.bf16 %v3196_v11  ;;  %v3198_v15 = vunpack.c.h.bf16 %v3196_v11  ;;  %v3812_v27 = vld [vmem:[#allocation6 + $0x60] ss:$16 sps:$4 sm:$0xff]   ;;  %v406_v48 = vrot.slane %v3201_v37, 7  ;;  %v407_v49 = vrot.slane %v3202_v41, 7 }
  0x79   : > { %v3350_v19 = vld [vmem:[%s4440_s16 + $0x60] sm:$0xff]   ;;  %v3018_v22 = vld [vmem:[#allocation2] ss:$0 sm:$0xff]  ;;  %v3250_v50 = vunpack.c.h.bf16 %v3351_v32  ;;  %v430_v55 = vrot.slane %v3249_v42, 7  ;;  %v4528_v56 = vld [vmem:[%s4440_s16 + $0x10] sm:$0xff]   ;;  %s3159_s12 = sshll.u32 %s4213_s25, 6 }
  0x7a   : > { %959 = vmatpush1.bf16.msra.mxu0 %v3803_v5  ;;  %3674 = vmatpush1.bf16.msra.mxu1 %v3803_v5  ;;  %v404_v20 = vrot.slane %v3197_v14, 7  ;;  %v405_v21 = vrot.slane %v3198_v15, 7  ;;  %v3245_v24 = vunpack.c.l.bf16 %v3350_v19  ;;  %573 = vst [vmem:[#allocation2 - $0x7] sm:$0x80] %v4466_v17  ;;  %v3246_v26 = vunpack.c.h.bf16 %v3350_v19  ;;  %v3813_v33 = vld [vmem:[#allocation6 + $0x44] ss:$16 sps:$4 sm:$0xff]   ;;  %s2878_s3 = sadd.s32 %s3159_s12, %s3158_s17 }
  0x7b   : > { %960 = vmatprep.subr.bf16.mxu0 %v3804_v6  ;;  %3667 = vmatprep.subr.bf16.mxu1 %v3804_v6  ;;  %v3815_v46 = vld [vmem:[#allocation6 + $0x40] ss:$16 sps:$4 sm:$0xff]   ;;  %v3816_v51 = vld [vmem:[#allocation6 + $0x24] ss:$16 sps:$4 sm:$0xff]   ;;  %v467_v58 = vsel %vm438_vm0, %v406_v48, %v407_v49  ;;  %v4536_v60 = vrot.slane %v3250_v50, 7  ;;  %v3205_v4 = vunpack.c.l.bf16 %v4528_v56  ;;  %s3160_s24 = sshll.u32 %s2878_s3, 6 }
  0x7c   : > { %v4479_v28 = vsel %vm438_vm0, %v404_v20, %v405_v21  ;;  %v428_v30 = vrot.slane %v3245_v24, 7  ;;  %v470_v34 = vsel %vm438_vm0, %v435_v25, %v404_v20  ;;  %v429_v36 = vrot.slane %v3246_v26, 7  ;;  %v3020_v61 = vld [vmem:[%s5449_s2] ss:$0 sm:$0xff]  ;;  %v3818_v0 = vld [vmem:[#allocation6 + $0x20] ss:$16 sps:$4 sm:$0xff]  }
  0x7d   : > { %v4492_v35 = vsub.f32 %v3198_v15, %v4479_v28  ;;  %v4496_v38 = vsel %vm502_vm1, %v3018_v22, %v470_v34  ;;  %v468_v59 = vsel %vm438_vm0, %v405_v21, %v406_v48  ;;  %v579_v63 = vsub.f32 %v3202_v41, %v467_v58  ;;  %v3819_v5 = vld [vmem:[#allocation6 + $0x4] ss:$16 sps:$4 sm:$0xff]   ;;  %v3821_v19 = vld [vmem:[#allocation6] ss:$16 sps:$4 sm:$0xff]   ;;  %v3846_v41 = vld [vmem:[#allocation8 + $0x78] sm:$0xff]   ;;  %s2881_s25 = sshll.u32 %s4454_s4, 4  ;;  %s5392_s25 = int_to_ptr.vmem [resolvable:$true] %s2881_s25 }
  0x7e   : > { %961 = vmatpush1.bf16.msra.mxu0 %v3806_v8  ;;  %3675 = vmatpush1.bf16.msra.mxu1 %v3806_v8  ;;  %v4506_v40 = vsel %vm438_vm0, %v4483_v29, %v428_v30  ;;  %v4509_v43 = vsub.f32 %v3197_v14, %v4496_v38  ;;  %v4513_v44 = vsel %vm438_vm0, %v428_v30, %v429_v36  ;;  %v3352_v15 = vld [vmem:[%s4440_s16 + $0x70] sm:$0xff]   ;;  %v3822_v48 = vld [vmem:[#allocation6 + $0xe8] ss:$16 sps:$4 sm:$0xff]   ;;  %v3864_v10 = vld [vmem:[#allocation8 + $0x40] sm:$0xff]   ;;  %s5690_s13 = sld [smem:[#allocation65_spill]]  ;;  %s2866_s26 = scalar_lea.sflag [#allocation5], %s4436_s10 }
  0x7f   : > { %962 = vmatprep.subr.bf16.mxu0 %v3807_v9  ;;  %3668 = vmatprep.subr.bf16.mxu1 %v3807_v9  ;;  %5534 = vst [vmem:[#allocation20_spill] sm:$0xff] %v4506_v40  ;;  %5535 = vst [vmem:[#allocation21_spill] sm:$0xff] %v4513_v44  ;;  %v4516_v45 = vsub.f32 %v3245_v24, %v4506_v40  ;;  %v4519_v47 = vsub.f32 %v3246_v26, %v4513_v44  ;;  %v3206_v9 = vunpack.c.h.bf16 %v4528_v56  ;;  %v3824_v26 = vld [vmem:[#allocation6 + $0xec] ss:$16 sps:$4 sm:$0xff]   ;;  %s4121_s19 = scalar_lea.vmem %s5392_s25, 2048  ;;  %s4237_s20 = smov [#allocation11]  }
  0x80   : > { %v614_v52 = vmul.f32 %v4501_v39, %v4509_v43  ;;  %v615_v53 = vmul.f32 %v4501_v39, %v4492_v35  ;;  %v578_v62 = vsub.f32 %v3201_v37, %v468_v59  ;;  %v4544_v1 = vsel %vm438_vm0, %v430_v55, %v4536_v60  ;;  %p4122_p4 = scmp.ne.s32.totalorder %s5392_s25, %s4121_s19 }
  0x81   : > { %5536 = vst [vmem:[#allocation22_spill] sm:$0xff] %v4516_v45  ;;  %5537 = vst [vmem:[#allocation23_spill] sm:$0xff] %v4519_v47  ;;  %v638_v54 = vmul.f32 %v4501_v39, %v4516_v45  ;;  %v639_v57 = vmul.f32 %v4501_v39, %v4519_v47  ;;  %v4548_v2 = vsel %vm438_vm0, %v429_v36, %v430_v55  ;;  %v408_v24 = vrot.slane %v3205_v4, 7 }
  0x82   : > { %963 = vmatpush1.bf16.msra.mxu0 %v3809_v12  ;;  %3676 = vmatpush1.bf16.msra.mxu1 %v3809_v12  ;;  %5538 = vst [vmem:[#allocation24_spill] sm:$0xff] %v4544_v1  ;;  %5539 = vst [vmem:[#allocation25_spill] sm:$0xff] %v4548_v2  ;;  %v646_v6 = vadd.f32 %v614_v52, %v4496_v38  ;;  %v647_v7 = vadd.f32 %v615_v53, %v4479_v28  ;;  %v409_v32 = vrot.slane %v3206_v9, 7  ;;  %v3827_v52 = vld [vmem:[#allocation6 + $0xcc] ss:$16 sps:$4 sm:$0xff]   ;;  %p4123_p2 = pnand %p4122_p4, %p4396_p6 }
  0x83   : > { %964 = vmatprep.subr.bf16.mxu0 %v3810_v13  ;;  %3669 = vmatprep.subr.bf16.mxu1 %v3810_v13  ;;  %v670_v8 = vadd.f32 %v638_v54, %v4506_v40  ;;  %v671_v11 = vadd.f32 %v639_v57, %v4513_v44  ;;  %v686_v12 = vmul.f32 %v3020_v61, %v578_v62  ;;  %v3253_v36 = vunpack.c.l.bf16 %v3352_v15 }
  0x84   : > { %v687_v13 = vmul.f32 %v3020_v61, %v579_v63  ;;  %v4557_v14 = vsub.f32 %v3249_v42, %v4548_v2  ;;  %v616_v20 = vmul.f32 %v4501_v39, %v578_v62  ;;  %v617_v21 = vmul.f32 %v4501_v39, %v579_v63  ;;  %s5390_s6 = scalar_lea.hbm %s5690_s13, %s3160_s24  ;;  %p4124_p5 = pneg %p4123_p2 }
  0x85   : > { %v4563_v22 = vsub.f32 %v3250_v50, %v4544_v1  ;;  %v3257_v37 = vunpack.c.l.bf16 %v4463_v16  ;;  %v4577_v42 = vpack.c.bf16 %v647_v7, %v646_v6  ;;  %v4589_v54 = vsel %vm438_vm0, %v408_v24, %v409_v32  ;;  %v3825_v7 = vld [vmem:[#allocation6 + $0xc8] ss:$16 sps:$4 sm:$0xff]  }
  0x86   : > { %965 = vmatpush1.bf16.msra.mxu0 %v3812_v27  ;;  %3677 = vmatpush1.bf16.msra.mxu1 %v3812_v27  ;;  %5540 = vst [vmem:[#allocation26_spill] sm:$0xff] %v4557_v14  ;;  %v4565_v27 = vadd.f32 %v686_v12, %v468_v59  ;;  %v4567_v30 = vadd.f32 %v687_v13, %v467_v58  ;;  %v3254_v55 = vunpack.c.h.bf16 %v3352_v15  ;;  %v432_v56 = vrot.slane %v3253_v36, 7  ;;  %v3837_v50 = vld [vmem:[#allocation6 + $0x48] ss:$16 sps:$4 sm:$0xff]  }
  0x87   : > { %966 = vmatprep.subr.bf16.mxu0 %v3813_v33  ;;  %3670 = vmatprep.subr.bf16.mxu1 %v3813_v33  ;;  %5541 = vst [vmem:[#allocation27_spill] sm:$0xff] %v4563_v22  ;;  %v640_v31 = vmul.f32 %v4501_v39, %v4557_v14  ;;  %v4572_v33 = vld [vmem:[%s4440_s16 + $0x18] sm:$0xff]   ;;  %v641_v34 = vmul.f32 %v4501_v39, %v4563_v22  ;;  %v434_v15 = vrot.slane %v3257_v37, 7  ;;  %v3860_v22 = vld [vmem:[#allocation8 + $0x48] sm:$0xff]   ;;  %v3862_v14 = vld [vmem:[#allocation8 + $0xf0] sm:$0xff]  }
  0x88   : > { %v648_v53 = vadd.f32 %v616_v20, %v468_v59  ;;  %v649_v57 = vadd.f32 %v617_v21, %v467_v58  ;;  %v3209_v62 = vunpack.c.l.bf16 %v4572_v33  ;;  %v3210_v63 = vunpack.c.h.bf16 %v4572_v33  ;;  %v3847_v58 = vld [vmem:[#allocation8 + $0x38] sm:$0xff]  }
  0x89   : > { %v672_v61 = vadd.f32 %v640_v31, %v4548_v2  ;;  %v4604_v6 = vsel %vm438_vm0, %v4536_v60, %v432_v56  ;;  %v3828_v33 = vld [vmem:[#allocation6 + $0xa8] ss:$16 sps:$4 sm:$0xff]  }
  0x8a   : > { %967 = vmatpush1.bf16.msra.mxu0 %v3815_v46  ;;  %3678 = vmatpush1.bf16.msra.mxu1 %v3815_v46  ;;  %v4579_v46 = vpack.c.bf16 %v671_v11, %v670_v8  ;;  %5542 = vst [vmem:[#allocation28_spill] sm:$0xff] %v4604_v6  ;;  %v4607_v8 = vsub.f32 %v3206_v9, %v4589_v54  ;;  %v410_v12 = vrot.slane %v3209_v62, 7  ;;  %v411_v13 = vrot.slane %v3210_v63, 7 }
  0x8b   : > { %968 = vmatprep.subr.bf16.mxu0 %v3816_v51  ;;  %3671 = vmatprep.subr.bf16.mxu1 %v3816_v51  ;;  %v4585_v51 = vsel %vm438_vm0, %v407_v49, %v408_v24  ;;  %v673_v49 = vadd.f32 %v641_v34, %v4544_v1  ;;  %v4610_v11 = vsub.f32 %v3253_v36, %v4604_v6  ;;  %v3857_v1 = vld [vmem:[#allocation8 + $0xf8] sm:$0xff]  }
  0x8c   : > { %v4599_v59 = vsub.f32 %v3205_v4, %v4585_v51  ;;  %v3830_v4 = vld [vmem:[#allocation6 + $0xac] ss:$16 sps:$4 sm:$0xff]   ;;  %v4626_v21 = vpack.c.bf16 %v649_v57, %v648_v53  ;;  %v619_v34 = vmul.f32 %v4501_v39, %v4607_v8  ;;  %v4644_v53 = vsel %vm438_vm0, %v409_v32, %v410_v12 }
  0x8d   : > { %5543 = vst [vmem:[#allocation29_spill] sm:$0xff] %v4610_v11  ;;  %v4630_v31 = vpack.c.bf16 %v673_v49, %v672_v61  ;;  %v642_v36 = vmul.f32 %v4501_v39, %v4610_v11  ;;  %v4653_v57 = vsel %vm438_vm0, %v434_v15, %v435_v25  ;;  %v3850_v49 = vld [vmem:[#allocation8 + $0x68] sm:$0xff]  }
  0x8e   : > { %969 = vmatpush1.bf16.msra.mxu0 %v3818_v0  ;;  %3679 = vmatpush1.bf16.msra.mxu1 %v3818_v0  ;;  %v4595_v0 = vld [vmem:[%s4440_s16 + $0x20] sm:$0xff]   ;;  %v618_v24 = vmul.f32 %v4501_v39, %v4599_v59  ;;  %5546 = vst [vmem:[#allocation32_spill] sm:$0xff] %v4653_v57 }
  0x8f   : > { %970 = vmatprep.subr.bf16.mxu0 %v3819_v5  ;;  %3672 = vmatprep.subr.bf16.mxu1 %v3819_v5  ;;  %v433_v5 = vrot.slane %v3254_v55, 7  ;;  %v3213_v9 = vunpack.c.l.bf16 %v4595_v0 }
  0x90   : > { %v650_v32 = vadd.f32 %v618_v24, %v4585_v51 }
  0x91   : > { %v4616_v60 = vsel %vm438_vm0, %v432_v56, %v433_v5  ;;  %v412_v56 = vrot.slane %v3213_v9, 7  ;;  %v4657_v61 = vsel %vm438_vm0, %v433_v5, %v434_v15 }
  0x92   : > { %971 = vmatpush1.bf16.msra.mxu0 %v3821_v19  ;;  %3680 = vmatpush1.bf16.msra.mxu1 %v3821_v19  ;;  %5544 = vst [vmem:[#allocation30_spill] sm:$0xff] %v4616_v60  ;;  %v3848_v19 = vld [vmem:[#allocation8 + $0x70] sm:$0xff]   ;;  %v4623_v20 = vsub.f32 %v3254_v55, %v4616_v60  ;;  %v3214_v55 = vunpack.c.h.bf16 %v4595_v0  ;;  %5547 = vst [vmem:[#allocation33_spill] sm:$0xff] %v4657_v61  ;;  %v4674_v15 = vsub.f32 %v3257_v37, %v4657_v61  ;;  %v3852_v0 = vld [vmem:[#allocation8 + $0x60] sm:$0xff]  }
  0x93   : > { %1149 = vmatprep.subr.bf16.mxu1 %v3824_v26  ;;  %3369 = vmatprep.subr.bf16.mxu0 %v3846_v41  ;;  %v3849_v26 = vld [vmem:[#allocation8 + $0x30] sm:$0xff]   ;;  %v4638_v41 = vsel %vm438_vm0, %v410_v12, %v411_v13  ;;  %v651_v12 = vadd.f32 %v619_v34, %v4589_v54 }
  0x94   : > { %5545 = vst [vmem:[#allocation31_spill] sm:$0xff] %v4623_v20  ;;  %v4666_v25 = vsub.f32 %v3210_v63, %v4638_v41  ;;  %5548 = vst [vmem:[#allocation34_spill] sm:$0xff] %v4674_v15  ;;  %v413_v24 = vrot.slane %v3214_v55, 7  ;;  %v3851_v63 = vld [vmem:[#allocation8 + $0x28] sm:$0xff]  }
  0x95   : > { %989 = vmatmul.mubr.bf16.vlgmr.msra.gmra.mxu0 %v4577_v42  ;;  %1109 = vmatmul.mubr.bf16.vlgmr.msra.gmra.mxu1 %v4579_v46  ;;  %v4683_v34 = vpack.c.bf16 %v651_v12, %v650_v32 }
  0x96   : > { %1150 = vmatpush1.bf16.msra.mxu1 %v3822_v48  ;;  %998 = vmatprep.mubr.bf16.mxu0 %v5468_v3  ;;  %v3833_v48 = vld [vmem:[#allocation6 + $0x8c] ss:$16 sps:$4 sm:$0xff]   ;;  %v621_v37 = vmul.f32 %v4501_v39, %v4666_v25  ;;  %v4701_v32 = vsel %vm438_vm0, %v412_v56, %v413_v24 }
  0x97   : > { %1151 = vmatprep.subr.bf16.mxu1 %v3827_v52  ;;  %1118 = vmatprep.mubr.bf16.mxu1 %v5468_v3  ;;  %v643_v52 = vmul.f32 %v4501_v39, %v4623_v20  ;;  %v4710_v23 = vsub.f32 %v3214_v55, %v4701_v32 }
  0x98   : > { %3370 = vmatpush3.bf16.msra.mxu0 %v3847_v58  ;;  %v3831_v58 = vld [vmem:[#allocation6 + $0x88] ss:$16 sps:$4 sm:$0xff]  }
  0x99   : > { %3371 = vmatprep.subr.bf16.mxu0 %v3848_v19  ;;  %v674_v19 = vadd.f32 %v642_v36, %v4604_v6  ;;  %v675_v5 = vadd.f32 %v643_v52, %v4616_v60  ;;  %v3834_v36 = vld [vmem:[#allocation6 + $0x68] ss:$16 sps:$4 sm:$0xff]  }
  0x9a   : > { %1152 = vmatpush1.bf16.msra.mxu1 %v3825_v7  ;;  %v4663_v7 = vsub.f32 %v3209_v62, %v4644_v53  ;;  %v4678_v62 = vsub.f32 %v4466_v17, %v4653_v57  ;;  %v4691_v17 = vsel %vm438_vm0, %v411_v13, %v412_v56  ;;  %v4713_v56 = vld [vmem:[%s4440_s16 + $0x30] sm:$0xff]  }
  0x9b   : > { %1153 = vmatprep.subr.bf16.mxu1 %v3830_v4  ;;  %v3836_v4 = vld [vmem:[#allocation6 + $0x6c] ss:$16 sps:$4 sm:$0xff]  }
  0x9c   : > { %3372 = vmatpush3.bf16.msra.mxu0 %v3849_v26  ;;  %5549 = vst [vmem:[#allocation35_spill] sm:$0xff] %v4678_v62  ;;  %v3343_v26 = vld [vmem:[%s4440_s16 + $0x28] sm:$0xff]   ;;  %v620_v16 = vmul.f32 %v4501_v39, %v4663_v7  ;;  %v645_v52 = vmul.f32 %v4501_v39, %v4678_v62  ;;  %v4723_v62 = vld [vmem:[%s4440_s16 + $0x50] sm:$0xff]  }
  0x9d   : > { %999 = vmatmul.mubr.bf16.gmra.mxu0 %v4626_v21  ;;  %1119 = vmatmul.mubr.bf16.gmra.mxu1 %v4630_v31  ;;  %v3217_v12 = vunpack.c.l.bf16 %v3343_v26  ;;  %v3218_v13 = vunpack.c.h.bf16 %v3343_v26  ;;  %v3842_v26 = vld [vmem:[#allocation6 + $0x2c] ss:$16 sps:$4 sm:$0xff]   ;;  %v5553_v6 = vunpack.c.h.bf16 %v4723_v62 }
  0x9e   : > { %1154 = vmatpush1.bf16.msra.mxu1 %v3828_v33  ;;  %1008 = vmatprep.mubr.bf16.mxu0 %v5468_v3  ;;  %v4693_v33 = vpack.c.bf16 %v675_v5, %v674_v19  ;;  %v653_v19 = vadd.f32 %v621_v37, %v4638_v41  ;;  %v4707_v5 = vsub.f32 %v3213_v9, %v4691_v17  ;;  %v3853_v9 = vld [vmem:[#allocation8 + $0x20] sm:$0xff]  }
  0x9f   : > { %1155 = vmatprep.subr.bf16.mxu1 %v3833_v48  ;;  %1128 = vmatprep.mubr.bf16.mxu1 %v5468_v3  ;;  %v644_v48 = vmul.f32 %v4501_v39, %v4674_v15  ;;  %v414_v55 = vrot.slane %v3217_v12, 7  ;;  %v415_v37 = vrot.slane %v3218_v13, 7 }
  0xa0   : > { %3373 = vmatprep.subr.bf16.mxu0 %v3850_v49  ;;  %v3839_v49 = vld [vmem:[#allocation6 + $0x4c] ss:$16 sps:$4 sm:$0xff]  }
  0xa1   : > { %3374 = vmatpush3.bf16.msra.mxu0 %v3851_v63  ;;  %v677_v63 = vadd.f32 %v645_v52, %v4653_v57  ;;  %v5472_v52 = vunpack.c.l.bf16 %v4470_v18  ;;  %v4741_v15 = vsel %vm438_vm0, %v413_v24, %v414_v55 }
  0xa2   : > { %1156 = vmatpush1.bf16.msra.mxu1 %v3831_v58  ;;  %v652_v58 = vadd.f32 %v620_v16, %v4644_v53  ;;  %v622_v16 = vmul.f32 %v4501_v39, %v4707_v5  ;;  %3375 = vmatprep.subr.bf16.mxu0 %v3852_v0  ;;  %5551 = vst [vmem:[#allocation37_spill] sm:$0xff] %v4741_v15  ;;  %v3222_v0 = vunpack.c.h.bf16 %v4713_v56 }
  0xa3   : > { %1157 = vmatprep.subr.bf16.mxu1 %v3836_v4  ;;  %v676_v4 = vadd.f32 %v644_v48, %v4657_v61  ;;  %v623_v48 = vmul.f32 %v4501_v39, %v4710_v23  ;;  %v3221_v61 = vunpack.c.l.bf16 %v4713_v56  ;;  %v4752_v24 = vsub.f32 %v3217_v12, %v4741_v15 }
  0xa4   : > { %v4730_v57 = vpack.c.bf16 %v653_v19, %v652_v58  ;;  %v3845_v19 = vld [vmem:[#allocation6 + $0xc] ss:$16 sps:$4 sm:$0xff]   ;;  %v654_v58 = vadd.f32 %v622_v16, %v4691_v17  ;;  %v417_v60 = vrot.slane %v3222_v0, 7  ;;  %v4762_v12 = vrot.slane %v5553_v6, 7 }
  0xa5   : > { %1009 = vmatmul.mubr.bf16.gmra.mxu0 %v4683_v34  ;;  %1129 = vmatmul.mubr.bf16.gmra.mxu1 %v4693_v33  ;;  %v3855_v16 = vld [vmem:[#allocation8 + $0x18] sm:$0xff]   ;;  %v624_v20 = vmul.f32 %v4501_v39, %v4752_v24 }
  0xa6   : > { %1158 = vmatpush1.bf16.msra.mxu1 %v3834_v36  ;;  %1018 = vmatprep.mubr.bf16.mxu0 %v5468_v3  ;;  %v4732_v36 = vpack.c.bf16 %v677_v63, %v676_v4  ;;  %v655_v4 = vadd.f32 %v623_v48, %v4701_v32  ;;  %v426_v63 = vrot.slane %v5472_v52, 7  ;;  %v3843_v48 = vld [vmem:[#allocation6 + $0x8] ss:$16 sps:$4 sm:$0xff]   ;;  %v3856_v52 = vld [vmem:[#allocation8 + $0x50] sm:$0xff]  }
  0xa7   : > { %1159 = vmatprep.subr.bf16.mxu1 %v3839_v49  ;;  %1138 = vmatprep.mubr.bf16.mxu1 %v5468_v3  ;;  %v3840_v49 = vld [vmem:[#allocation6 + $0x28] ss:$16 sps:$4 sm:$0xff]   ;;  %v4737_v3 = vsel %vm438_vm0, %v414_v55, %v415_v37 }
  0xa8   : > { %3376 = vmatpush3.bf16.msra.mxu0 %v3853_v9  ;;  %5550 = vst [vmem:[#allocation36_spill] sm:$0xff] %v4737_v3  ;;  %v4755_v56 = vsub.f32 %v3218_v13, %v4737_v3  ;;  %v3345_v9 = vld [vmem:[%s4440_s16 + $0x38] sm:$0xff]   ;;  %v4767_v13 = vsel %vm438_vm0, %v426_v63, %v4483_v29  ;;  %v4769_v2 = vpack.c.bf16 %v655_v4, %v654_v58  ;;  %v3858_v58 = vld [vmem:[#allocation8 + $0x10] sm:$0xff]  }
  0xa9   : > { %v3854_v55 = vld [vmem:[#allocation8 + $0x58] sm:$0xff]   ;;  %5554 = vst [vmem:[#allocation38_spill] sm:$0xff] %v4767_v13  ;;  %v4782_v29 = vsel %vm438_vm0, %v4762_v12, %v426_v63  ;;  %v3226_v11 = vunpack.c.h.bf16 %v3345_v9  ;;  %v656_v63 = vadd.f32 %v624_v20, %v4741_v15 }
  0xaa   : > { %1160 = vmatpush1.bf16.msra.mxu1 %v3837_v50  ;;  %v5552_v50 = vmov 0   ;;  %3377 = vmatprep.subr.bf16.mxu0 %v3854_v55  ;;  %5556 = vst [vmem:[#allocation40_spill] sm:$0xff] %v4782_v29  ;;  %v3859_v4 = vld [vmem:[#allocation8 + $0xb8] sm:$0xff]  }
  0xab   : > { %1161 = vmatprep.subr.bf16.mxu1 %v3842_v26  ;;  %v416_v26 = vrot.slane %v3221_v61, 7 }
  0xac   : > { %3378 = vmatpush3.bf16.msra.mxu0 %v3855_v16 }
  0xad   : > { %1019 = vmatmul.mubr.bf16.gmra.mxu0 %v4730_v57  ;;  %1139 = vmatmul.mubr.bf16.gmra.mxu1 %v4732_v36  ;;  %v4777_v6 = vsel %vm438_vm0, %v415_v37, %v416_v26  ;;  %v4786_v55 = vsel %vm438_vm0, %v416_v26, %v417_v60 }
  0xae   : > { %1162 = vmatpush1.bf16.msra.mxu1 %v3840_v49  ;;  %1028 = vmatprep.mubr.bf16.mxu0 %v5552_v50  ;;  %v3225_v49 = vunpack.c.l.bf16 %v3345_v9  ;;  %5555 = vst [vmem:[#allocation39_spill] sm:$0xff] %v4777_v6  ;;  %5557 = vst [vmem:[#allocation41_spill] sm:$0xff] %v4786_v55  ;;  %v4789_v37 = vsub.f32 %v3221_v61, %v4777_v6  ;;  %v3346_v9 = vld [vmem:[%s4440_s16 + $0x40] sm:$0xff]   ;;  %v3861_v61 = vld [vmem:[#allocation8 + $0x8] sm:$0xff]  }
  0xaf   : > { %1163 = vmatprep.subr.bf16.mxu1 %v3845_v19  ;;  %1181 = vmatprep.mubr.bf16.mxu1 %v5552_v50  ;;  %v625_v19 = vmul.f32 %v4501_v39, %v4755_v56  ;;  %v3229_v44 = vunpack.c.l.bf16 %v3346_v9 }
  0xb0   : > { %3379 = vmatprep.subr.bf16.mxu0 %v3856_v52  ;;  %5558 = vst [vmem:[#allocation42_spill] sm:$0xff] %v4789_v37  ;;  %v418_v26 = vrot.slane %v3225_v49, 7  ;;  %v3863_v52 = vld [vmem:[#allocation8 + $0xb0] sm:$0xff]   ;;  %v626_v20 = vmul.f32 %v4501_v39, %v4789_v37 }
  0xb1   : > { %v657_v16 = vadd.f32 %v625_v19, %v4737_v3  ;;  %3380 = vmatpush3.bf16.msra.mxu0 %v3858_v58 }
  0xb2   : > { %1164 = vmatpush1.bf16.msra.mxu1 %v3843_v48  ;;  %v4796_v48 = vsub.f32 %v3222_v0, %v4786_v55  ;;  %3381 = vmatprep.subr.bf16.mxu0 %v3860_v22  ;;  %v4809_v19 = vsel %vm438_vm0, %v417_v60, %v418_v26  ;;  %v658_v22 = vadd.f32 %v626_v20, %v4777_v6 }
  0xb3   : > { %3481 = vmatprep.subr.bf16.mxu1 %v3857_v1  ;;  %v419_v1 = vrot.slane %v3226_v11, 7  ;;  %5560 = vst [vmem:[#allocation44_spill] sm:$0xff] %v4809_v19 }
  0xb4   : > { %5559 = vst [vmem:[#allocation43_spill] sm:$0xff] %v4796_v48  ;;  %v627_v0 = vmul.f32 %v4501_v39, %v4796_v48 }
  0xb5   : > { %1029 = vmatmul.mubr.bf16.gmra.mxu0 %v4769_v2  ;;  %1182 = vmatmul.mubr.bf16.vlgmr.msra.gmra.mxu1 %v4577_v42  ;;  %v4801_v42 = vpack.c.bf16 %v657_v16, %v656_v63  ;;  %v4813_v58 = vsel %vm438_vm0, %v418_v26, %v419_v1  ;;  %v420_v16 = vrot.slane %v3229_v44, 7 }
  0xb6   : > { %1038 = vmatprep.mubr.bf16.mxu0 %v5552_v50  ;;  %1191 = vmatprep.mubr.bf16.mxu1 %v5552_v50  ;;  %5561 = vst [vmem:[#allocation45_spill] sm:$0xff] %v4813_v58  ;;  %v659_v63 = vadd.f32 %v627_v0, %v4786_v55  ;;  %v4823_v60 = vsub.f32 %v3226_v11, %v4813_v58 }
  0xb7   : > { %3482 = vmatpush3.bf16.msra.mxu1 %v3859_v4  ;;  %v3230_v4 = vunpack.c.h.bf16 %v3346_v9  ;;  %3382 = vmatpush3.bf16.msra.mxu0 %v3861_v61  ;;  %v3347_v9 = vld [vmem:[%s4440_s16 + $0x48] sm:$0xff]   ;;  %s4125_s16 = sshll.u32 %s4237_s20, 4  ;;  %s4126_s16 = int_to_ptr.vmem [resolvable:$false] %s4125_s16 }
  0xb8   : > { %3483 = vmatprep.subr.bf16.mxu1 %v3862_v14  ;;  %v4816_v14 = vsub.f32 %v3225_v49, %v4809_v19  ;;  %5563 = vst [vmem:[#allocation47_spill] sm:$0xff] %v4823_v60  ;;  %v4828_v49 = vpack.c.bf16 %v659_v63, %v658_v22  ;;  %v3233_v20 = vunpack.c.l.bf16 %v3347_v9  ;;  %v3234_v0 = vunpack.c.h.bf16 %v3347_v9  ;;  %3383 = vmatprep.subr.bf16.mxu0 %v3864_v10  ;;  %s4127_s21 = scalar_lea.vmem %s4126_s16, 4096  ;;  %p4128_p7 = scmp.lt.s32.totalorder %s5392_s25, %s4126_s16 }
  0xb9   : > { %v421_v26 = vrot.slane %v3230_v4, 7  ;;  %p4129_p9 = scmp.lt.s32.totalorder %s4127_s21, %s4121_s19 }
  0xba   : > { %5562 = vst [vmem:[#allocation46_spill] sm:$0xff] %v4816_v14  ;;  %v628_v61 = vmul.f32 %v4501_v39, %v4816_v14  ;;  %v423_v9 = vrot.slane %v3234_v0, 7 }
  0xbb   : > { %3484 = vmatpush3.bf16.msra.mxu1 %v3863_v52  ;;  %v4836_v52 = vsel %vm438_vm0, %v419_v1, %v420_v16  ;;  %v4840_v11 = vsel %vm438_vm0, %v420_v16, %v421_v26  ;;  %v422_v16 = vrot.slane %v3233_v20, 7  ;;  %p4130_p12 = por %p4129_p9, %p4128_p7 }
  0xbc   : > { %5564 = vst [vmem:[#allocation48_spill] sm:$0xff] %v4836_v52  ;;  %5565 = vst [vmem:[#allocation49_spill] sm:$0xff] %v4840_v11  ;;  %v4843_v40 = vsub.f32 %v3229_v44, %v4836_v52  ;;  %v660_v22 = vadd.f32 %v628_v61, %v4809_v19  ;;  %v4850_v1 = vsub.f32 %v3230_v4, %v4840_v11  ;;  %v3237_v61 = vunpack.c.l.bf16 %v4723_v62 }
  0xbd   : > { %1039 = vmatmul.mubr.bf16.gmra.mxu0 %v4801_v42  ;;  %1192 = vmatmul.mubr.bf16.gmra.mxu1 %v4626_v21  ;;  %v629_v21 = vmul.f32 %v4501_v39, %v4823_v60  ;;  %v4865_v4 = vsel %vm438_vm0, %v421_v26, %v422_v16  ;;  %p4131_p11 = pnand %p4130_p12, %p4124_p5 }
  0xbe   : > { %1048 = vmatprep.mubr.bf16.mxu0 %v5552_v50  ;;  %1201 = vmatprep.mubr.bf16.mxu1 %v5552_v50  ;;  %5566 = vst [vmem:[#allocation50_spill] sm:$0xff] %v4843_v40  ;;  %5567 = vst [vmem:[#allocation51_spill] sm:$0xff] %v4850_v1  ;;  %v630_v44 = vmul.f32 %v4501_v39, %v4843_v40  ;;  %v424_v19 = vrot.slane %v3237_v61, 7 }
  0xbf   : > { %v661_v63 = vadd.f32 %v629_v21, %v4813_v58  ;;  %v4861_v21 = vsel %vm438_vm0, %v422_v16, %v423_v9  ;;  %5569 = vst [vmem:[#allocation53_spill] sm:$0xff] %v4865_v4 }
  0xc0   : > { %5568 = vst [vmem:[#allocation52_spill] sm:$0xff] %v4861_v21  ;;  %v662_v45 = vadd.f32 %v630_v44, %v4836_v52  ;;  %v4874_v58 = vsub.f32 %v3234_v0, %v4861_v21  ;;  %v4884_v44 = vsel %vm438_vm0, %v423_v9, %v424_v19 }
  0xc1   : > { %v755_v47 = vpack.c.bf16 %v661_v63, %v660_v22  ;;  %v4871_v63 = vsub.f32 %v3233_v20, %v4865_v4  ;;  %5572 = vst [vmem:[#allocation56_spill] sm:$0xff] %v4884_v44  ;;  %v4889_v20 = vsel %vm438_vm0, %v424_v19, %v4762_v12  ;;  %v4892_v0 = vsub.f32 %v3237_v61, %v4884_v44  ;;  %v3865_v61 = vld [vmem:[#allocation8] sm:$0xff]  }
  0xc2   : > { %5571 = vst [vmem:[#allocation55_spill] sm:$0xff] %v4874_v58  ;;  %5573 = vst [vmem:[#allocation57_spill] sm:$0xff] %v4889_v20  ;;  %3384 = vmatpush3.bf16.msra.mxu0 %v3865_v61 }
  0xc3   : > { %5570 = vst [vmem:[#allocation54_spill] sm:$0xff] %v4871_v63  ;;  %v632_v16 = vmul.f32 %v4501_v39, %v4871_v63  ;;  %5574 = vst [vmem:[#allocation58_spill] sm:$0xff] %v4892_v0  ;;  %v634_v19 = vmul.f32 %v4501_v39, %v4892_v0 }
  0xc5   : > { %1049 = vmatmul.mubr.bf16.gmra.mxu0 %v4828_v49  ;;  %1202 = vmatmul.mubr.bf16.gmra.mxu1 %v4683_v34  ;;  %v631_v34 = vmul.f32 %v4501_v39, %v4850_v1 }
  0xc6   : > { %1058 = vmatprep.mubr.bf16.mxu0 %v5552_v50  ;;  %1211 = vmatprep.mubr.bf16.mxu1 %v5552_v50 }
  0xc7   : > { %v663_v22 = vadd.f32 %v631_v34, %v4840_v11 }
  0xc9   : > { %v756_v26 = vpack.c.bf16 %v663_v22, %v662_v45  ;;  %v664_v45 = vadd.f32 %v632_v16, %v4865_v4  ;;  %v5575_v22 = vunpack.c.h.bf16 %v4723_v62  ;;  %v5577_v16 = vunpack.c.h.bf16 %v4470_v18 }
  0xcb   : > { %v4900_v9 = vsub.f32 %v5575_v22, %v4889_v20  ;;  %v4911_v62 = vsub.f32 %v5577_v16, %v4767_v13  ;;  %v3866_v16 = vld [vmem:[#allocation8 + $0xe8] sm:$0xff]  }
  0xcc   : > { %3485 = vmatprep.subr.bf16.mxu1 %v3866_v16  ;;  %v3875_v16 = vld [vmem:[#allocation8 + $0x90] sm:$0xff]  }
  0xcd   : > { %1059 = vmatmul.mubr.bf16.gmra.mxu0 %v755_v47  ;;  %1212 = vmatmul.mubr.bf16.gmra.mxu1 %v4730_v57  ;;  %v633_v57 = vmul.f32 %v4501_v39, %v4874_v58  ;;  %5576 = vst [vmem:[#allocation59_spill] sm:$0xff] %v4900_v9  ;;  %5578 = vst [vmem:[#allocation60_spill] sm:$0xff] %v4911_v62 }
  0xce   : > { %1068 = vmatprep.mubr.bf16.mxu0 %v5552_v50  ;;  %1221 = vmatprep.mubr.bf16.mxu1 %v5552_v50 }
  0xcf   : > { %v665_v34 = vadd.f32 %v633_v57, %v4861_v21  ;;  %v666_v57 = vadd.f32 %v634_v19, %v4884_v44  ;;  %v3867_v19 = vld [vmem:[#allocation8 + $0xa8] sm:$0xff]  }
  0xd0   : > { %3486 = vmatpush3.bf16.msra.mxu1 %v3867_v19  ;;  %v3876_v19 = vld [vmem:[#allocation8 + $0xc8] sm:$0xff]  }
  0xd1   : > { %v757_v12 = vpack.c.bf16 %v665_v34, %v664_v45  ;;  %v5579_v34 = vunpack.c.l.bf16 %v4470_v18 }
  0xd3   : > { %v4919_v22 = vsub.f32 %v5579_v34, %v4782_v29  ;;  %v3870_v34 = vld [vmem:[#allocation8 + $0xa0] sm:$0xff]  }
  0xd5   : > { %1069 = vmatmul.mubr.bf16.gmra.mxu0 %v756_v26  ;;  %1222 = vmatmul.mubr.bf16.gmra.mxu1 %v4769_v2  ;;  %v635_v2 = vmul.f32 %v4501_v39, %v4900_v9  ;;  %5580 = vst [vmem:[#allocation61_spill] sm:$0xff] %v4919_v22  ;;  %v636_v61 = vmul.f32 %v4501_v39, %v4919_v22 }
  0xd6   : > { %1078 = vmatprep.mubr.bf16.mxu0 %v5552_v50  ;;  %1231 = vmatprep.mubr.bf16.mxu1 %v5552_v50 }
  0xd7   : > { %v667_v45 = vadd.f32 %v635_v2, %v4889_v20  ;;  %v668_v18 = vadd.f32 %v636_v61, %v4782_v29  ;;  %v3873_v61 = vld [vmem:[#allocation8 + $0x98] sm:$0xff]  }
  0xd9   : > { %v758_v10 = vpack.c.bf16 %v667_v45, %v666_v57  ;;  %v4932_v57 = vld [vmem:[#allocation9 + $0x38] sm:$0xff]   ;;  %v3869_v45 = vld [vmem:[#allocation8 + $0xe0] sm:$0xff]  }
  0xda   : > { %3617 = vmatprep.subr.bf16.mxu0 %v4932_v57  ;;  %3487 = vmatprep.subr.bf16.mxu1 %v3869_v45 }
  0xdb   : > { %3488 = vmatpush3.bf16.msra.mxu1 %v3870_v34 }
  0xdd   : > { %1079 = vmatmul.mubr.bf16.gmra.mxu0 %v757_v12  ;;  %1232 = vmatmul.mubr.bf16.gmra.mxu1 %v4801_v42  ;;  %v637_v42 = vmul.f32 %v4501_v39, %v4911_v62 }
  0xde   : > { %1088 = vmatprep.mubr.bf16.mxu0 %v5552_v50  ;;  %1241 = vmatprep.mubr.bf16.mxu1 %v5552_v50 }
  0xdf   : > { %v669_v2 = vadd.f32 %v637_v42, %v4767_v13  ;;  %v3874_v42 = vld [vmem:[#allocation8 + $0xd0] sm:$0xff]  }
  0xe1   : > { %v759_v39 = vpack.c.bf16 %v669_v2, %v668_v18  ;;  %v3877_v18 = vld [vmem:[#allocation8 + $0x88] sm:$0xff]   ;;  %v3879_v2 = vld [vmem:[#allocation8 + $0x80] sm:$0xff]  }
  0xe5   : > { %1089 = vmatmul.mubr.bf16.gmra.mxu0 %v758_v10  ;;  %1242 = vmatmul.mubr.bf16.gmra.mxu1 %v4828_v49  ;;  %v3872_v49 = vld [vmem:[#allocation8 + $0xd8] sm:$0xff]  }
  0xe6   : > { %1098 = vmatprep.mubr.bf16.mxu0 %v5552_v50  ;;  %1251 = vmatprep.mubr.bf16.mxu1 %v5552_v50 }
  0xe7   : > { %3489 = vmatprep.subr.bf16.mxu1 %v3872_v49 }
  0xe8   : > { %3490 = vmatpush3.bf16.msra.mxu1 %v3873_v61 }
  0xe9   : > { %3491 = vmatprep.subr.bf16.mxu1 %v3874_v42 }
  0xec   : > { %3492 = vmatpush3.bf16.msra.mxu1 %v3875_v16 }
  0xed   : > { %1099 = vmatmul.mubr.bf16.gmra.mxu0 %v759_v39  ;;  %1252 = vmatmul.mubr.bf16.gmra.mxu1 %v755_v47  ;;  %v3878_v47 = vld [vmem:[#allocation8 + $0xc0] sm:$0xff]  }
  0xee   : > { %1261 = vmatprep.mubr.bf16.mxu1 %v5552_v50  ;;  %3493 = vmatprep.subr.bf16.mxu1 %v3876_v19 }
  0xf0   : > { %3494 = vmatpush3.bf16.msra.mxu1 %v3877_v18 }
  0xf1   : > { %3495 = vmatprep.subr.bf16.mxu1 %v3878_v47 }
  0xf4   : > { %3496 = vmatpush3.bf16.msra.mxu1 %v3879_v2 }
  0xf5   : > { %1262 = vmatmul.mubr.bf16.gmra.mxu1 %v756_v26 }
  0xf6   : > { %1271 = vmatprep.mubr.bf16.mxu1 %v5552_v50 }
  0xfd   : > { %1272 = vmatmul.mubr.bf16.gmra.mxu1 %v757_v12 }
  0xfe   : > { %1281 = vmatprep.mubr.bf16.mxu1 %v5552_v50 }
 0x105   : > { %1282 = vmatmul.mubr.bf16.gmra.mxu1 %v758_v10 }
 0x106   : > { %1291 = vmatprep.mubr.bf16.mxu1 %v5552_v50 }
 0x10d   : > { %1292 = vmatmul.mubr.bf16.gmra.mxu1 %v759_v39 }
 0x10e   : > { %1301 = vmatprep.mubr.bf16.mxu1 %v5552_v50 }
 0x115   : > { %1302 = vmatmul.mubr.bf16.gmra.mxu1 %v4579_v46 }
 0x116   : > { %1311 = vmatprep.mubr.bf16.mxu1 %v5552_v50 }
 0x11d   : > { %1312 = vmatmul.mubr.bf16.gmra.mxu1 %v4630_v31 }
 0x11e   : > { %1321 = vmatprep.mubr.bf16.mxu1 %v5552_v50 }
 0x125   : > { %1322 = vmatmul.mubr.bf16.gmra.mxu1 %v4693_v33 }
 0x126   : > { %1331 = vmatprep.mubr.bf16.mxu1 %v5552_v50 }
 0x12d   : > { %1332 = vmatmul.mubr.bf16.gmra.mxu1 %v4732_v36 }
 0x155   : > { %v990_v26 = vpop.f32.mrf.mxu0  ;;  %v1110_v12 = vpop.f32.mrf.mxu1 }
 0x156   : > { %v1438_v10 = vmax.f32 %v1110_v12, 0.0  ;;  %v1342_v16 = vmax.f32 %v990_v26, 0.0 }
 0x157   : > { %v992_v39 = vpop.f32.mrf.mxu0  ;;  %v4947_v45 = vpop.f32.mrf.mxu1 }
 0x158   : > { %v4949_v49 = vmul.f32 %v1438_v10, %v1438_v10  ;;  %v1343_v61 = vmax.f32 %v992_v39, 0.0  ;;  %v1470_v10 = vmul.f32 %v1342_v16, %v1342_v16 }
 0x159   : > { %v994_v34 = vpop.f32.mrf.mxu0  ;;  %v1114_v46 = vpop.f32.mrf.mxu1 }
 0x15a   : > { %v1346_v31 = vmax.f32 %v994_v34, 0.0  ;;  %v1442_v42 = vmax.f32 %v1114_v46, 0.0  ;;  %v1471_v12 = vmul.f32 %v1343_v61, %v1343_v61 }
 0x15b   : > { %v996_v19 = vpop.f32.mrf.mxu0  ;;  %v4951_v33 = vpop.f32.mrf.mxu1 }
 0x15c   : > { %v4953_v50 = vmul.f32 %v1442_v42, %v1442_v42  ;;  %v1347_v36 = vmax.f32 %v996_v19, 0.0  ;;  %v1474_v18 = vmul.f32 %v1346_v31, %v1346_v31  ;;  %v3871_v42 = vld [vmem:[#allocation9 + $0x30] sm:$0xff]  }
 0x15d   : > { %v1000_v47 = vpop.f32.mrf.mxu0  ;;  %v1120_v2 = vpop.f32.mrf.mxu1 }
 0x15e   : > { %v1475_v29 = vmul.f32 %v1347_v36, %v1347_v36  ;;  %v1446_v62 = vmax.f32 %v1120_v2, 0.0  ;;  %v1598_v46 = vpack.c.bf16 %v1474_v18, %v1470_v10  ;;  %v1350_v61 = vmax.f32 %v1000_v47, 0.0 }
 0x15f   : > { %v1002_v39 = vpop.f32.mrf.mxu0  ;;  %v4957_v34 = vpop.f32.mrf.mxu1 }
 0x160   : > { %v1599_v26 = vpack.c.bf16 %v1475_v29, %v1471_v12  ;;  %v4959_v44 = vmul.f32 %v1446_v62, %v1446_v62  ;;  %v1351_v31 = vmax.f32 %v1002_v39, 0.0  ;;  %v3880_v62 = vld [vmem:[#allocation9 + $0x28] sm:$0xff]   ;;  %v1478_v47 = vmul.f32 %v1350_v61, %v1350_v61 }
 0x161   : > { %v1004_v22 = vpop.f32.mrf.mxu0  ;;  %v1124_v20 = vpop.f32.mrf.mxu1 }
 0x162   : > { %v1354_v19 = vmax.f32 %v1004_v22, 0.0  ;;  %v1450_v21 = vmax.f32 %v1124_v20, 0.0  ;;  %1950 = vmatprep.mubr.bf16.mxu0 %v1599_v26  ;;  %v1479_v12 = vmul.f32 %v1351_v31, %v1351_v31 }
 0x163   : > { %v1006_v4 = vpop.f32.mrf.mxu0  ;;  %v4961_v13 = vpop.f32.mrf.mxu1  ;;  %1951 = vmatmul.mubr.bf16.vlgmr.msra.gmra.mxu0 %v1598_v46 }
 0x164   : > { %v4963_v16 = vmul.f32 %v1450_v21, %v1450_v21  ;;  %v1355_v36 = vmax.f32 %v1006_v4, 0.0  ;;  %3618 = vmatpush3.bf16.msra.mxu0 %v4932_v57  ;;  %v1482_v29 = vmul.f32 %v1354_v19, %v1354_v19  ;;  %v3881_v19 = vld [vmem:[#allocation9 + $0x20] sm:$0xff]  }
 0x165   : > { %v1010_v18 = vpop.f32.mrf.mxu0  ;;  %v1130_v2 = vpop.f32.mrf.mxu1  ;;  %3619 = vmatprep.subr.bf16.mxu0 %v3871_v42 }
 0x166   : > { %v1483_v22 = vmul.f32 %v1355_v36, %v1355_v36  ;;  %v1454_v10 = vmax.f32 %v1130_v2, 0.0  ;;  %v1602_v4 = vpack.c.bf16 %v1482_v29, %v1478_v47  ;;  %v1358_v20 = vmax.f32 %v1010_v18, 0.0  ;;  %v3882_v47 = vld [vmem:[#allocation9 + $0x18] sm:$0xff]  }
 0x167   : > { %v1012_v39 = vpop.f32.mrf.mxu0  ;;  %v4968_v26 = vpop.f32.mrf.mxu1 }
 0x168   : > { %v1603_v21 = vpack.c.bf16 %v1483_v22, %v1479_v12  ;;  %3620 = vmatpush3.bf16.msra.mxu0 %v3871_v42  ;;  %v4970_v9 = vmul.f32 %v1454_v10, %v1454_v10  ;;  %v1359_v0 = vmax.f32 %v1012_v39, 0.0 }
 0x169   : > { %v1014_v46 = vpop.f32.mrf.mxu0  ;;  %v1134_v57 = vpop.f32.mrf.mxu1  ;;  %3621 = vmatprep.subr.bf16.mxu0 %v3880_v62 }
 0x16a   : > { %v1362_v31 = vmax.f32 %v1014_v46, 0.0  ;;  %v1458_v58 = vmax.f32 %v1134_v57, 0.0  ;;  %1958 = vmatprep.mubr.bf16.mxu0 %v1603_v21  ;;  %v1487_v10 = vmul.f32 %v1359_v0, %v1359_v0  ;;  %v1486_v21 = vmul.f32 %v1358_v20, %v1358_v20 }
 0x16b   : > { %v1016_v36 = vpop.f32.mrf.mxu0  ;;  %v4972_v61 = vpop.f32.mrf.mxu1  ;;  %1959 = vmatmul.mubr.bf16.gmra.mxu0 %v1602_v4 }
 0x16c   : > { %v4974_v2 = vmul.f32 %v1458_v58, %v1458_v58  ;;  %v1363_v12 = vmax.f32 %v1016_v36, 0.0  ;;  %3622 = vmatpush3.bf16.msra.mxu0 %v3880_v62  ;;  %v1490_v42 = vmul.f32 %v1362_v31, %v1362_v31  ;;  %v3883_v31 = vld [vmem:[#allocation9 + $0x10] sm:$0xff]  }
 0x16d   : > { %v1020_v29 = vpop.f32.mrf.mxu0  ;;  %v1140_v22 = vpop.f32.mrf.mxu1  ;;  %3623 = vmatprep.subr.bf16.mxu0 %v3881_v19 }
 0x16e   : > { %v1491_v46 = vmul.f32 %v1363_v12, %v1363_v12  ;;  %v1462_v18 = vmax.f32 %v1140_v22, 0.0  ;;  %v1606_v58 = vpack.c.bf16 %v1490_v42, %v1486_v21  ;;  %v1366_v39 = vmax.f32 %v1020_v29, 0.0  ;;  %v3884_v21 = vld [vmem:[#allocation9 + $0x8] sm:$0xff]  }
 0x16f   : > { %v1022_v57 = vpop.f32.mrf.mxu0  ;;  %v4978_v63 = vpop.f32.mrf.mxu1 }
 0x170   : > { %v1607_v4 = vpack.c.bf16 %v1491_v46, %v1487_v10  ;;  %3624 = vmatpush3.bf16.msra.mxu0 %v3881_v19  ;;  %v4980_v11 = vmul.f32 %v1462_v18, %v1462_v18  ;;  %v1367_v52 = vmax.f32 %v1022_v57, 0.0 }
 0x171   : > { %v1024_v36 = vpop.f32.mrf.mxu0  ;;  %v1144_v62 = vpop.f32.mrf.mxu1  ;;  %3625 = vmatprep.subr.bf16.mxu0 %v3882_v47 }
 0x172   : > { %v1370_v0 = vmax.f32 %v1024_v36, 0.0  ;;  %v1466_v1 = vmax.f32 %v1144_v62, 0.0  ;;  %1966 = vmatprep.mubr.bf16.mxu0 %v1607_v4  ;;  %v1495_v18 = vmul.f32 %v1367_v52, %v1367_v52  ;;  %v1494_v4 = vmul.f32 %v1366_v39, %v1366_v39 }
 0x173   : > { %v1026_v12 = vpop.f32.mrf.mxu0  ;;  %v4982_v20 = vpop.f32.mrf.mxu1  ;;  %1967 = vmatmul.mubr.bf16.gmra.mxu0 %v1606_v58 }
 0x174   : > { %v4984_v22 = vmul.f32 %v1466_v1, %v1466_v1  ;;  %v1371_v10 = vmax.f32 %v1026_v12, 0.0  ;;  %3626 = vmatpush3.bf16.msra.mxu0 %v3882_v47  ;;  %v1498_v19 = vmul.f32 %v1370_v0, %v1370_v0  ;;  %v3885_v0 = vld [vmem:[#allocation9] sm:$0xff]  }
 0x175   : > { %v1030_v42 = vpop.f32.mrf.mxu0  ;;  %v1183_v46 = vpop.f32.mrf.mxu1  ;;  %3627 = vmatprep.subr.bf16.mxu0 %v3883_v31 }
 0x176   : > { %v1499_v36 = vmul.f32 %v1371_v10, %v1371_v10  ;;  %v1344_v29 = vmax.f32 %v1183_v46, 0.0  ;;  %v1610_v1 = vpack.c.bf16 %v1498_v19, %v1494_v4  ;;  %v1374_v52 = vmax.f32 %v1030_v42, 0.0 }
 0x177   : > { %v1032_v62 = vpop.f32.mrf.mxu0  ;;  %v1185_v40 = vpop.f32.mrf.mxu1 }
 0x178   : > { %v1345_v60 = vmax.f32 %v1185_v40, 0.0  ;;  %v1611_v58 = vpack.c.bf16 %v1499_v36, %v1495_v18  ;;  %3628 = vmatpush3.bf16.msra.mxu0 %v3883_v31  ;;  %v1375_v14 = vmax.f32 %v1032_v62, 0.0  ;;  %v1472_v3 = vmul.f32 %v1344_v29, %v1344_v29 }
 0x179   : > { %v1034_v12 = vpop.f32.mrf.mxu0  ;;  %v1187_v47 = vpop.f32.mrf.mxu1  ;;  %3629 = vmatprep.subr.bf16.mxu0 %v3884_v21 }
 0x17a   : > { %v1378_v55 = vmax.f32 %v1034_v12, 0.0  ;;  %v1348_v6 = vmax.f32 %v1187_v47, 0.0  ;;  %1974 = vmatprep.mubr.bf16.mxu0 %v1611_v58  ;;  %v1473_v39 = vmul.f32 %v1345_v60, %v1345_v60  ;;  %v1503_v36 = vmul.f32 %v1375_v14, %v1375_v14 }
 0x17b   : > { %v1036_v57 = vpop.f32.mrf.mxu0  ;;  %v1189_v10 = vpop.f32.mrf.mxu1  ;;  %1975 = vmatmul.mubr.bf16.gmra.mxu0 %v1610_v1  ;;  %v1502_v12 = vmul.f32 %v1374_v52, %v1374_v52 }
 0x17c   : > { %v1476_v46 = vmul.f32 %v1348_v6, %v1348_v6  ;;  %v1379_v15 = vmax.f32 %v1036_v57, 0.0  ;;  %v1349_v40 = vmax.f32 %v1189_v10, 0.0  ;;  %3630 = vmatpush3.bf16.msra.mxu0 %v3884_v21  ;;  %v1506_v31 = vmul.f32 %v1378_v55, %v1378_v55 }
 0x17d   : > { %v1040_v19 = vpop.f32.mrf.mxu0  ;;  %v1193_v18 = vpop.f32.mrf.mxu1  ;;  %3631 = vmatprep.subr.bf16.mxu0 %v3885_v0 }
 0x17e   : > { %v1507_v4 = vmul.f32 %v1379_v15, %v1379_v15  ;;  %v1477_v62 = vmul.f32 %v1349_v40, %v1349_v40  ;;  %v1600_v47 = vpack.c.bf16 %v1476_v46, %v1472_v3  ;;  %v1352_v58 = vmax.f32 %v1193_v18, 0.0 }
 0x17f   : > { %v1042_v42 = vpop.f32.mrf.mxu0  ;;  %v1195_v29 = vpop.f32.mrf.mxu1  ;;  %v1614_v6 = vpack.c.bf16 %v1506_v31, %v1502_v12  ;;  %v1382_v14 = vmax.f32 %v1040_v19, 0.0 }
 0x180   : > { %v1353_v48 = vmax.f32 %v1195_v29, 0.0  ;;  %v1615_v37 = vpack.c.bf16 %v1507_v4, %v1503_v36  ;;  %v1601_v1 = vpack.c.bf16 %v1477_v62, %v1473_v39  ;;  %3632 = vmatpush3.bf16.msra.mxu0 %v3885_v0  ;;  %v1383_v21 = vmax.f32 %v1042_v42, 0.0 }
 0x181   : > { %v1044_v60 = vpop.f32.mrf.mxu0  ;;  %v1197_v57 = vpop.f32.mrf.mxu1  ;;  %v1480_v15 = vmul.f32 %v1352_v58, %v1352_v58  ;;  %v1510_v42 = vmul.f32 %v1382_v14, %v1382_v14 }
 0x182   : > { %v1386_v55 = vmax.f32 %v1044_v60, 0.0  ;;  %v1356_v10 = vmax.f32 %v1197_v57, 0.0  ;;  %1982 = vmatprep.mubr.bf16.mxu0 %v1615_v37  ;;  %2111 = vmatprep.mubr.bf16.mxu1 %v1601_v1  ;;  %v1481_v3 = vmul.f32 %v1353_v48, %v1353_v48  ;;  %v1511_v4 = vmul.f32 %v1383_v21, %v1383_v21 }
 0x183   : > { %v1046_v40 = vpop.f32.mrf.mxu0  ;;  %v1199_v52 = vpop.f32.mrf.mxu1  ;;  %1983 = vmatmul.mubr.bf16.gmra.mxu0 %v1614_v6  ;;  %2112 = vmatmul.mubr.bf16.vlgmr.msra.gmra.mxu1 %v1600_v47 }
 0x184   : > { %v1484_v46 = vmul.f32 %v1356_v10, %v1356_v10  ;;  %v1387_v18 = vmax.f32 %v1046_v40, 0.0  ;;  %v1357_v36 = vmax.f32 %v1199_v52, 0.0  ;;  %v1514_v39 = vmul.f32 %v1386_v55, %v1386_v55 }
 0x185   : > { %v1050_v0 = vpop.f32.mrf.mxu0  ;;  %v1203_v31 = vpop.f32.mrf.mxu1 }
 0x186   : > { %v1515_v62 = vmul.f32 %v1387_v18, %v1387_v18  ;;  %v1485_v12 = vmul.f32 %v1357_v36, %v1357_v36  ;;  %v1604_v29 = vpack.c.bf16 %v1484_v46, %v1480_v15  ;;  %v1360_v37 = vmax.f32 %v1203_v31, 0.0 }
 0x187   : > { %v1052_v1 = vpop.f32.mrf.mxu0  ;;  %v1205_v19 = vpop.f32.mrf.mxu1  ;;  %v1618_v6 = vpack.c.bf16 %v1514_v39, %v1510_v42  ;;  %v1390_v55 = vmax.f32 %v1050_v0, 0.0 }
 0x188   : > { %v1361_v58 = vmax.f32 %v1205_v19, 0.0  ;;  %v1619_v60 = vpack.c.bf16 %v1515_v62, %v1511_v4  ;;  %v1605_v57 = vpack.c.bf16 %v1485_v12, %v1481_v3  ;;  %v1391_v10 = vmax.f32 %v1052_v1, 0.0 }
 0x189   : > { %v1054_v47 = vpop.f32.mrf.mxu0  ;;  %v1207_v48 = vpop.f32.mrf.mxu1  ;;  %v1488_v21 = vmul.f32 %v1360_v37, %v1360_v37  ;;  %v1518_v1 = vmul.f32 %v1390_v55, %v1390_v55 }
 0x18a   : > { %v1394_v40 = vmax.f32 %v1054_v47, 0.0  ;;  %v1364_v52 = vmax.f32 %v1207_v48, 0.0  ;;  %1990 = vmatprep.mubr.bf16.mxu0 %v1619_v60  ;;  %2119 = vmatprep.mubr.bf16.mxu1 %v1605_v57  ;;  %v1489_v14 = vmul.f32 %v1361_v58, %v1361_v58  ;;  %v1519_v62 = vmul.f32 %v1391_v10, %v1391_v10 }
 0x18b   : > { %v1056_v18 = vpop.f32.mrf.mxu0  ;;  %v1209_v36 = vpop.f32.mrf.mxu1  ;;  %1991 = vmatmul.mubr.bf16.gmra.mxu0 %v1618_v6  ;;  %2120 = vmatmul.mubr.bf16.gmra.mxu1 %v1604_v29 }
 0x18c   : > { %v1492_v15 = vmul.f32 %v1364_v52, %v1364_v52  ;;  %v1395_v46 = vmax.f32 %v1056_v18, 0.0  ;;  %v1365_v31 = vmax.f32 %v1209_v36, 0.0  ;;  %v1522_v4 = vmul.f32 %v1394_v40, %v1394_v40 }
 0x18d   : > { %v1060_v3 = vpop.f32.mrf.mxu0  ;;  %v1213_v39 = vpop.f32.mrf.mxu1 }
 0x18e   : > { %v1523_v12 = vmul.f32 %v1395_v46, %v1395_v46  ;;  %v1493_v42 = vmul.f32 %v1365_v31, %v1365_v31  ;;  %v1608_v19 = vpack.c.bf16 %v1492_v15, %v1488_v21  ;;  %v1368_v60 = vmax.f32 %v1213_v39, 0.0 }
 0x18f   : > { %v1062_v57 = vpop.f32.mrf.mxu0  ;;  %v1215_v0 = vpop.f32.mrf.mxu1  ;;  %v1622_v6 = vpack.c.bf16 %v1522_v4, %v1518_v1  ;;  %v1398_v40 = vmax.f32 %v1060_v3, 0.0 }
 0x190   : > { %v1369_v37 = vmax.f32 %v1215_v0, 0.0  ;;  %v1623_v47 = vpack.c.bf16 %v1523_v12, %v1519_v62  ;;  %v1609_v48 = vpack.c.bf16 %v1493_v42, %v1489_v14  ;;  %v1399_v52 = vmax.f32 %v1062_v57, 0.0 }
 0x191   : > { %v1064_v29 = vpop.f32.mrf.mxu0  ;;  %v1217_v58 = vpop.f32.mrf.mxu1  ;;  %v1496_v10 = vmul.f32 %v1368_v60, %v1368_v60  ;;  %v1526_v57 = vmul.f32 %v1398_v40, %v1398_v40 }
 0x192   : > { %v1402_v18 = vmax.f32 %v1064_v29, 0.0  ;;  %v1372_v36 = vmax.f32 %v1217_v58, 0.0  ;;  %1998 = vmatprep.mubr.bf16.mxu0 %v1623_v47  ;;  %2127 = vmatprep.mubr.bf16.mxu1 %v1609_v48  ;;  %v1497_v55 = vmul.f32 %v1369_v37, %v1369_v37  ;;  %v1527_v12 = vmul.f32 %v1399_v52, %v1399_v52 }
 0x193   : > { %v1066_v46 = vpop.f32.mrf.mxu0  ;;  %v1219_v31 = vpop.f32.mrf.mxu1  ;;  %1999 = vmatmul.mubr.bf16.gmra.mxu0 %v1622_v6  ;;  %2128 = vmatmul.mubr.bf16.gmra.mxu1 %v1608_v19 }
 0x194   : > { %v1500_v21 = vmul.f32 %v1372_v36, %v1372_v36  ;;  %v1403_v15 = vmax.f32 %v1066_v46, 0.0  ;;  %v1373_v39 = vmax.f32 %v1219_v31, 0.0  ;;  %v1530_v62 = vmul.f32 %v1402_v18, %v1402_v18 }
 0x195   : > { %v1070_v14 = vpop.f32.mrf.mxu0  ;;  %v1223_v4 = vpop.f32.mrf.mxu1 }
 0x196   : > { %v1531_v42 = vmul.f32 %v1403_v15, %v1403_v15  ;;  %v1501_v1 = vmul.f32 %v1373_v39, %v1373_v39  ;;  %v1612_v0 = vpack.c.bf16 %v1500_v21, %v1496_v10  ;;  %v1376_v47 = vmax.f32 %v1223_v4, 0.0 }
 0x197   : > { %v1072_v48 = vpop.f32.mrf.mxu0  ;;  %v1225_v3 = vpop.f32.mrf.mxu1  ;;  %v1626_v6 = vpack.c.bf16 %v1530_v62, %v1526_v57  ;;  %v1406_v18 = vmax.f32 %v1070_v14, 0.0 }
 0x198   : > { %v1377_v60 = vmax.f32 %v1225_v3, 0.0  ;;  %v1627_v29 = vpack.c.bf16 %v1531_v42, %v1527_v12  ;;  %v1613_v58 = vpack.c.bf16 %v1501_v1, %v1497_v55  ;;  %v1407_v36 = vmax.f32 %v1072_v48, 0.0 }
 0x199   : > { %v1074_v19 = vpop.f32.mrf.mxu0  ;;  %v1227_v37 = vpop.f32.mrf.mxu1  ;;  %v1504_v52 = vmul.f32 %v1376_v47, %v1376_v47  ;;  %v1534_v48 = vmul.f32 %v1406_v18, %v1406_v18 }
 0x19a   : > { %v1410_v46 = vmax.f32 %v1074_v19, 0.0  ;;  %v1380_v31 = vmax.f32 %v1227_v37, 0.0  ;;  %2006 = vmatprep.mubr.bf16.mxu0 %v1627_v29  ;;  %2135 = vmatprep.mubr.bf16.mxu1 %v1613_v58  ;;  %v1505_v40 = vmul.f32 %v1377_v60, %v1377_v60  ;;  %v1535_v42 = vmul.f32 %v1407_v36, %v1407_v36 }
 0x19b   : > { %v1076_v15 = vpop.f32.mrf.mxu0  ;;  %v1229_v39 = vpop.f32.mrf.mxu1  ;;  %2007 = vmatmul.mubr.bf16.gmra.mxu0 %v1626_v6  ;;  %2136 = vmatmul.mubr.bf16.gmra.mxu1 %v1612_v0 }
 0x19c   : > { %v1508_v10 = vmul.f32 %v1380_v31, %v1380_v31  ;;  %v1411_v21 = vmax.f32 %v1076_v15, 0.0  ;;  %v1381_v4 = vmax.f32 %v1229_v39, 0.0  ;;  %v1538_v12 = vmul.f32 %v1410_v46, %v1410_v46 }
 0x19d   : > { %v1080_v55 = vpop.f32.mrf.mxu0  ;;  %v1233_v62 = vpop.f32.mrf.mxu1 }
 0x19e   : > { %v1539_v1 = vmul.f32 %v1411_v21, %v1411_v21  ;;  %v1509_v57 = vmul.f32 %v1381_v4, %v1381_v4  ;;  %v1616_v3 = vpack.c.bf16 %v1508_v10, %v1504_v52  ;;  %v1384_v29 = vmax.f32 %v1233_v62, 0.0 }
 0x19f   : > { %v1082_v58 = vpop.f32.mrf.mxu0  ;;  %v1235_v14 = vpop.f32.mrf.mxu1  ;;  %v1630_v6 = vpack.c.bf16 %v1538_v12, %v1534_v48  ;;  %v1414_v46 = vmax.f32 %v1080_v55, 0.0 }
 0x1a0   : > { %v1631_v47 = vpack.c.bf16 %v1539_v1, %v1535_v42  ;;  %v1617_v19 = vpack.c.bf16 %v1509_v57, %v1505_v40  ;;  %v1385_v37 = vmax.f32 %v1235_v14, 0.0  ;;  %v1415_v31 = vmax.f32 %v1082_v58, 0.0 }
 0x1a1   : > { %v1084_v0 = vpop.f32.mrf.mxu0  ;;  %v1237_v60 = vpop.f32.mrf.mxu1  ;;  %v1512_v36 = vmul.f32 %v1384_v29, %v1384_v29  ;;  %v1542_v58 = vmul.f32 %v1414_v46, %v1414_v46 }
 0x1a2   : > { %v1418_v15 = vmax.f32 %v1084_v0, 0.0  ;;  %v1388_v39 = vmax.f32 %v1237_v60, 0.0  ;;  %2014 = vmatprep.mubr.bf16.mxu0 %v1631_v47  ;;  %2143 = vmatprep.mubr.bf16.mxu1 %v1617_v19  ;;  %v1513_v18 = vmul.f32 %v1385_v37, %v1385_v37  ;;  %v1543_v1 = vmul.f32 %v1415_v31, %v1415_v31 }
 0x1a3   : > { %v1086_v21 = vpop.f32.mrf.mxu0  ;;  %v1239_v4 = vpop.f32.mrf.mxu1  ;;  %2015 = vmatmul.mubr.bf16.gmra.mxu0 %v1630_v6  ;;  %2144 = vmatmul.mubr.bf16.gmra.mxu1 %v1616_v3 }
 0x1a4   : > { %v1516_v52 = vmul.f32 %v1388_v39, %v1388_v39  ;;  %v1419_v10 = vmax.f32 %v1086_v21, 0.0  ;;  %v1389_v62 = vmax.f32 %v1239_v4, 0.0  ;;  %v1546_v40 = vmul.f32 %v1418_v15, %v1418_v15 }
 0x1a5   : > { %v1090_v42 = vpop.f32.mrf.mxu0  ;;  %v1243_v12 = vpop.f32.mrf.mxu1 }
 0x1a6   : > { %v1547_v57 = vmul.f32 %v1419_v10, %v1419_v10  ;;  %v1517_v48 = vmul.f32 %v1389_v62, %v1389_v62  ;;  %v1620_v14 = vpack.c.bf16 %v1516_v52, %v1512_v36  ;;  %v1392_v47 = vmax.f32 %v1243_v12, 0.0 }
 0x1a7   : > { %v1092_v19 = vpop.f32.mrf.mxu0  ;;  %v1245_v55 = vpop.f32.mrf.mxu1  ;;  %v1634_v6 = vpack.c.bf16 %v1546_v40, %v1542_v58  ;;  %v1422_v15 = vmax.f32 %v1090_v42, 0.0 }
 0x1a8   : > { %v1635_v29 = vpack.c.bf16 %v1547_v57, %v1543_v1  ;;  %v1621_v0 = vpack.c.bf16 %v1517_v48, %v1513_v18  ;;  %v1393_v60 = vmax.f32 %v1245_v55, 0.0  ;;  %v1423_v39 = vmax.f32 %v1092_v19, 0.0 }
 0x1a9   : > { %v1094_v3 = vpop.f32.mrf.mxu0  ;;  %v1247_v37 = vpop.f32.mrf.mxu1  ;;  %v1520_v31 = vmul.f32 %v1392_v47, %v1392_v47  ;;  %v1550_v19 = vmul.f32 %v1422_v15, %v1422_v15 }
 0x1aa   : > { %v1426_v21 = vmax.f32 %v1094_v3, 0.0  ;;  %v1396_v4 = vmax.f32 %v1247_v37, 0.0  ;;  %2022 = vmatprep.mubr.bf16.mxu0 %v1635_v29  ;;  %2151 = vmatprep.mubr.bf16.mxu1 %v1621_v0  ;;  %v1521_v46 = vmul.f32 %v1393_v60, %v1393_v60  ;;  %v1551_v57 = vmul.f32 %v1423_v39, %v1423_v39 }
 0x1ab   : > { %v1096_v10 = vpop.f32.mrf.mxu0  ;;  %v1249_v62 = vpop.f32.mrf.mxu1  ;;  %2023 = vmatmul.mubr.bf16.gmra.mxu0 %v1634_v6  ;;  %2152 = vmatmul.mubr.bf16.gmra.mxu1 %v1620_v14  ;;  %v1439_v14 = vmax.f32 %v4947_v45, 0.0 }
 0x1ac   : > { %v1524_v36 = vmul.f32 %v1396_v4, %v1396_v4  ;;  %v1427_v52 = vmax.f32 %v1096_v10, 0.0  ;;  %v1397_v12 = vmax.f32 %v1249_v62, 0.0  ;;  %v1554_v18 = vmul.f32 %v1426_v21, %v1426_v21 }
 0x1ad   : > { %v1100_v1 = vpop.f32.mrf.mxu0  ;;  %v1253_v40 = vpop.f32.mrf.mxu1  ;;  %v1443_v21 = vmax.f32 %v4951_v33, 0.0 }
 0x1ae   : > { %v1555_v48 = vmul.f32 %v1427_v52, %v1427_v52  ;;  %v1525_v58 = vmul.f32 %v1397_v12, %v1397_v12  ;;  %v1624_v55 = vpack.c.bf16 %v1524_v36, %v1520_v31  ;;  %v1400_v29 = vmax.f32 %v1253_v40, 0.0 }
 0x1af   : > { %v1102_v0 = vpop.f32.mrf.mxu0  ;;  %v1255_v42 = vpop.f32.mrf.mxu1  ;;  %v1638_v60 = vpack.c.bf16 %v1554_v18, %v1550_v19  ;;  %v1430_v15 = vmax.f32 %v1100_v1, 0.0  ;;  %v1567_v18 = vmul.f32 %v1439_v14, %v1439_v14 }
 0x1b0   : > { %v1639_v47 = vpack.c.bf16 %v1555_v48, %v1551_v57  ;;  %v1625_v3 = vpack.c.bf16 %v1525_v58, %v1521_v46  ;;  %v1401_v37 = vmax.f32 %v1255_v42, 0.0  ;;  %v1431_v10 = vmax.f32 %v1102_v0, 0.0 }
 0x1b1   : > { %v1104_v6 = vpop.f32.mrf.mxu0  ;;  %v1257_v4 = vpop.f32.mrf.mxu1  ;;  %v1528_v31 = vmul.f32 %v1400_v29, %v1400_v29  ;;  %v1571_v58 = vmul.f32 %v1443_v21, %v1443_v21  ;;  %v1558_v42 = vmul.f32 %v1430_v15, %v1430_v15 }
 0x1b2   : > { %v1434_v62 = vmax.f32 %v1104_v6, 0.0  ;;  %v1404_v39 = vmax.f32 %v1257_v4, 0.0  ;;  %2030 = vmatprep.mubr.bf16.mxu0 %v1639_v47  ;;  %2159 = vmatprep.mubr.bf16.mxu1 %v1625_v3  ;;  %v1529_v46 = vmul.f32 %v1401_v37, %v1401_v37  ;;  %v1559_v33 = vmul.f32 %v1431_v10, %v1431_v10 }
 0x1b3   : > { %v1106_v36 = vpop.f32.mrf.mxu0  ;;  %v1259_v52 = vpop.f32.mrf.mxu1  ;;  %2031 = vmatmul.mubr.bf16.gmra.mxu0 %v1638_v60  ;;  %2160 = vmatmul.mubr.bf16.gmra.mxu1 %v1624_v55  ;;  %v1447_v37 = vmax.f32 %v4957_v34, 0.0  ;;  %v1647_v21 = vpack.c.bf16 %v1571_v58, %v1567_v18  ;;  %v1455_v18 = vmax.f32 %v4968_v26, 0.0  ;;  %v1459_v58 = vmax.f32 %v4972_v61, 0.0 }
 0x1b4   : > { %v1532_v12 = vmul.f32 %v1404_v39, %v1404_v39  ;;  %v1435_v40 = vmax.f32 %v1106_v36, 0.0  ;;  %v1405_v45 = vmax.f32 %v1259_v52, 0.0  ;;  %v1562_v57 = vmul.f32 %v1434_v62, %v1434_v62 }
 0x1b5   : > { %v1263_v48 = vpop.f32.mrf.mxu1  ;;  %v1451_v39 = vmax.f32 %v4961_v13, 0.0 }
 0x1b6   : > { %v1563_v19 = vmul.f32 %v1435_v40, %v1435_v40  ;;  %v1533_v0 = vmul.f32 %v1405_v45, %v1405_v45  ;;  %v1628_v47 = vpack.c.bf16 %v1532_v12, %v1528_v31  ;;  %v1408_v3 = vmax.f32 %v1263_v48, 0.0 }
 0x1b7   : > { %v1265_v1 = vpop.f32.mrf.mxu1  ;;  %v1642_v60 = vpack.c.bf16 %v1562_v57, %v1558_v42  ;;  %v1579_v12 = vmul.f32 %v1451_v39, %v1451_v39 }
 0x1b8   : > { %v1643_v29 = vpack.c.bf16 %v1563_v19, %v1559_v33  ;;  %v1629_v6 = vpack.c.bf16 %v1533_v0, %v1529_v46  ;;  %v1409_v4 = vmax.f32 %v1265_v1, 0.0  ;;  %v1536_v10 = vmul.f32 %v1408_v3, %v1408_v3 }
 0x1b9   : > { %v1267_v55 = vpop.f32.mrf.mxu1  ;;  %v1575_v46 = vmul.f32 %v1447_v37, %v1447_v37  ;;  %v5581_v3 = vpack.c.bf16 %v4953_v50, %v4949_v49  ;;  %v1467_v49 = vmax.f32 %v4982_v20, 0.0 }
 0x1ba   : > { %v1412_v14 = vmax.f32 %v1267_v55, 0.0  ;;  %2038 = vmatprep.mubr.bf16.mxu0 %v1643_v29  ;;  %2167 = vmatprep.mubr.bf16.mxu1 %v1629_v6  ;;  %v1537_v15 = vmul.f32 %v1409_v4, %v1409_v4  ;;  %v1587_v55 = vmul.f32 %v1459_v58, %v1459_v58 }
 0x1bb   : > { %v1269_v62 = vpop.f32.mrf.mxu1  ;;  %2039 = vmatmul.mubr.bf16.gmra.mxu0 %v1642_v60  ;;  %2168 = vmatmul.mubr.bf16.gmra.mxu1 %v1628_v47  ;;  %v1651_v0 = vpack.c.bf16 %v1579_v12, %v1575_v46  ;;  %v1583_v60 = vmul.f32 %v1455_v18, %v1455_v18 }
 0x1bc   : > { %v1540_v31 = vmul.f32 %v1412_v14, %v1412_v14  ;;  %v1413_v36 = vmax.f32 %v1269_v62, 0.0  ;;  %2046 = vmatprep.mubr.bf16.mxu0 %v1647_v21  ;;  %v1463_v62 = vmax.f32 %v4978_v63, 0.0 }
 0x1bd   : > { %v1273_v52 = vpop.f32.mrf.mxu1 }
 0x1be   : > { %v1541_v40 = vmul.f32 %v1413_v36, %v1413_v36  ;;  %v1632_v45 = vpack.c.bf16 %v1540_v31, %v1536_v10  ;;  %v1416_v34 = vmax.f32 %v1273_v52, 0.0  ;;  %v5582_v52 = vpack.c.bf16 %v4963_v16, %v4959_v44 }
 0x1bf   : > { %v1275_v57 = vpop.f32.mrf.mxu1 }
 0x1c0   : > { %v1633_v13 = vpack.c.bf16 %v1541_v40, %v1537_v15  ;;  %v1417_v48 = vmax.f32 %v1275_v57, 0.0  ;;  %v1544_v42 = vmul.f32 %v1416_v34, %v1416_v34  ;;  %v1655_v15 = vpack.c.bf16 %v1587_v55, %v1583_v60 }
 0x1c1   : > { %v1277_v33 = vpop.f32.mrf.mxu1  ;;  %v1591_v34 = vmul.f32 %v1463_v62, %v1463_v62  ;;  %v1595_v57 = vmul.f32 %v1467_v49, %v1467_v49 }
 0x1c2   : > { %v1420_v19 = vmax.f32 %v1277_v33, 0.0  ;;  %2175 = vmatprep.mubr.bf16.mxu1 %v1633_v13  ;;  %v1545_v1 = vmul.f32 %v1417_v48, %v1417_v48  ;;  %v5005_v33 = vld [vmem:[%s5449_s2] ss:$0 sm:$0xff] }
 0x1c3   : > { %v1279_v47 = vpop.f32.mrf.mxu1  ;;  %2047 = vmatmul.mubr.bf16.gmra.mxu0 %v5581_v3  ;;  %2176 = vmatmul.mubr.bf16.gmra.mxu1 %v1632_v45  ;;  %v684_v44 = vmul.f32 %v5005_v33, %v4509_v43  ;;  %v685_v58 = vmul.f32 %v5005_v33, %v4492_v35 }
 0x1c4   : > { %v1548_v29 = vmul.f32 %v1420_v19, %v1420_v19  ;;  %v1421_v6 = vmax.f32 %v1279_v47, 0.0  ;;  %2054 = vmatprep.mubr.bf16.mxu0 %v1651_v0 }
 0x1c5   : > { %v1283_v4 = vpop.f32.mrf.mxu1  ;;  %v717_v60 = vadd.f32 %v685_v58, %v4479_v28  ;;  %v5584_v28 = vpack.c.bf16 %v4984_v22, %v4980_v11  ;;  %v691_v11 = vmul.f32 %v5005_v33, %v4666_v25  ;;  %v5585_v25 = vpack.c.bf16 %v4567_v30, %v4565_v27 }
 0x1c6   : > { %v1549_v26 = vmul.f32 %v1421_v6, %v1421_v6  ;;  %v1636_v37 = vpack.c.bf16 %v1548_v29, %v1544_v42  ;;  %v1424_v61 = vmax.f32 %v1283_v4, 0.0  ;;  %v1659_v42 = vpack.c.bf16 %v1595_v57, %v1591_v34 }
 0x1c7   : > { %v1285_v39 = vpop.f32.mrf.mxu1  ;;  %v716_v29 = vadd.f32 %v684_v44, %v4496_v38  ;;  %v689_v38 = vmul.f32 %v5005_v33, %v4607_v8 }
 0x1c8   : > { %v1637_v14 = vpack.c.bf16 %v1549_v26, %v1545_v1  ;;  %v1425_v21 = vmax.f32 %v1285_v39, 0.0  ;;  %v1552_v31 = vmul.f32 %v1424_v61, %v1424_v61  ;;  %v5583_v1 = vpack.c.bf16 %v4974_v2, %v4970_v9 }
 0x1c9   : > { %v1287_v10 = vpop.f32.mrf.mxu1  ;;  %v688_v39 = vmul.f32 %v5005_v33, %v4599_v59  ;;  %v2240_v2 = vpack.c.bf16 %v717_v60, %v716_v29 }
 0x1ca   : > { %v1428_v50 = vmax.f32 %v1287_v10, 0.0  ;;  %2183 = vmatprep.mubr.bf16.mxu1 %v1637_v14  ;;  %v1553_v46 = vmul.f32 %v1425_v21, %v1425_v21 }
 0x1cb   : > { %v1289_v36 = vpop.f32.mrf.mxu1  ;;  %2055 = vmatmul.mubr.bf16.gmra.mxu0 %v5582_v52  ;;  %2184 = vmatmul.mubr.bf16.gmra.mxu1 %v1636_v37 }
 0x1cc   : > { %v1556_v12 = vmul.f32 %v1428_v50, %v1428_v50  ;;  %v1429_v40 = vmax.f32 %v1289_v36, 0.0  ;;  %2062 = vmatprep.mubr.bf16.mxu0 %v1655_v15  ;;  %v720_v50 = vadd.f32 %v688_v39, %v4585_v51  ;;  %v721_v36 = vadd.f32 %v689_v38, %v4589_v54  ;;  %v5591_v38 = vld [vmem:[#allocation41_spill] sm:$0xff] }
 0x1cd   : > { %v1293_v45 = vpop.f32.mrf.mxu1  ;;  %v692_v51 = vmul.f32 %v5005_v33, %v4707_v5  ;;  %v693_v54 = vmul.f32 %v5005_v33, %v4710_v23  ;;  %v723_v5 = vadd.f32 %v691_v11, %v4638_v41  ;;  %v5595_v11 = vld [vmem:[#allocation51_spill] sm:$0xff] }
 0x1ce   : > { %v1557_v63 = vmul.f32 %v1429_v40, %v1429_v40  ;;  %v1640_v13 = vpack.c.bf16 %v1556_v12, %v1552_v31  ;;  %v1432_v20 = vmax.f32 %v1293_v45, 0.0  ;;  %v2242_v57 = vpack.c.bf16 %v721_v36, %v720_v50  ;;  %v5593_v36 = vld [vmem:[#allocation47_spill] sm:$0xff] }
 0x1cf   : > { %v1295_v48 = vpop.f32.mrf.mxu1  ;;  %v724_v44 = vadd.f32 %v692_v51, %v4691_v17  ;;  %v725_v23 = vadd.f32 %v693_v54, %v4701_v32  ;;  %v701_v51 = vmul.f32 %v5005_v33, %v5595_v11 }
 0x1d0   : > { %v1641_v16 = vpack.c.bf16 %v1557_v63, %v1553_v46  ;;  %v1433_v18 = vmax.f32 %v1295_v48, 0.0  ;;  %v1560_v47 = vmul.f32 %v1432_v20, %v1432_v20  ;;  %v690_v46 = vmul.f32 %v5005_v33, %v4663_v7 }
 0x1d1   : > { %v1297_v19 = vpop.f32.mrf.mxu1 }
 0x1d2   : > { %v1436_v0 = vmax.f32 %v1297_v19, 0.0  ;;  %2191 = vmatprep.mubr.bf16.mxu1 %v1641_v16  ;;  %v1561_v6 = vmul.f32 %v1433_v18, %v1433_v18  ;;  %v722_v7 = vadd.f32 %v690_v46, %v4644_v53  ;;  %v694_v53 = vmul.f32 %v5005_v33, %v4752_v24  ;;  %v5588_v24 = vld [vmem:[#allocation37_spill] sm:$0xff] }
 0x1d3   : > { %v1299_v3 = vpop.f32.mrf.mxu1  ;;  %2063 = vmatmul.mubr.bf16.gmra.mxu0 %v5583_v1  ;;  %2192 = vmatmul.mubr.bf16.gmra.mxu1 %v1640_v13 }
 0x1d4   : > { %v1564_v43 = vmul.f32 %v1436_v0, %v1436_v0  ;;  %v1437_v4 = vmax.f32 %v1299_v3, 0.0  ;;  %2070 = vmatprep.mubr.bf16.mxu0 %v1659_v42  ;;  %v695_v42 = vmul.f32 %v5005_v33, %v4755_v56  ;;  %v2243_v41 = vpack.c.bf16 %v723_v5, %v722_v7  ;;  %v5586_v3 = vld [vmem:[#allocation42_spill] sm:$0xff]  ;;  %v5597_v7 = vld [vmem:[#allocation45_spill] sm:$0xff] }
 0x1d5   : > { %v1303_v35 = vpop.f32.mrf.mxu1  ;;  %v696_v17 = vmul.f32 %v5005_v33, %v5586_v3  ;;  %v5602_v3 = vld [vmem:[#allocation58_spill] sm:$0xff] }
 0x1d6   : > { %v1565_v55 = vmul.f32 %v1437_v4, %v1437_v4  ;;  %v1644_v26 = vpack.c.bf16 %v1564_v43, %v1560_v47  ;;  %v1440_v37 = vmax.f32 %v1303_v35, 0.0  ;;  %v5587_v43 = vld [vmem:[#allocation43_spill] sm:$0xff]  ;;  %v726_v35 = vadd.f32 %v694_v53, %v5588_v24  ;;  %v5600_v53 = vld [vmem:[#allocation54_spill] sm:$0xff] }
 0x1d7   : > { %v1305_v61 = vpop.f32.mrf.mxu1  ;;  %v697_v32 = vmul.f32 %v5005_v33, %v5587_v43 }
 0x1d8   : > { %v1645_v14 = vpack.c.bf16 %v1565_v55, %v1561_v6  ;;  %v1441_v9 = vmax.f32 %v1305_v61, 0.0  ;;  %v1568_v62 = vmul.f32 %v1440_v37, %v1440_v37  ;;  %v2244_v6 = vpack.c.bf16 %v725_v23, %v724_v44  ;;  %v5589_v55 = vld [vmem:[#allocation36_spill] sm:$0xff]  ;;  %v5590_v61 = vld [vmem:[#allocation39_spill] sm:$0xff] }
 0x1d9   : > { %v1307_v21 = vpop.f32.mrf.mxu1  ;;  %v727_v56 = vadd.f32 %v695_v42, %v5589_v55  ;;  %v728_v39 = vadd.f32 %v696_v17, %v5590_v61  ;;  %v702_v42 = vmul.f32 %v5005_v33, %v5600_v53  ;;  %v704_v17 = vmul.f32 %v5005_v33, %v5602_v3  ;;  %v5609_v61 = vld [vmem:[#allocation60_spill] sm:$0xff] }
 0x1da   : > { %v1444_v10 = vmax.f32 %v1307_v21, 0.0  ;;  %2199 = vmatprep.mubr.bf16.mxu1 %v1645_v14  ;;  %v1569_v15 = vmul.f32 %v1441_v9, %v1441_v9  ;;  %v729_v21 = vadd.f32 %v697_v32, %v5591_v38  ;;  %v5605_v32 = vld [vmem:[#allocation52_spill] sm:$0xff]  ;;  %v5611_v38 = vld [vmem:[#allocation23_spill] sm:$0xff] }
 0x1db   : > { %v1309_v49 = vpop.f32.mrf.mxu1  ;;  %2071 = vmatmul.mubr.bf16.gmra.mxu0 %v5584_v28  ;;  %2200 = vmatmul.mubr.bf16.gmra.mxu1 %v1644_v26  ;;  %v5592_v28 = vld [vmem:[#allocation46_spill] sm:$0xff] }
 0x1dc   : > { %v1572_v59 = vmul.f32 %v1444_v10, %v1444_v10  ;;  %v1445_v31 = vmax.f32 %v1309_v49, 0.0  ;;  %3633 = vmatprep.mubr.bf16.mxu0 %v2240_v2  ;;  %v2245_v49 = vpack.c.bf16 %v727_v56, %v726_v35  ;;  %v698_v50 = vmul.f32 %v5005_v33, %v5592_v28  ;;  %v5607_v35 = vld [vmem:[#allocation57_spill] sm:$0xff] }
 0x1dd   : > { %v1313_v52 = vpop.f32.mrf.mxu1 }
 0x1de   : > { %v1573_v8 = vmul.f32 %v1445_v31, %v1445_v31  ;;  %v1648_v12 = vpack.c.bf16 %v1572_v59, %v1568_v62  ;;  %v1448_v40 = vmax.f32 %v1313_v52, 0.0  ;;  %v699_v52 = vmul.f32 %v5005_v33, %v5593_v36 }
 0x1df   : > { %v1315_v45 = vpop.f32.mrf.mxu1 }
 0x1e0   : > { %v1649_v22 = vpack.c.bf16 %v1573_v8, %v1569_v15  ;;  %v1449_v34 = vmax.f32 %v1315_v45, 0.0  ;;  %v1576_v20 = vmul.f32 %v1448_v40, %v1448_v40  ;;  %v5594_v8 = vld [vmem:[#allocation50_spill] sm:$0xff]  ;;  %v2246_v45 = vpack.c.bf16 %v729_v21, %v728_v39 }
 0x1e1   : > { %v1317_v63 = vpop.f32.mrf.mxu1  ;;  %v700_v46 = vmul.f32 %v5005_v33, %v5594_v8  ;;  %v707_v39 = vmul.f32 %v5005_v33, %v5609_v61  ;;  %v709_v21 = vmul.f32 %v5005_v33, %v5611_v38 }
 0x1e2   : > { %v1452_v13 = vmax.f32 %v1317_v63, 0.0  ;;  %2207 = vmatprep.mubr.bf16.mxu1 %v1649_v22  ;;  %v1577_v16 = vmul.f32 %v1449_v34, %v1449_v34 }
 0x1e3   : > { %v1319_v48 = vpop.f32.mrf.mxu1  ;;  %2208 = vmatmul.mubr.bf16.gmra.mxu1 %v1648_v12  ;;  %3634 = vmatmul.mubr.bf16.vlgmr.msra.gmra.mxu0 %v5585_v25 }
 0x1e4   : > { %v1580_v18 = vmul.f32 %v1452_v13, %v1452_v13  ;;  %v1453_v58 = vmax.f32 %v1319_v48, 0.0  ;;  %3637 = vmatprep.mubr.bf16.mxu0 %v2242_v57  ;;  %v5596_v57 = vld [vmem:[#allocation44_spill] sm:$0xff] }
 0x1e5   : > { %v1323_v19 = vpop.f32.mrf.mxu1  ;;  %v730_v54 = vadd.f32 %v698_v50, %v5596_v57  ;;  %v5598_v48 = vld [vmem:[#allocation48_spill] sm:$0xff] }
 0x1e6   : > { %v1581_v0 = vmul.f32 %v1453_v58, %v1453_v58  ;;  %v1652_v27 = vpack.c.bf16 %v1580_v18, %v1576_v20  ;;  %v1456_v30 = vmax.f32 %v1323_v19, 0.0  ;;  %v731_v20 = vadd.f32 %v699_v52, %v5597_v7  ;;  %v5599_v18 = vld [vmem:[#allocation49_spill] sm:$0xff]  ;;  %v5614_v50 = vld [vmem:[#allocation20_spill] sm:$0xff]  ;;  %v5616_v52 = vld [vmem:[#allocation26_spill] sm:$0xff] }
 0x1e7   : > { %v1325_v47 = vpop.f32.mrf.mxu1  ;;  %v732_v25 = vadd.f32 %v700_v46, %v5598_v48  ;;  %v733_v58 = vadd.f32 %v701_v51, %v5599_v18  ;;  %v710_v8 = vmul.f32 %v5005_v33, %v5616_v52  ;;  %v5617_v46 = vld [vmem:[#allocation27_spill] sm:$0xff] }
 0x1e8   : > { %v1653_v1 = vpack.c.bf16 %v1581_v0, %v1577_v16  ;;  %v1457_v29 = vmax.f32 %v1325_v47, 0.0  ;;  %v1584_v26 = vmul.f32 %v1456_v30, %v1456_v30  ;;  %v2247_v0 = vpack.c.bf16 %v731_v20, %v730_v54  ;;  %v5619_v51 = vld [vmem:[#allocation31_spill] sm:$0xff]  ;;  %v5621_v54 = vld [vmem:[#allocation24_spill] sm:$0xff]  ;;  %v5623_v20 = vld [vmem:[#allocation30_spill] sm:$0xff] }
 0x1e9   : > { %v1327_v4 = vpop.f32.mrf.mxu1 }
 0x1ea   : > { %v1460_v60 = vmax.f32 %v1327_v4, 0.0  ;;  %2215 = vmatprep.mubr.bf16.mxu1 %v1653_v1  ;;  %v1585_v14 = vmul.f32 %v1457_v29, %v1457_v29  ;;  %v5603_v1 = vld [vmem:[#allocation59_spill] sm:$0xff] }
 0x1eb   : > { %v1329_v37 = vpop.f32.mrf.mxu1  ;;  %2216 = vmatmul.mubr.bf16.gmra.mxu1 %v1652_v27  ;;  %3638 = vmatmul.mubr.bf16.gmra.mxu0 %v2243_v41  ;;  %v5601_v27 = vld [vmem:[#allocation55_spill] sm:$0xff]  ;;  %v2248_v41 = vpack.c.bf16 %v733_v58, %v732_v25  ;;  %v705_v29 = vmul.f32 %v5005_v33, %v5603_v1 }
 0x1ec   : > { %v1588_v9 = vmul.f32 %v1460_v60, %v1460_v60  ;;  %v1461_v2 = vmax.f32 %v1329_v37, 0.0  ;;  %3641 = vmatprep.mubr.bf16.mxu0 %v2244_v6  ;;  %v703_v30 = vmul.f32 %v5005_v33, %v5601_v27  ;;  %v5604_v6 = vld [vmem:[#allocation53_spill] sm:$0xff]  ;;  %v5606_v60 = vld [vmem:[#allocation56_spill] sm:$0xff] }
 0x1ed   : > { %v1333_v10 = vpop.f32.mrf.mxu1  ;;  %v734_v43 = vadd.f32 %v702_v42, %v5604_v6  ;;  %v736_v24 = vadd.f32 %v704_v17, %v5606_v60  ;;  %v737_v55 = vadd.f32 %v705_v29, %v5607_v35 }
 0x1ee   : > { %v1589_v62 = vmul.f32 %v1461_v2, %v1461_v2  ;;  %v1656_v15 = vpack.c.bf16 %v1588_v9, %v1584_v26  ;;  %v1464_v59 = vmax.f32 %v1333_v10, 0.0  ;;  %v735_v4 = vadd.f32 %v703_v30, %v5605_v32  ;;  %v5608_v26 = vld [vmem:[#allocation61_spill] sm:$0xff]  ;;  %v5610_v9 = vld [vmem:[#allocation22_spill] sm:$0xff]  ;;  %v5612_v10 = vld [vmem:[#allocation40_spill] sm:$0xff] }
 0x1ef   : > { %v1335_v31 = vpop.f32.mrf.mxu1  ;;  %v706_v37 = vmul.f32 %v5005_v33, %v5608_v26  ;;  %v708_v2 = vmul.f32 %v5005_v33, %v5610_v9 }
 0x1f0   : > { %v1657_v12 = vpack.c.bf16 %v1589_v62, %v1585_v14  ;;  %v1465_v40 = vmax.f32 %v1335_v31, 0.0  ;;  %v1592_v63 = vmul.f32 %v1464_v59, %v1464_v59  ;;  %v2249_v56 = vpack.c.bf16 %v735_v4, %v734_v43  ;;  %v5615_v59 = vld [vmem:[#allocation21_spill] sm:$0xff] }
 0x1f1   : > { %v1337_v22 = vpop.f32.mrf.mxu1  ;;  %v2250_v14 = vpack.c.bf16 %v737_v55, %v736_v24  ;;  %v738_v62 = vadd.f32 %v706_v37, %v5612_v10  ;;  %v741_v31 = vadd.f32 %v709_v21, %v5615_v59 }
 0x1f2   : > { %v1468_v34 = vmax.f32 %v1337_v22, 0.0  ;;  %2223 = vmatprep.mubr.bf16.mxu1 %v1657_v12  ;;  %v1593_v5 = vmul.f32 %v1465_v40, %v1465_v40  ;;  %v711_v12 = vmul.f32 %v5005_v33, %v5617_v46  ;;  %v713_v22 = vmul.f32 %v5005_v33, %v5619_v51 }
 0x1f3   : > { %v1339_v13 = vpop.f32.mrf.mxu1  ;;  %2224 = vmatmul.mubr.bf16.gmra.mxu1 %v1656_v15  ;;  %3642 = vmatmul.mubr.bf16.gmra.mxu0 %v2245_v49  ;;  %v5613_v49 = vld [vmem:[#allocation38_spill] sm:$0xff]  ;;  %v740_v15 = vadd.f32 %v708_v2, %v5614_v50 }
 0x1f4   : > { %v1596_v44 = vmul.f32 %v1468_v34, %v1468_v34  ;;  %v1469_v16 = vmax.f32 %v1339_v13, 0.0  ;;  %3645 = vmatprep.mubr.bf16.mxu0 %v2246_v45  ;;  %v739_v28 = vadd.f32 %v707_v39, %v5613_v49  ;;  %v5618_v45 = vld [vmem:[#allocation29_spill] sm:$0xff]  ;;  %v5622_v13 = vld [vmem:[#allocation28_spill] sm:$0xff]  ;;  %v745_v48 = vadd.f32 %v713_v22, %v5623_v20 }
 0x1f5   : > { %v2252_v40 = vpack.c.bf16 %v741_v31, %v740_v15  ;;  %v712_v11 = vmul.f32 %v5005_v33, %v5618_v45  ;;  %v5620_v34 = vld [vmem:[#allocation25_spill] sm:$0xff] }
 0x1f6   : > { %v1597_v23 = vmul.f32 %v1469_v16, %v1469_v16  ;;  %v1660_v19 = vpack.c.bf16 %v1596_v44, %v1592_v63  ;;  %v2251_v36 = vpack.c.bf16 %v739_v28, %v738_v62  ;;  %v742_v57 = vadd.f32 %v710_v8, %v5620_v34  ;;  %v5625_v16 = vld [vmem:[#allocation35_spill] sm:$0xff] }
 0x1f7   : > { %v743_v63 = vadd.f32 %v711_v12, %v5621_v54  ;;  %v744_v7 = vadd.f32 %v712_v11, %v5622_v13  ;;  %v715_v18 = vmul.f32 %v5005_v33, %v5625_v16 }
 0x1f8   : > { %v1661_v47 = vpack.c.bf16 %v1597_v23, %v1593_v5  ;;  %v5624_v5 = vld [vmem:[#allocation34_spill] sm:$0xff]  ;;  %v5626_v23 = vld [vmem:[#allocation33_spill] sm:$0xff] }
 0x1f9   : > { %v2253_v25 = vpack.c.bf16 %v743_v63, %v742_v57  ;;  %v714_v44 = vmul.f32 %v5005_v33, %v5624_v5  ;;  %v2254_v58 = vpack.c.bf16 %v745_v48, %v744_v7 }
 0x1fa   : > { %2231 = vmatprep.mubr.bf16.mxu1 %v1661_v47 }
 0x1fb   : > { %2232 = vmatmul.mubr.bf16.gmra.mxu1 %v1660_v19  ;;  %3646 = vmatmul.mubr.bf16.gmra.mxu0 %v2247_v0  ;;  %v746_v19 = vadd.f32 %v714_v44, %v5626_v23  ;;  %v5627_v0 = vld [vmem:[#allocation32_spill] sm:$0xff] }
 0x1fc   : > { %3649 = vmatprep.mubr.bf16.mxu0 %v2248_v41  ;;  %v747_v53 = vadd.f32 %v715_v18, %v5627_v0 }
 0x1fe   : > { %v2255_v42 = vpack.c.bf16 %v747_v53, %v746_v19 }
 0x203   : > { %3650 = vmatmul.mubr.bf16.gmra.mxu0 %v2249_v56 }
 0x204   : > { %3653 = vmatprep.mubr.bf16.mxu0 %v2250_v14 }
 0x20b   : > { %3654 = vmatmul.mubr.bf16.gmra.mxu0 %v2251_v36 }
 0x20c   : > { %3657 = vmatprep.mubr.bf16.mxu0 %v2252_v40 }
 0x213   : > { %3658 = vmatmul.mubr.bf16.gmra.mxu0 %v2253_v25 }
 0x214   : > { %3661 = vmatprep.mubr.bf16.mxu0 %v2254_v58 }
 0x21b   : > { %3662 = vmatmul.mubr.bf16.gmra.mxu0 %v2255_v42 }
 0x223   : > { %v3385_v27 = vpop.f32.mrf.mxu0 }
 0x225   : > { %v3386_v30 = vpop.f32.mrf.mxu0 }
 0x226   : > { %v3387_v47 = vadd.f32 %v3386_v30, %v3385_v27 }
 0x227   : > { %v3388_v41 = vpop.f32.mrf.mxu0 }
 0x229   : > { %v3389_v3 = vpop.f32.mrf.mxu0 }
 0x22a   : > { %v3390_v17 = vadd.f32 %v3389_v3, %v3388_v41 }
 0x22b   : > { %v3391_v1 = vpop.f32.mrf.mxu0 }
 0x22d   : > { %v3392_v29 = vpop.f32.mrf.mxu0 }
 0x22e   : > { %v5106_v6 = vadd.f32 %v3392_v29, %v3391_v1 }
 0x22f   : > { %v3394_v33 = vpop.f32.mrf.mxu0 }
 0x231   : > { %v3395_v43 = vpop.f32.mrf.mxu0 }
 0x232   : > { %v5108_v32 = vadd.f32 %v3395_v43, %v3394_v33 }
 0x233   : > { %v3397_v4 = vpop.f32.mrf.mxu0 }
 0x235   : > { %v3398_v60 = vpop.f32.mrf.mxu0 }
 0x236   : > { %v5110_v24 = vadd.f32 %v3398_v60, %v3397_v4 }
 0x237   : > { %v3400_v35 = vpop.f32.mrf.mxu0 }
 0x239   : > { %v3401_v55 = vpop.f32.mrf.mxu0 }
 0x23a   : > { %v5112_v56 = vadd.f32 %v3401_v55, %v3400_v35 }
 0x23b   : > { %v3403_v26 = vpop.f32.mrf.mxu0 }
 0x23d   : > { %v3404_v37 = vpop.f32.mrf.mxu0 }
 0x23e   : > { %v5114_v61 = vadd.f32 %v3404_v37, %v3403_v26 }
 0x23f   : > { %v3406_v39 = vpop.f32.mrf.mxu0 }
 0x241   : > { %v3407_v14 = vpop.f32.mrf.mxu0 }
 0x242   : > { %v5116_v9 = vadd.f32 %v3407_v14, %v3406_v39 }
 0x243   : > { %v3409_v2 = vpop.f32.mrf.mxu0  ;;  %v3497_v38 = vpop.f32.mrf.mxu1 }
 0x245   : > { %v3410_v21 = vpop.f32.mrf.mxu0  ;;  %v3498_v10 = vpop.f32.mrf.mxu1 }
 0x246   : > { %v5118_v62 = vadd.f32 %v3410_v21, %v3409_v2  ;;  %v3499_v49 = vadd.f32 %v3498_v10, %v3497_v38 }
 0x247   : > { %v3412_v28 = vpop.f32.mrf.mxu0  ;;  %v3500_v50 = vpop.f32.mrf.mxu1 }
 0x248   : > { %v5120_v15 = vadd.f32 %v3499_v49, %v3387_v47 }
 0x249   : > { %v3413_v59 = vpop.f32.mrf.mxu0  ;;  %v3501_v31 = vpop.f32.mrf.mxu1 }
 0x24a   : > { %v5122_v36 = vadd.f32 %v3413_v59, %v3412_v28  ;;  %v3502_v52 = vadd.f32 %v3501_v31, %v3500_v50 }
 0x24b   : > { %v3415_v8 = vpop.f32.mrf.mxu0  ;;  %v5124_v46 = vpop.f32.mrf.mxu1 }
 0x24c   : > { %v5126_v12 = vadd.f32 %v3502_v52, %v3390_v17 }
 0x24d   : > { %v3416_v40 = vpop.f32.mrf.mxu0  ;;  %v5128_v45 = vpop.f32.mrf.mxu1 }
 0x24e   : > { %v5130_v11 = vadd.f32 %v3416_v40, %v3415_v8 }
 0x24f   : > { %v3418_v51 = vpop.f32.mrf.mxu0  ;;  %v5132_v22 = vpop.f32.mrf.mxu1 }
 0x251   : > { %v3419_v34 = vpop.f32.mrf.mxu0  ;;  %v5134_v57 = vpop.f32.mrf.mxu1 }
 0x252   : > { %v5136_v54 = vadd.f32 %v3419_v34, %v3418_v51 }
 0x253   : > { %v3421_v63 = vpop.f32.mrf.mxu0  ;;  %v5138_v13 = vpop.f32.mrf.mxu1 }
 0x255   : > { %v3422_v7 = vpop.f32.mrf.mxu0  ;;  %v5140_v20 = vpop.f32.mrf.mxu1 }
 0x256   : > { %v5142_v48 = vadd.f32 %v3422_v7, %v3421_v63 }
 0x257   : > { %v3424_v25 = vpop.f32.mrf.mxu0  ;;  %v5144_v5 = vpop.f32.mrf.mxu1 }
 0x259   : > { %v3425_v44 = vpop.f32.mrf.mxu0  ;;  %v5146_v16 = vpop.f32.mrf.mxu1 }
 0x25a   : > { %v5148_v18 = vadd.f32 %v3425_v44, %v3424_v25 }
 0x25b   : > { %v3427_v58 = vpop.f32.mrf.mxu0  ;;  %v5150_v23 = vpop.f32.mrf.mxu1 }
 0x25d   : > { %v3428_v19 = vpop.f32.mrf.mxu0  ;;  %v5152_v0 = vpop.f32.mrf.mxu1 }
 0x25e   : > { %v5154_v53 = vadd.f32 %v3428_v19, %v3427_v58 }
 0x25f   : > { %v3430_v42 = vpop.f32.mrf.mxu0  ;;  %v5156_v27 = vpop.f32.mrf.mxu1 }
 0x261   : > { %v3431_v30 = vpop.f32.mrf.mxu0  ;;  %v5158_v47 = vpop.f32.mrf.mxu1 }
 0x262   : > { %v5160_v41 = vadd.f32 %v3431_v30, %v3430_v42 }
 0x263   : > { %v3433_v3 = vpop.f32.mrf.mxu0  ;;  %v5162_v17 = vpop.f32.mrf.mxu1 }
 0x265   : > { %v3434_v1 = vpop.f32.mrf.mxu0  ;;  %v5164_v29 = vpop.f32.mrf.mxu1 }
 0x266   : > { %v5166_v33 = vadd.f32 %v3434_v1, %v3433_v3 }
 0x267   : > { %v3436_v43 = vpop.f32.mrf.mxu0  ;;  %v5168_v4 = vpop.f32.mrf.mxu1 }
 0x268   : > { %5628 = vst [vmem:[#allocation42_spill] sm:$0xff] %v5166_v33 }
 0x269   : > { %v3437_v60 = vpop.f32.mrf.mxu0  ;;  %v5170_v35 = vpop.f32.mrf.mxu1 }
 0x26a   : > { %v5172_v55 = vadd.f32 %v3437_v60, %v3436_v43 }
 0x26b   : > { %v3439_v26 = vpop.f32.mrf.mxu0  ;;  %v5174_v37 = vpop.f32.mrf.mxu1 }
 0x26c   : > { %5629 = vst [vmem:[#allocation43_spill] sm:$0xff] %v5172_v55 }
 0x26d   : > { %v3440_v39 = vpop.f32.mrf.mxu0  ;;  %v5176_v14 = vpop.f32.mrf.mxu1 }
 0x26e   : > { %v5178_v2 = vadd.f32 %v3440_v39, %v3439_v26 }
 0x26f   : > { %v3442_v38 = vpop.f32.mrf.mxu0  ;;  %v5180_v21 = vpop.f32.mrf.mxu1 }
 0x270   : > { %5630 = vst [vmem:[#allocation37_spill] sm:$0xff] %v5178_v2 }
 0x271   : > { %v3443_v10 = vpop.f32.mrf.mxu0  ;;  %v5182_v49 = vpop.f32.mrf.mxu1 }
 0x272   : > { %v5184_v28 = vadd.f32 %v3443_v10, %v3442_v38 }
 0x273   : > { %v3445_v50 = vpop.f32.mrf.mxu0  ;;  %v5186_v59 = vpop.f32.mrf.mxu1 }
 0x274   : > { %5631 = vst [vmem:[#allocation36_spill] sm:$0xff] %v5184_v28 }
 0x275   : > { %v3446_v31 = vpop.f32.mrf.mxu0  ;;  %v5188_v52 = vpop.f32.mrf.mxu1 }
 0x276   : > { %v5190_v8 = vadd.f32 %v3446_v31, %v3445_v50 }
 0x277   : > { %v3448_v40 = vpop.f32.mrf.mxu0  ;;  %v5192_v51 = vpop.f32.mrf.mxu1 }
 0x278   : > { %5632 = vst [vmem:[#allocation39_spill] sm:$0xff] %v5190_v8 }
 0x279   : > { %v3449_v34 = vpop.f32.mrf.mxu0  ;;  %v5194_v63 = vpop.f32.mrf.mxu1 }
 0x27a   : > { %v5196_v7 = vadd.f32 %v3449_v34, %v3448_v40 }
 0x27b   : > { %v3451_v25 = vpop.f32.mrf.mxu0  ;;  %v5198_v44 = vpop.f32.mrf.mxu1 }
 0x27c   : > { %5633 = vst [vmem:[#allocation41_spill] sm:$0xff] %v5196_v7 }
 0x27d   : > { %v3452_v58 = vpop.f32.mrf.mxu0  ;;  %v5200_v19 = vpop.f32.mrf.mxu1 }
 0x27e   : > { %v5202_v42 = vadd.f32 %v3452_v58, %v3451_v25 }
 0x27f   : > { %v3454_v30 = vpop.f32.mrf.mxu0  ;;  %v5204_v3 = vpop.f32.mrf.mxu1 }
 0x280   : > { %5634 = vst [vmem:[#allocation46_spill] sm:$0xff] %v5202_v42 }
 0x281   : > { %v3455_v1 = vpop.f32.mrf.mxu0  ;;  %v5206_v43 = vpop.f32.mrf.mxu1 }
 0x282   : > { %v5208_v60 = vadd.f32 %v3455_v1, %v3454_v30 }
 0x283   : > { %v3457_v26 = vpop.f32.mrf.mxu0  ;;  %v5210_v39 = vpop.f32.mrf.mxu1 }
 0x284   : > { %5635 = vst [vmem:[#allocation47_spill] sm:$0xff] %v5208_v60  ;;  %5636 = vst [vmem:[#allocation50_spill] sm:$0xff] %v5210_v39 }
 0x285   : > { %v3458_v38 = vpop.f32.mrf.mxu0  ;;  %v5212_v10 = vpop.f32.mrf.mxu1 }
 0x286   : > { %5637 = vst [vmem:[#allocation51_spill] sm:$0xff] %v5212_v10  ;;  %v5214_v50 = vadd.f32 %v3458_v38, %v3457_v26 }
 0x287   : > { %v3460_v31 = vpop.f32.mrf.mxu0  ;;  %v5216_v40 = vpop.f32.mrf.mxu1 }
 0x288   : > { %5638 = vst [vmem:[#allocation44_spill] sm:$0xff] %v5214_v50  ;;  %5639 = vst [vmem:[#allocation45_spill] sm:$0xff] %v5216_v40 }
 0x289   : > { %v3461_v34 = vpop.f32.mrf.mxu0  ;;  %v5218_v25 = vpop.f32.mrf.mxu1 }
 0x28a   : > { %5640 = vst [vmem:[#allocation48_spill] sm:$0xff] %v5218_v25  ;;  %v5220_v58 = vadd.f32 %v3461_v34, %v3460_v31 }
 0x28b   : > { %v3463_v7 = vpop.f32.mrf.mxu0  ;;  %v5222_v8 = vpop.f32.mrf.mxu1 }
 0x28c   : > { %5641 = vst [vmem:[#allocation49_spill] sm:$0xff] %v5220_v58 }
 0x28d   : > { %v3464_v30 = vpop.f32.mrf.mxu0  ;;  %v5226_v42 = vpop.f32.mrf.mxu1 }
 0x28e   : > { %v5224_v1 = vadd.f32 %v3464_v30, %v3463_v7 }
 0x28f   : > { %v3466_v60 = vpop.f32.mrf.mxu0  ;;  %v5230_v50 = vpop.f32.mrf.mxu1 }
 0x290   : > { %5642 = vst [vmem:[#allocation54_spill] sm:$0xff] %v5224_v1 }
 0x291   : > { %v3467_v55 = vpop.f32.mrf.mxu0  ;;  %v5234_v34 = vpop.f32.mrf.mxu1 }
 0x292   : > { %v5228_v26 = vadd.f32 %v3467_v55, %v3466_v60  ;;  %5645 = vst [vmem:[#allocation59_spill] sm:$0xff] %v5234_v34 }
 0x293   : > { %v3469_v38 = vpop.f32.mrf.mxu0  ;;  %v5238_v30 = vpop.f32.mrf.mxu1 }
 0x294   : > { %5643 = vst [vmem:[#allocation55_spill] sm:$0xff] %v5228_v26  ;;  %5647 = vst [vmem:[#allocation52_spill] sm:$0xff] %v5238_v30 }
 0x295   : > { %v3470_v33 = vpop.f32.mrf.mxu0  ;;  %v5242_v60 = vpop.f32.mrf.mxu1 }
 0x296   : > { %v5232_v28 = vadd.f32 %v3470_v33, %v3469_v38  ;;  %5649 = vst [vmem:[#allocation57_spill] sm:$0xff] %v5242_v60 }
 0x297   : > { %v3472_v31 = vpop.f32.mrf.mxu0  ;;  %v5246_v38 = vpop.f32.mrf.mxu1 }
 0x298   : > { %5644 = vst [vmem:[#allocation58_spill] sm:$0xff] %v5232_v28  ;;  %5651 = vst [vmem:[#allocation60_spill] sm:$0xff] %v5246_v38 }
 0x299   : > { %v3473_v58 = vpop.f32.mrf.mxu0 }
 0x29a   : > { %v5236_v2 = vadd.f32 %v3473_v58, %v3472_v31 }
 0x29b   : > { %v3475_v7 = vpop.f32.mrf.mxu0 }
 0x29c   : > { %5646 = vst [vmem:[#allocation53_spill] sm:$0xff] %v5236_v2  ;;  %v5248_v2 = vpop.f32.mrf.mxu1 }
 0x29d   : > { %v3476_v1 = vpop.f32.mrf.mxu0  ;;  %5652 = vst [vmem:[#allocation22_spill] sm:$0xff] %v5248_v2 }
 0x29e   : > { %v5240_v25 = vadd.f32 %v3476_v1, %v3475_v7  ;;  %v5250_v60 = vpop.f32.mrf.mxu1 }
 0x29f   : > { %v3478_v55 = vpop.f32.mrf.mxu0  ;;  %5653 = vst [vmem:[#allocation23_spill] sm:$0xff] %v5250_v60 }
 0x2a0   : > { %5648 = vst [vmem:[#allocation56_spill] sm:$0xff] %v5240_v25  ;;  %v5252_v38 = vpop.f32.mrf.mxu1 }
 0x2a1   : > { %v3479_v26 = vpop.f32.mrf.mxu0  ;;  %5654 = vst [vmem:[#allocation40_spill] sm:$0xff] %v5252_v38 }
 0x2a2   : > { %v5244_v40 = vadd.f32 %v3479_v26, %v3478_v55 }
 0x2a3   : > { %v3635_v33 = vpop.f32.mrf.mxu0 }
 0x2a4   : > { %5650 = vst [vmem:[#allocation61_spill] sm:$0xff] %v5244_v40  ;;  %v3095_v28 = vmul.f32 -1.442695, %v3635_v33 }
 0x2a5   : > { %v2354_v10 = vpop.f32.mrf.mxu0 }
 0x2a6   : > { %3886 = vpow2.f32 %v3095_v28  ;;  %v3093_v58 = vmul.f32 -1.442695, %v2354_v10 }
 0x2a7   : > { %v3636_v31 = vpop.f32.mrf.mxu0 }
 0x2a8   : > { %3888 = vpow2.f32 %v3093_v58  ;;  %v3096_v30 = vmul.f32 -1.442695, %v3636_v31 }
 0x2a9   : > { %v2357_v1 = vpop.f32.mrf.mxu0 }
 0x2aa   : > { %3890 = vpow2.f32 %v3096_v30  ;;  %v3094_v7 = vmul.f32 -1.442695, %v2357_v1  ;;  %v5254_v30 = vpop.f32.mrf.mxu1 }
 0x2ab   : > { %v3639_v25 = vpop.f32.mrf.mxu0  ;;  %5655 = vst [vmem:[#allocation38_spill] sm:$0xff] %v5254_v30 }
 0x2ac   : > { %3892 = vpow2.f32 %v3094_v7  ;;  %v3099_v26 = vmul.f32 -1.442695, %v3639_v25 }
 0x2ad   : > { %v2370_v55 = vpop.f32.mrf.mxu0 }
 0x2ae   : > { %3894 = vpow2.f32 %v3099_v26  ;;  %v3097_v40 = vmul.f32 -1.442695, %v2370_v55 }
 0x2af   : > { %v3640_v33 = vpop.f32.mrf.mxu0 }
 0x2b0   : > { %3896 = vpow2.f32 %v3097_v40  ;;  %v3100_v28 = vmul.f32 -1.442695, %v3640_v33  ;;  %v5256_v40 = vpop.f32.mrf.mxu1 }
 0x2b1   : > { %v2373_v10 = vpop.f32.mrf.mxu0  ;;  %5656 = vst [vmem:[#allocation20_spill] sm:$0xff] %v5256_v40 }
 0x2b2   : > { %3898 = vpow2.f32 %v3100_v28  ;;  %v3098_v58 = vmul.f32 -1.442695, %v2373_v10 }
 0x2b3   : > { %v3887_v31 = vpop.eup %3886  ;;  %v3643_v2 = vpop.f32.mrf.mxu0 }
 0x2b4   : > { %v2579_v1 = vadd.f32 1.0, %v3887_v31  ;;  %3900 = vpow2.f32 %v3098_v58  ;;  %v3103_v60 = vmul.f32 -1.442695, %v3643_v2 }
 0x2b5   : > { %v3889_v7 = vpop.eup %3888  ;;  %v2386_v25 = vpop.f32.mrf.mxu0 }
 0x2b6   : > { %3902 = vrcp.f32 %v2579_v1  ;;  %v2577_v26 = vadd.f32 1.0, %v3889_v7  ;;  %v3101_v55 = vmul.f32 -1.442695, %v2386_v25  ;;  %v5258_v1 = vpop.f32.mrf.mxu1 }
 0x2b7   : > { %v3891_v39 = vpop.eup %3890  ;;  %3904 = vpow2.f32 %v3103_v60  ;;  %v3644_v38 = vpop.f32.mrf.mxu0 }
 0x2b8   : > { %3906 = vrcp.f32 %v2577_v26  ;;  %v2580_v33 = vadd.f32 1.0, %v3891_v39  ;;  %v3104_v28 = vmul.f32 -1.442695, %v3644_v38 }
 0x2b9   : > { %v3893_v10 = vpop.eup %3892  ;;  %3908 = vpow2.f32 %v3101_v55  ;;  %v2389_v34 = vpop.f32.mrf.mxu0 }
 0x2ba   : > { %3910 = vrcp.f32 %v2580_v33  ;;  %v2578_v31 = vadd.f32 1.0, %v3893_v10  ;;  %v3102_v58 = vmul.f32 -1.442695, %v2389_v34  ;;  %v5260_v33 = vpop.f32.mrf.mxu1 }
 0x2bb   : > { %v3895_v2 = vpop.eup %3894  ;;  %3912 = vpow2.f32 %v3104_v28  ;;  %v3647_v30 = vpop.f32.mrf.mxu0  ;;  %5657 = vst [vmem:[#allocation21_spill] sm:$0xff] %v5260_v33 }
 0x2bc   : > { %3914 = vrcp.f32 %v2578_v31  ;;  %v2583_v7 = vadd.f32 1.0, %v3895_v2  ;;  %v3107_v60 = vmul.f32 -1.442695, %v3647_v30  ;;  %v3505_v31 = vadd.f32 %v5128_v45, %v5124_v46  ;;  %v5266_v33 = vpop.f32.mrf.mxu1 }
 0x2bd   : > { %v3897_v25 = vpop.eup %3896  ;;  %3916 = vpow2.f32 %v3102_v58  ;;  %v2402_v40 = vpop.f32.mrf.mxu0  ;;  %v3508_v58 = vadd.f32 %v5134_v57, %v5132_v22  ;;  %5658 = vst [vmem:[#allocation26_spill] sm:$0xff] %v5266_v33 }
 0x2be   : > { %3918 = vrcp.f32 %v2583_v7  ;;  %v2581_v39 = vadd.f32 1.0, %v3897_v25  ;;  %v3105_v38 = vmul.f32 -1.442695, %v2402_v40  ;;  %v5274_v33 = vpop.f32.mrf.mxu1 }
 0x2bf   : > { %v3899_v26 = vpop.eup %3898  ;;  %3920 = vpow2.f32 %v3107_v60  ;;  %v3648_v55 = vpop.f32.mrf.mxu0  ;;  %v2125_v22 = vadd.f32 %v3508_v58, %v5108_v32 }
 0x2c0   : > { %3922 = vrcp.f32 %v2581_v39  ;;  %v2584_v34 = vadd.f32 1.0, %v3899_v26  ;;  %v3108_v28 = vmul.f32 -1.442695, %v3648_v55 }
 0x2c1   : > { %v3901_v10 = vpop.eup %3900  ;;  %3924 = vpow2.f32 %v3105_v38  ;;  %v2405_v30 = vpop.f32.mrf.mxu0  ;;  %v2122_v38 = vadd.f32 %v3505_v31, %v5106_v6  ;;  %v3520_v31 = vadd.f32 %v5158_v47, %v5156_v27 }
 0x2c2   : > { %3926 = vrcp.f32 %v2584_v34  ;;  %v2582_v2 = vadd.f32 1.0, %v3901_v10  ;;  %v3106_v40 = vmul.f32 -1.442695, %v2405_v30  ;;  %v3517_v10 = vadd.f32 %v5152_v0, %v5150_v23 }
 0x2c3   : > { %v3903_v7 = vpop.eup %3902  ;;  %3928 = vpow2.f32 %v3108_v28  ;;  %v3651_v60 = vpop.f32.mrf.mxu0  ;;  %v3511_v28 = vadd.f32 %v5140_v20, %v5138_v13 }
 0x2c4   : > { %v3905_v25 = vpop.eup %3904  ;;  %3930 = vrcp.f32 %v2582_v2  ;;  %v3111_v39 = vmul.f32 -1.442695, %v3651_v60 }
 0x2c5   : > { %v3907_v26 = vpop.eup %3906  ;;  %v2587_v55 = vadd.f32 1.0, %v3905_v25  ;;  %3932 = vpow2.f32 %v3106_v40  ;;  %v2418_v46 = vpop.f32.mrf.mxu0  ;;  %v2675_v40 = vmul.f32 %v3903_v7, %v2122_v38 }
 0x2c6   : > { %v3909_v45 = vpop.eup %3908  ;;  %3934 = vpow2.f32 %v3111_v39  ;;  %v3109_v57 = vmul.f32 -1.442695, %v2418_v46  ;;  %v2673_v13 = vmul.f32 %v3907_v26, %v5120_v15  ;;  %v3514_v46 = vadd.f32 %v5146_v16, %v5144_v5  ;;  %v5283_v26 = vpop.f32.mrf.mxu1 }
 0x2c7   : > { %v3911_v34 = vpop.eup %3910  ;;  %3936 = vrcp.f32 %v2587_v55  ;;  %v2585_v30 = vadd.f32 1.0, %v3909_v45  ;;  %v3652_v2 = vpop.f32.mrf.mxu0  ;;  %v2138_v5 = vadd.f32 %v3517_v10, %v5114_v61  ;;  %v2141_v16 = vadd.f32 %v3520_v31, %v5116_v9 }
 0x2c8   : > { %v3913_v60 = vpop.eup %3912  ;;  %v2676_v25 = vmul.f32 %v3911_v34, %v2125_v22  ;;  %3938 = vpow2.f32 %v3109_v57  ;;  %v3112_v6 = vmul.f32 -1.442695, %v3652_v2  ;;  %v3526_v10 = vadd.f32 %v5170_v35, %v5168_v4 }
 0x2c9   : > { %v3915_v32 = vpop.eup %3914  ;;  %3940 = vrcp.f32 %v2585_v30  ;;  %v2588_v20 = vadd.f32 1.0, %v3913_v60  ;;  %v2421_v23 = vpop.f32.mrf.mxu0 }
 0x2ca   : > { %v3917_v0 = vpop.eup %3916  ;;  %v3267_v58 = vpack.c.bf16 %v2676_v25, %v2675_v40  ;;  %v2674_v39 = vmul.f32 %v3915_v32, %v5126_v12  ;;  %3942 = vpow2.f32 %v3112_v6  ;;  %v3110_v7 = vmul.f32 -1.442695, %v2421_v23 }
 0x2cb   : > { %v3919_v55 = vpop.eup %3918  ;;  %3944 = vrcp.f32 %v2588_v20  ;;  %v2586_v45 = vadd.f32 1.0, %v3917_v0  ;;  %v3655_v27 = vpop.f32.mrf.mxu0  ;;  %v2130_v12 = vadd.f32 %v3511_v28, %v5110_v24  ;;  %v2133_v40 = vadd.f32 %v3514_v46, %v5112_v56 }
 0x2cc   : > { %v3921_v47 = vpop.eup %3920  ;;  %3354 = vst [vmem:[%s4454_s4 + $0x8] sm:$0xff] %v3267_v58   ;;  %v3262_v15 = vpack.c.bf16 %v2674_v39, %v2673_v13  ;;  %3946 = vpow2.f32 %v3110_v7  ;;  %v3115_v38 = vmul.f32 -1.442695, %v3655_v27  ;;  %v3523_v25 = vadd.f32 %v5164_v29, %v5162_v17  ;;  %v5292_v13 = vpop.f32.mrf.mxu1 }
 0x2cd   : > { %v3923_v22 = vpop.eup %3922  ;;  %3948 = vrcp.f32 %v2586_v45  ;;  %v2591_v57 = vadd.f32 1.0, %v3921_v47  ;;  %v2434_v34 = vpop.f32.mrf.mxu0  ;;  %v2679_v32 = vmul.f32 %v3919_v55, %v2138_v5  ;;  %v3529_v7 = vadd.f32 %v5176_v14, %v5174_v37 }
 0x2ce   : > { %v3925_v30 = vpop.eup %3924  ;;  %3263 = vst [vmem:[%s4454_s4] sm:$0xff] %v3262_v15   ;;  %3950 = vpow2.f32 %v3115_v38  ;;  %v3113_v2 = vmul.f32 -1.442695, %v2434_v34  ;;  %v2677_v31 = vmul.f32 %v3923_v22, %v2130_v12  ;;  %v3532_v55 = vadd.f32 %v5182_v49, %v5180_v21  ;;  %v5300_v45 = vpop.f32.mrf.mxu1 }
 0x2cf   : > { %v3927_v60 = vpop.eup %3926  ;;  %3952 = vrcp.f32 %v2591_v57  ;;  %v2589_v6 = vadd.f32 1.0, %v3925_v30  ;;  %v3656_v24 = vpop.f32.mrf.mxu0  ;;  %v2146_v37 = vadd.f32 %v3523_v25, %v5118_v62  ;;  %v2149_v57 = vadd.f32 %v3526_v10, %v5122_v36 }
 0x2d0   : > { %v3929_v28 = vpop.eup %3928  ;;  %v2680_v20 = vmul.f32 %v3927_v60, %v2141_v16  ;;  %3954 = vpow2.f32 %v3113_v2  ;;  %v3116_v61 = vmul.f32 -1.442695, %v3656_v24  ;;  %v2154_v34 = vadd.f32 %v3529_v7, %v5130_v11  ;;  %v5310_v60 = vpop.f32.mrf.mxu1 }
 0x2d1   : > { %v3931_v9 = vpop.eup %3930  ;;  %3956 = vrcp.f32 %v2589_v6  ;;  %v2592_v56 = vadd.f32 1.0, %v3929_v28  ;;  %v2437_v23 = vpop.f32.mrf.mxu0  ;;  %v2157_v30 = vadd.f32 %v3532_v55, %v5136_v54  ;;  %v3535_v2 = vadd.f32 %v5188_v52, %v5186_v59 }
 0x2d2   : > { %v3933_v17 = vpop.eup %3932  ;;  %v3277_v29 = vpack.c.bf16 %v2680_v20, %v2679_v32  ;;  %v2678_v0 = vmul.f32 %v3931_v9, %v2133_v40  ;;  %3958 = vpow2.f32 %v3116_v61  ;;  %v3114_v58 = vmul.f32 -1.442695, %v2437_v23 }
 0x2d3   : > { %v3935_v39 = vpop.eup %3934  ;;  %3960 = vrcp.f32 %v2592_v56  ;;  %v2590_v4 = vadd.f32 1.0, %v3933_v17  ;;  %v3659_v35 = vpop.f32.mrf.mxu0  ;;  %v3541_v6 = vadd.f32 %v5200_v19, %v5198_v44  ;;  %v3544_v28 = vadd.f32 %v5206_v43, %v5204_v3 }
 0x2d4   : > { %v3937_v46 = vpop.eup %3936  ;;  %3356 = vst [vmem:[%s4454_s4 + $0x18] sm:$0xff] %v3277_v29   ;;  %v3272_v27 = vpack.c.bf16 %v2678_v0, %v2677_v31  ;;  %v2595_v47 = vadd.f32 1.0, %v3935_v39  ;;  %3962 = vpow2.f32 %v3114_v58  ;;  %v3119_v15 = vmul.f32 -1.442695, %v3659_v35  ;;  %v5318_v19 = vpop.f32.mrf.mxu1 }
 0x2d5   : > { %v3939_v38 = vpop.eup %3938  ;;  %3964 = vrcp.f32 %v2590_v4  ;;  %v2450_v22 = vpop.f32.mrf.mxu0  ;;  %v2683_v36 = vmul.f32 %v3937_v46, %v2154_v34  ;;  %v3538_v44 = vadd.f32 %v5194_v63, %v5192_v51  ;;  %v2162_v7 = vadd.f32 %v3535_v2, %v5142_v48  ;;  %v5663_v2 = vld [vmem:[#allocation48_spill] sm:$0xff] }
 0x2d6   : > { %v3941_v12 = vpop.eup %3940  ;;  %3355 = vst [vmem:[%s4454_s4 + $0x10] sm:$0xff] %v3272_v27   ;;  %3966 = vrcp.f32 %v2595_v47  ;;  %v2593_v14 = vadd.f32 1.0, %v3939_v38  ;;  %v3117_v21 = vmul.f32 -1.442695, %v2450_v22  ;;  %v2170_v51 = vadd.f32 %v3541_v6, %v5154_v53  ;;  %v5326_v46 = vpop.f32.mrf.mxu1 }
 0x2d7   : > { %v3943_v49 = vpop.eup %3942  ;;  %3968 = vpow2.f32 %v3119_v15  ;;  %v3660_v5 = vpop.f32.mrf.mxu0  ;;  %v2681_v20 = vmul.f32 %v3941_v12, %v2146_v37  ;;  %v2173_v63 = vadd.f32 %v3544_v28, %v5160_v41  ;;  %v2165_v35 = vadd.f32 %v3538_v44, %v5148_v18  ;;  %v5659_v12 = vld [vmem:[#allocation59_spill] sm:$0xff] }
 0x2d8   : > { %v3945_v16 = vpop.eup %3944  ;;  %3970 = vrcp.f32 %v2593_v14  ;;  %v2596_v62 = vadd.f32 1.0, %v3943_v49  ;;  %v3120_v40 = vmul.f32 -1.442695, %v3660_v5  ;;  %v3553_v38 = vadd.f32 %v5226_v42, %v5222_v8  ;;  %v5660_v8 = vld [vmem:[#allocation50_spill] sm:$0xff]  ;;  %v5661_v42 = vld [vmem:[#allocation51_spill] sm:$0xff] }
 0x2d9   : > { %v3947_v25 = vpop.eup %3946  ;;  %v2684_v24 = vmul.f32 %v3945_v16, %v2157_v30  ;;  %3972 = vpow2.f32 %v3117_v21  ;;  %v2453_v11 = vpop.f32.mrf.mxu0  ;;  %v3556_v37 = vadd.f32 %v5659_v12, %v5230_v50  ;;  %v3547_v5 = vadd.f32 %v5661_v42, %v5660_v8  ;;  %v5662_v16 = vld [vmem:[#allocation45_spill] sm:$0xff] }
 0x2da   : > { %v3949_v54 = vpop.eup %3948  ;;  %3974 = vrcp.f32 %v2596_v62  ;;  %v2594_v59 = vadd.f32 1.0, %v3947_v25  ;;  %v3118_v52 = vmul.f32 -1.442695, %v2453_v11  ;;  %v3550_v62 = vadd.f32 %v5663_v2, %v5662_v16  ;;  %v5679_v2 = vld [vmem:[#allocation41_spill] sm:$0xff] }
 0x2db   : > { %v3951_v32 = vpop.eup %3950  ;;  %v3287_v61 = vpack.c.bf16 %v2684_v24, %v2683_v36  ;;  %v2682_v9 = vmul.f32 %v3949_v54, %v2149_v57  ;;  %3976 = vpow2.f32 %v3120_v40  ;;  %v3663_v10 = vpop.f32.mrf.mxu0  ;;  %v5664_v24 = vld [vmem:[#allocation37_spill] sm:$0xff]  ;;  %v5665_v54 = vld [vmem:[#allocation36_spill] sm:$0xff] }
 0x2dc   : > { %v3953_v31 = vpop.eup %3952  ;;  %3978 = vrcp.f32 %v2594_v59  ;;  %v2599_v56 = vadd.f32 1.0, %v3951_v32  ;;  %v3123_v3 = vmul.f32 -1.442695, %v3663_v10  ;;  %v5336_v40 = vpop.f32.mrf.mxu1  ;;  %v2186_v11 = vadd.f32 %v3553_v38, %v5664_v24 }
 0x2dd   : > { %v3955_v43 = vpop.eup %3954  ;;  %3358 = vst [vmem:[%s4454_s4 + $0x28] sm:$0xff] %v3287_v61   ;;  %v3282_v23 = vpack.c.bf16 %v2682_v9, %v2681_v20  ;;  %3980 = vpow2.f32 %v3118_v52  ;;  %v2466_v17 = vpop.f32.mrf.mxu0  ;;  %v2687_v48 = vmul.f32 %v3953_v31, %v2170_v51  ;;  %v2189_v28 = vadd.f32 %v3556_v37, %v5665_v54  ;;  %v5666_v20 = vld [vmem:[#allocation42_spill] sm:$0xff]  ;;  %v5667_v9 = vld [vmem:[#allocation43_spill] sm:$0xff] }
 0x2de   : > { %v3957_v29 = vpop.eup %3956  ;;  %3982 = vrcp.f32 %v2599_v56  ;;  %v2597_v0 = vadd.f32 1.0, %v3955_v43  ;;  %v3121_v58 = vmul.f32 -1.442695, %v2466_v17  ;;  %v2178_v61 = vadd.f32 %v3547_v5, %v5666_v20  ;;  %v5344_v31 = vpop.f32.mrf.mxu1  ;;  %v5668_v43 = vld [vmem:[#allocation23_spill] sm:$0xff] }
 0x2df   : > { %v3959_v39 = vpop.eup %3958  ;;  %3357 = vst [vmem:[%s4454_s4 + $0x20] sm:$0xff] %v3282_v23   ;;  %3984 = vpow2.f32 %v3123_v3  ;;  %v3664_v55 = vpop.f32.mrf.mxu0  ;;  %v2685_v49 = vmul.f32 %v3957_v29, %v2162_v7  ;;  %v2181_v10 = vadd.f32 %v3550_v62, %v5667_v9  ;;  %v5669_v23 = vld [vmem:[#allocation40_spill] sm:$0xff]  ;;  %v5670_v29 = vld [vmem:[#allocation38_spill] sm:$0xff]  ;;  %v5678_v5 = vld [vmem:[#allocation39_spill] sm:$0xff] }
 0x2e0   : > { %v3961_v4 = vpop.eup %3960  ;;  %3986 = vrcp.f32 %v2597_v0  ;;  %v2600_v27 = vadd.f32 1.0, %v3959_v39  ;;  %v3124_v47 = vmul.f32 -1.442695, %v3664_v55  ;;  %v3565_v17 = vadd.f32 %v5669_v23, %v5668_v43  ;;  %v5671_v0 = vld [vmem:[#allocation20_spill] sm:$0xff] }
 0x2e1   : > { %v3963_v15 = vpop.eup %3962  ;;  %v2688_v22 = vmul.f32 %v3961_v4, %v2173_v63  ;;  %3988 = vpow2.f32 %v3121_v58  ;;  %v2469_v53 = vpop.f32.mrf.mxu0  ;;  %v3568_v58 = vadd.f32 %v5671_v0, %v5670_v29  ;;  %v5684_v0 = vld [vmem:[#allocation44_spill] sm:$0xff] }
 0x2e2   : > { %v3965_v41 = vpop.eup %3964  ;;  %3990 = vrcp.f32 %v2600_v27  ;;  %v2598_v18 = vadd.f32 1.0, %v3963_v15  ;;  %v3122_v14 = vmul.f32 -1.442695, %v2469_v53  ;;  %v5673_v15 = vld [vmem:[#allocation57_spill] sm:$0xff] }
 0x2e3   : > { %v3967_v21 = vpop.eup %3966  ;;  %v3297_v57 = vpack.c.bf16 %v2688_v22, %v2687_v48  ;;  %v2686_v34 = vmul.f32 %v3965_v41, %v2165_v35  ;;  %3992 = vpow2.f32 %v3124_v47  ;;  %v5672_v47 = vld [vmem:[#allocation52_spill] sm:$0xff]  ;;  %v5675_v22 = vld [vmem:[#allocation22_spill] sm:$0xff]  ;;  %v3587_v41 = vpop.f32.mrf.mxu1 }
 0x2e4   : > { %v3969_v30 = vpop.eup %3968  ;;  %3994 = vrcp.f32 %v2598_v18  ;;  %v2691_v44 = vmul.f32 %v3967_v21, %v2186_v11  ;;  %v3559_v38 = vadd.f32 %v5673_v15, %v5672_v47  ;;  %v5674_v48 = vld [vmem:[#allocation60_spill] sm:$0xff]  ;;  %v5676_v21 = vld [vmem:[#allocation46_spill] sm:$0xff]  ;;  %v3583_v47 = vadd.f32 %v5326_v46, %v5318_v19  ;;  %v5689_v46 = vld [vmem:[#allocation53_spill] sm:$0xff] }
 0x2e5   : > { %v3971_v50 = vpop.eup %3970  ;;  %3360 = vst [vmem:[%s4454_s4 + $0x38] sm:$0xff] %v3297_v57   ;;  %v3292_v25 = vpack.c.bf16 %v2686_v34, %v2685_v49  ;;  %v2603_v6 = vadd.f32 1.0, %v3969_v30  ;;  %3996 = vpow2.f32 %v3122_v14  ;;  %v3562_v53 = vadd.f32 %v5675_v22, %v5674_v48  ;;  %v5677_v57 = vld [vmem:[#allocation47_spill] sm:$0xff] }
 0x2e6   : > { %v3973_v36 = vpop.eup %3972  ;;  %v2689_v51 = vmul.f32 %v3971_v50, %v2178_v61  ;;  %v2202_v49 = vadd.f32 %v3565_v17, %v5676_v21  ;;  %v2205_v34 = vadd.f32 %v3568_v58, %v5677_v57  ;;  %v2194_v16 = vadd.f32 %v3559_v38, %v5678_v5  ;;  %v3588_v50 = vpop.f32.mrf.mxu1 }
 0x2e7   : > { %v3975_v59 = vpop.eup %3974  ;;  %3359 = vst [vmem:[%s4454_s4 + $0x30] sm:$0xff] %v3292_v25   ;;  %v2601_v52 = vadd.f32 1.0, %v3973_v36  ;;  %3998 = vrcp.f32 %v2603_v6  ;;  %v2197_v62 = vadd.f32 %v3562_v53, %v5679_v2  ;;  %v3586_v15 = vadd.f32 %v5344_v31, %v5336_v40  ;;  %v5686_v53 = vld [vmem:[#allocation56_spill] sm:$0xff] }
 0x2e8   : > { %v3977_v32 = vpop.eup %3976  ;;  %v2692_v56 = vmul.f32 %v3975_v59, %v2189_v28  ;;  %v3590_v61 = vpop.f32.mrf.mxu1 }
 0x2e9   : > { %v3979_v3 = vpop.eup %3978  ;;  %v2604_v39 = vadd.f32 1.0, %v3977_v32  ;;  %4000 = vrcp.f32 %v2601_v52  ;;  %v3577_v52 = vadd.f32 %v5292_v13, %v5283_v26  ;;  %v3580_v32 = vadd.f32 %v5310_v60, %v5300_v45  ;;  %v5682_v26 = vld [vmem:[#allocation54_spill] sm:$0xff]  ;;  %v5683_v45 = vld [vmem:[#allocation55_spill] sm:$0xff] }
 0x2ea   : > { %v3981_v7 = vpop.eup %3980  ;;  %v3307_v63 = vpack.c.bf16 %v2692_v56, %v2691_v44  ;;  %v2690_v55 = vmul.f32 %v3979_v3, %v2181_v10  ;;  %v5680_v10 = vld [vmem:[#allocation21_spill] sm:$0xff]  ;;  %v5681_v56 = vld [vmem:[#allocation26_spill] sm:$0xff]  ;;  %v3591_v29 = vpop.f32.mrf.mxu1  ;;  %v2229_v21 = vadd.f32 %v3586_v15, %v5689_v46 }
 0x2eb   : > { %v3983_v4 = vpop.eup %3982  ;;  %4002 = vrcp.f32 %v2604_v39  ;;  %v2602_v35 = vadd.f32 1.0, %v3981_v7  ;;  %v3571_v44 = vadd.f32 %v5680_v10, %v5258_v1  ;;  %v3574_v3 = vadd.f32 %v5274_v33, %v5681_v56  ;;  %v5685_v39 = vld [vmem:[#allocation49_spill] sm:$0xff] }
 0x2ec   : > { %v3985_v27 = vpop.eup %3984  ;;  %3362 = vst [vmem:[%s4454_s4 + $0x48] sm:$0xff] %v3307_v63   ;;  %v3302_v12 = vpack.c.bf16 %v2690_v55, %v2689_v51  ;;  %v2695_v25 = vmul.f32 %v3983_v4, %v2202_v49  ;;  %v2218_v13 = vadd.f32 %v3577_v52, %v5682_v26  ;;  %v2221_v60 = vadd.f32 %v3580_v32, %v5683_v45 }
 0x2ed   : > { %v3987_v37 = vpop.eup %3986  ;;  %4004 = vrcp.f32 %v2602_v35  ;;  %v2607_v18 = vadd.f32 1.0, %v3985_v27  ;;  %v2210_v58 = vadd.f32 %v3571_v44, %v5684_v0  ;;  %v2213_v1 = vadd.f32 %v3574_v3, %v5685_v39 }
 0x2ee   : > { %v3989_v14 = vpop.eup %3988  ;;  %3361 = vst [vmem:[%s4454_s4 + $0x40] sm:$0xff] %v3302_v12   ;;  %v2693_v54 = vmul.f32 %v3987_v37, %v2194_v16  ;;  %v3589_v63 = vadd.f32 %v3588_v50, %v3587_v41  ;;  %v3592_v55 = vadd.f32 %v3591_v29, %v3590_v61  ;;  %v5687_v12 = vld [vmem:[#allocation61_spill] sm:$0xff] }
 0x2ef   : > { %v3991_v30 = vpop.eup %3990  ;;  %v2605_v8 = vadd.f32 1.0, %v3989_v14  ;;  %4006 = vrcp.f32 %v2607_v18  ;;  %v5688_v14 = vld [vmem:[#allocation58_spill] sm:$0xff] }
 0x2f0   : > { %v3993_v42 = vpop.eup %3992  ;;  %v2696_v6 = vmul.f32 %v3991_v30, %v2205_v34  ;;  %v2234_v41 = vadd.f32 %v3589_v63, %v5686_v53  ;;  %v2237_v37 = vadd.f32 %v3592_v55, %v5687_v12  ;;  %v2226_v19 = vadd.f32 %v3583_v47, %v5688_v14 }
 0x2f1   : > { %v3995_v36 = vpop.eup %3994  ;;  %v2608_v24 = vadd.f32 1.0, %v3993_v42  ;;  %4008 = vrcp.f32 %v2605_v8 }
 0x2f2   : > { %v3997_v11 = vpop.eup %3996  ;;  %v3317_v28 = vpack.c.bf16 %v2696_v6, %v2695_v25  ;;  %v2694_v59 = vmul.f32 %v3995_v36, %v2197_v62 }
 0x2f3   : > { %4010 = vrcp.f32 %v2608_v24  ;;  %v2606_v20 = vadd.f32 1.0, %v3997_v11 }
 0x2f4   : > { %3364 = vst [vmem:[%s4454_s4 + $0x58] sm:$0xff] %v3317_v28   ;;  %v3312_v9 = vpack.c.bf16 %v2694_v59, %v2693_v54  ;;  %v3999_v43 = vpop.eup %3998 }
 0x2f5   : > { %4012 = vrcp.f32 %v2606_v20  ;;  %v2699_v7 = vmul.f32 %v3999_v43, %v2218_v13 }
 0x2f6   : > { %3363 = vst [vmem:[%s4454_s4 + $0x50] sm:$0xff] %v3312_v9   ;;  %v4001_v23 = vpop.eup %4000 }
 0x2f7   : > { %v2697_v4 = vmul.f32 %v4001_v23, %v2210_v58 }
 0x2f8   : > { %v4003_v17 = vpop.eup %4002 }
 0x2f9   : > { %v2700_v51 = vmul.f32 %v4003_v17, %v2221_v60 }
 0x2fa   : > { %v4005_v33 = vpop.eup %4004 }
 0x2fb   : > { %v3327_v35 = vpack.c.bf16 %v2700_v51, %v2699_v7  ;;  %v2698_v27 = vmul.f32 %v4005_v33, %v2213_v1 }
 0x2fc   : > { %v4007_v48 = vpop.eup %4006 }
 0x2fd   : > { %3366 = vst [vmem:[%s4454_s4 + $0x68] sm:$0xff] %v3327_v35   ;;  %v3322_v38 = vpack.c.bf16 %v2698_v27, %v2697_v4  ;;  %v2703_v49 = vmul.f32 %v4007_v48, %v2234_v41 }
 0x2fe   : > { %v4009_v22 = vpop.eup %4008 }
 0x2ff   : > { %3365 = vst [vmem:[%s4454_s4 + $0x60] sm:$0xff] %v3322_v38   ;;  %v2701_v57 = vmul.f32 %v4009_v22, %v2226_v19 }
 0x300   : > { %v4011_v18 = vpop.eup %4010 }
 0x301   : > { %v2704_v40 = vmul.f32 %v4011_v18, %v2237_v37 }
 0x302   : > { %v4013_v31 = vpop.eup %4012 }
 0x303   : > { %v3337_v34 = vpack.c.bf16 %v2704_v40, %v2703_v49  ;;  %v2702_v30 = vmul.f32 %v4013_v31, %v2229_v21 }
 0x305   : > { %3368 = vst [vmem:[%s4454_s4 + $0x78] sm:$0xff] %v3337_v34   ;;  %v3332_v8 = vpack.c.bf16 %v2702_v30, %v2701_v57 }
 0x307   : > { %3367 = vst [vmem:[%s4454_s4 + $0x70] sm:$0xff] %v3332_v8  }
 0x308   : > { %4134 = shalt.err (!%p4131_p11)
}
 0x309   : > { %s4135_s4 = scalar_lea.hbm %s5390_s6, 2048  ;;  %s4139_s11 = scalar_lea.hbm %s5690_s13, 8192 }
 0x30a   : > { %p4136_p13 = scmp.ne.s32.totalorder %s5390_s6, %s4135_s4  ;;  %p4140_p10 = scmp.lt.s32.totalorder %s5390_s6, %s5690_s13 }
 0x30b   : > { %p4141_p1 = scmp.lt.s32.totalorder %s4139_s11, %s4135_s4 }
 0x30c   : > { %p4137_p3 = pnand %p4136_p13, %p4396_p6 }
 0x30d   : > { %p4142_p8 = por %p4141_p1, %p4140_p10 }
 0x30e   : > { %p4138_p0 = pneg %p4137_p3 }
 0x310   : > { %p4143_p4 = pnand %p4142_p8, %p4138_p0 }
 0x312   : > { %4146 = shalt.err (!%p4143_p4)
}
 0x313   : > { %s4238_s17 = smov 64   ;;  %s4239_s12 = smov 4  }
 0x314   : > { %3695 = dma.vmem_to_hbm [thread:$0]  (%p4396_p6), %s5392_s25, 2048, %s5390_s6, %s2866_s26, %s4238_s17, %s4238_s17, %s4239_s12  }
 0x315 PF: > { %s5691_s3 = sld [smem:[#allocation16_spill]]  ;;  %p3722_p2 = scmp.ge.s32.totalorder %s4225_s28, 2 }
 0x316   : > { %s5692_s24 = sld [smem:[#allocation18_spill]] }
 0x31b   : > { %s2896_s15 = sand.u32 1, %s5691_s3  }
 0x31c   : > { %p5693_p5 = scmp.ne.s32.totalorder %s5692_s24, 0  ;;  %s2897_s14 = scalar_lea.sflag [#allocation5], %s2896_s15 }
 0x31e   : > { %p3712_p7 = pnand %p3722_p2, %p5693_p5 }
 0x320   : > { %p3713_p9 = pneg %p3712_p7 }
 0x322   : > { %4192 = dma.done.wait (%p3713_p9), %s2897_s14, 2048  }
 0x323   : > { %4194 = vsyncadd (%p3713_p9), %s2897_s14, 4294965248  ;;  %s24_s28 = sadd.s32 1, %s4225_s28   ;;  %s5694_s24 = sld [smem:[#allocation17_spill]] }
 0x324   : > { %p21_p12 = scmp.ge.s32.totalorder %s24_s28, 6   ;;  %s5695_s26 = sld [smem:[#allocation19_spill]] }
 0x325   : > { %s5696_s21 = smov %s4201_s22  ;;  %s5697_s22 = smov %s4205_s23 }
 0x326   : > { %s5698_s23 = smov %s4413_s5  ;;  %s5699_s25 = smov %s4221_s27 }
 0x327   : > { %s5700_s27 = smov %s5706_s30  ;;  %23 = sbr.rel (!%p21_p12) target bundleno = 14 (0xe), region = 105 }
 0x32c   :  { %2902 = vsyncpa [#allocation4], 1 }
 0x32d   :  { %2904 = vsyncpa [#allocation4 + $0x1], 1 }
 0x32e   :  { %2905 = vsyncpa [#allocation7], 1 }
 0x32f   :  { %2906 = vsyncpa [#allocation10], 1 }
 0x330   :  { %2907 = vsyncpa [#allocation5], 1 }
 0x331   :  { %2909 = vsyncpa [#allocation5 + $0x1], 1 }

// kernel: tpu_custom_call.1
= control target key start
LH: loop header
LB: loop body
LE: loop exit
PB: predicated region body
PF: predicated region fallthrough
CT: control target
= control target key end

     0   :  { %s5447_s0 = inlined_call_operand.hbm [shape: bf16[2,512,128], index: 0, kind: input, shape index: {}]   ;;  %s5448_s1 = inlined_call_operand.vmem [shape: f32[1,128], index: 1, kind: input, shape index: {}]   ;;  %s5449_s2 = inlined_call_operand.vmem [shape: f32[1,128], index: 2, kind: input, shape index: {}]   ;;  %s5450_s3 = inlined_call_operand.hbm [shape: bf16[128,512], index: 3, kind: input, shape index: {}]   ;;  %s5451_s4 = inlined_call_operand.hbm [shape: bf16[512,128], index: 4, kind: input, shape index: {}]   ;;  %s5452_s5 = inlined_call_operand.hbm [shape: bf16[128,128], index: 5, kind: input, shape index: {}]   ;;  %s5453_s6 = inlined_call_operand.hbm [shape: bf16[2,512,128], index: 6, kind: output, shape index: {}]  }
   0x1   :  { %5510 = sst [smem:[#allocation62_spill]] %s5450_s3 }
   0x2   :  { %5511 = sst [smem:[#allocation63_spill]] %s5451_s4 }
   0x3   :  { %5512 = sst [smem:[#allocation64_spill]] %s5452_s5 }
   0x4   :  { %5513 = sst [smem:[#allocation65_spill]] %s5453_s6 }
   0x5   :  { %11 = vsyncpa [#allocation4], 0 }
   0x6   :  { %13 = vsyncpa [#allocation4 + $0x1], 0 }
   0x7   :  { %14 = vsyncpa [#allocation7], 0 }
   0x8   :  { %15 = vsyncpa [#allocation10], 0 }
   0x9   :  { %16 = vsyncpa [#allocation5], 0 }
   0xa   :  { %18 = vsyncpa [#allocation5 + $0x1], 0  ;;  %s4275_s21 = smov 0   ;;  %s4277_s22 = smov 0  }
   0xb   :  { %s4279_s23 = smov 0   ;;  %s4281_s24 = smov 0  }
   0xc   :  { %s4283_s25 = smov 0   ;;  %s4285_s26 = smov 0  }
   0xd   :  { %s4287_s27 = smov 0   ;;  %s4289_s28 = smov 0  }
   0xe LB: > { %5514 = sst [smem:[#allocation16_spill]] %s4197_s21  ;;  %s3000_s29 = sadd.s32 4294967295, %s4225_s28   ;;  %s4225_s28 = sphi %s4289_s28, %s24_s28   ;;  %s4221_s27 = sphi %s4287_s27, %s5700_s27   ;;  %s4217_s26 = sphi %s4285_s26, %s5695_s26   ;;  %s4213_s25 = sphi %s4283_s25, %s5699_s25   ;;  %s4209_s24 = sphi %s4281_s24, %s5694_s24   ;;  %s4205_s23 = sphi %s4279_s23, %s5698_s23   ;;  %s4201_s22 = sphi %s4277_s22, %s5697_s22   ;;  %s4197_s21 = sphi %s4275_s21, %s5696_s21  }
   0xf   : > { %5515 = sst [smem:[#allocation17_spill]] %s4217_s26  ;;  %s3001_s30 = sadd.s32 4294967294, %s4225_s28  }
  0x10   : > { %p58_p0 = scmp.ne.s32.totalorder %s4201_s22, %s4197_s21  ;;  %p4319_p1 = scmp.eq.s32.totalorder %s3000_s29, 0 }
  0x11   : > { %p4323_p2 = scmp.eq.s32.totalorder %s3000_s29, 3  ;;  %p195_p3 = scmp.eq.s32.totalorder %s3001_s30, 3 }
  0x12   : > { %s5516_s7 = scalar_select %p4319_p1, 1, 0 }
  0x13   : > { %p4329_p4 = por %p4319_p1, %p58_p0  ;;  %p3002_p5 = scmp.ge.s32.totalorder %s4225_s28, 1 }
  0x14   : > { %p4334_p6 = por %p195_p3, %p58_p0  ;;  %p202_p7 = scmp.lt.s32.totalorder %s4225_s28, 5 }
  0x15   : > { %s5518_s9 = scalar_select %p4329_p4, 1, 0 }
  0x16   : > { %s5519_s10 = scalar_select %p4334_p6, 1, 0 }
  0x17   : > { %p4339_p8 = pnand %p3002_p5, %p202_p7  ;;  %s4227_s12 = smov [#allocation6]  }
  0x18   : > { %5520 = sst [smem:[#allocation18_spill]] %s5519_s10  ;;  %s220_s13 = sshll.u32 %s4227_s12, 4  ;;  %s221_s13 = int_to_ptr.vmem [resolvable:$true] %s220_s13 }
  0x19   : > { %p3697_p9 = pneg %p4339_p8  ;;  %s4228_s15 = smov [#allocation8]  }
  0x1a   : > { %s233_s16 = sshll.u32 %s4228_s15, 4  ;;  %s4026_s17 = scalar_lea.vmem %s221_s13, 4096  ;;  %s234_s16 = int_to_ptr.vmem [resolvable:$true] %s233_s16 }
  0x1b   : > { %p4347_p10 = pnand %p3697_p9, %p4319_p1  ;;  %p4027_p12 = scmp.ne.s32.totalorder %s221_s13, %s4026_s17 }
  0x1c   : > { %p4034_p3 = scmp.lt.s32.totalorder %s221_s13, %s221_s13  ;;  %p4035_p5 = scmp.lt.s32.totalorder %s4026_s17, %s4026_s17 }
  0x1d   : > { %p4017_p11 = pneg %p4347_p10 }
  0x1e   : > { %p4036_p7 = por %p4035_p5, %p4034_p3 }
  0x1f   : > { %p4029_p13 = pnand %p4027_p12, %p4017_p11 }
  0x21   : > { %p4030_p0 = pneg %p4029_p13 }
  0x23   : > { %p4037_p9 = pnand %p4036_p7, %p4030_p0 }
  0x25   : > { %4040 = shalt.err (!%p4037_p9)
}
  0x26   : > { %s4229_s18 = smov 256   ;;  %s4230_s19 = smov 16  }
  0x27   : > { %s5523_s3 = sld [smem:[#allocation62_spill]]  ;;  %s4052_s30 = scalar_lea.vmem %s234_s16, 4096 }
  0x28   : > { %p4053_p6 = scmp.ne.s32.totalorder %s234_s16, %s4052_s30  ;;  %p4060_p1 = scmp.lt.s32.totalorder %s234_s16, %s234_s16 }
  0x29   : > { %p4061_p4 = scmp.lt.s32.totalorder %s4052_s30, %s4052_s30 }
  0x2a   : > { %p4055_p12 = pnand %p4053_p6, %p4017_p11 }
  0x2b   : > { %p4062_p3 = por %p4061_p4, %p4060_p1 }
  0x2c   : > { %p4056_p13 = pneg %p4055_p12 }
  0x2d   : > { %3700 = dma.hbm_to_vmem [thread:$0]  (!%p4347_p10), %s5523_s3, 4096, %s221_s13, [#allocation7], %s4229_s18, %s4229_s18, %s4230_s19  }
  0x2e   : > { %p4063_p0 = pnand %p4062_p3, %p4056_p13 }
  0x30   : > { %4066 = shalt.err (!%p4063_p0)
}
  0x31   : > { %s5457_s12 = smov 64   ;;  %s5458_s15 = smov 4  }
  0x32   : > { %s5524_s4 = sld [smem:[#allocation63_spill]]  ;;  %s4233_s18 = smov [#allocation9]  }
  0x33   : > { %s246_s19 = sshll.u32 %s4233_s18, 4  ;;  %s247_s19 = int_to_ptr.vmem [resolvable:$true] %s246_s19 }
  0x34   : > { %s4078_s20 = scalar_lea.vmem %s247_s19, 1024  ;;  %p4086_p5 = scmp.lt.s32.totalorder %s247_s19, %s247_s19 }
  0x35   : > { %p4079_p6 = scmp.ne.s32.totalorder %s247_s19, %s4078_s20  ;;  %p4087_p7 = scmp.lt.s32.totalorder %s4078_s20, %s4078_s20 }
  0x37   : > { %p4081_p1 = pnand %p4079_p6, %p4017_p11  ;;  %p4088_p9 = por %p4087_p7, %p4086_p5 }
  0x38   : > { %3703 = dma.hbm_to_vmem [thread:$0]  (!%p4347_p10), %s5524_s4, 4096, %s234_s16, [#allocation7], %s5457_s12, %s5457_s12, %s5458_s15  }
  0x39   : > { %p4082_p4 = pneg %p4081_p1 }
  0x3b   : > { %p4089_p12 = pnand %p4088_p9, %p4082_p4 }
  0x3d   : > { %4092 = shalt.err (!%p4089_p12)
}
  0x3e   : > { %s5525_s5 = sld [smem:[#allocation64_spill]]  ;;  %s33_s14 = sadd.s32 1, %s4217_s26 }
  0x3f   : > { %p34_p11 = scmp.ge.s32.totalorder %s33_s14, 2  ;;  %s36_s30 = sadd.s32 1, %s4221_s27 }
  0x40   : > { %s45_s13 = sadd.s32 1, %s4205_s23  ;;  %p52_p13 = scmp.ne.s32.totalorder %s4205_s23, %s4201_s22 }
  0x41   : > { %s5702_s14 = smov (%p34_p11, %s33_s14), 0  ;;  %s5704_s30 = smov (!%p34_p11, %s36_s30), %s4221_s27 }
  0x42   : > { %5526 = sst [smem:[#allocation19_spill]] %s5702_s14  ;;  %s41_s17 = ssub.s32 %s4217_s26, %s5702_s14 }
  0x43   : > { %p53_p3 = scmp.eq.s32.totalorder %s4225_s28, 0  ;;  %p38_p0 = scmp.ge.s32.totalorder %s5704_s30, 2 }
  0x44   : > { %3706 = dma.hbm_to_vmem [thread:$0]  (!%p4347_p10), %s5525_s5, 1024, %s247_s19, [#allocation10], %s5457_s12, %s5457_s12, %s5458_s15  }
  0x45   : > { %p4396_p6 = por %p4323_p2, %p52_p13  ;;  %p4400_p10 = por %p53_p3, %p52_p13 }
  0x46   : > { %p3718_p1 = scmp.lt.s32.totalorder %s4225_s28, 4  ;;  %s5706_s30 = smov (%p38_p0, %s5704_s30), 0 }
  0x47   : > { %s260_s20 = sand.u32 1, %s4205_s23   ;;  %s3008_s16 = sshll.u32 %s4217_s26, 5 }
  0x48   : > { %s40_s29 = ssub.s32 %s4221_s27, %s5706_s30  ;;  %s3007_s15 = sshll.u32 %s260_s20, 7 }
  0x49   : > { %s42_s12 = sor.u32 %s41_s17, %s40_s29  ;;  %s3009_s8 = sshll.u32 %s4221_s27, 6 }
  0x4a   : > { %p43_p4 = scmp.eq.s32.totalorder %s42_s12, 0  ;;  %s264_s3 = scalar_lea.vmem [#allocation3], %s3007_s15 }
  0x4b   : > { %s273_s4 = sshll.u32 %s264_s3, 4  ;;  %s270_s14 = sadd.s32 %s3009_s8, %s3008_s16  ;;  %s274_s4 = int_to_ptr.vmem [resolvable:$true] %s273_s4 }
  0x4c   : > { %s4413_s5 = scalar_select %p43_p4, %s4205_s23, %s45_s13  }
  0x4d   : > { %s3010_s10 = sshll.u32 %s270_s14, 6  ;;  %p4419_p2 = pnand %p3718_p1, %p4400_p10 }
  0x4e   : > { %s272_s17 = scalar_lea.hbm %s5447_s0, %s3010_s10  ;;  %s261_s12 = scalar_lea.sflag [#allocation4], %s260_s20 }
  0x4f   : > { %p4095_p5 = pneg %p4419_p2  ;;  %s4106_s3 = scalar_lea.vmem %s274_s4, 2048 }
  0x50   : > { %p4107_p7 = scmp.ne.s32.totalorder %s274_s4, %s4106_s3  ;;  %s4234_s15 = smov [#allocation3]  }
  0x51   : > { %s4111_s14 = sshll.u32 %s4234_s15, 4  ;;  %s4112_s14 = int_to_ptr.vmem [resolvable:$false] %s4111_s14 }
  0x52   : > { %p4109_p9 = pnand %p4107_p7, %p4095_p5  ;;  %s4113_s13 = scalar_lea.vmem %s4112_s14, 4096 }
  0x53   : > { %p4114_p11 = scmp.lt.s32.totalorder %s274_s4, %s4112_s14  ;;  %p4115_p13 = scmp.lt.s32.totalorder %s4113_s13, %s4106_s3 }
  0x54   : > { %p4110_p12 = pneg %p4109_p9 }
  0x55   : > { %p4116_p3 = por %p4115_p13, %p4114_p11 }
  0x57   : > { %p4117_p0 = pnand %p4116_p3, %p4110_p12 }
  0x59   : > { %4120 = shalt.err (!%p4117_p0)
}
  0x5a   : > { %s5530_s6 = smov 4   ;;  %s5531_s26 = smov 64  }
  0x5b   : > { %3710 = dma.hbm_to_vmem [thread:$0]  (!%p4419_p2), %s272_s17, 2048, %s274_s4, %s261_s12, %s5531_s26, %s5531_s26, %s5530_s6  }
  0x5c   : > { %285 = sbr.rel (%p4339_p8) target bundleno = 789 (0x315), region = 44 }
  0x61   : > { %s4436_s10 = sand.u32 1, %s4201_s22   ;;  %p5532_p10 = scmp.ne.s32.totalorder %s5518_s9, 0 }
  0x62   : > { %s3012_s19 = sshll.u32 %s4436_s10, 7  ;;  %s288_s20 = scalar_lea.sflag [#allocation4], %s4436_s10 }
  0x63   : > { %s4440_s16 = scalar_lea.vmem [#allocation3], %s3012_s19 }
  0x64   : > { %4180 = dma.done.wait (%p5532_p10), %s288_s20, 2048  }
  0x65   : > { %4182 = vsyncadd (%p5532_p10), %s288_s20, 4294965248  ;;  %p5533_p1 = scmp.ne.s32.totalorder %s5516_s7, 0 }
  0x67   : > { %4184 = dma.done.wait (%p5533_p1), [#allocation7], 8192  }
  0x68   : > { %4186 = vsyncadd (%p5533_p1), [#allocation7], 4294959104 }
  0x69   : > { %4188 = dma.done.wait (%p5533_p1), [#allocation10], 1024  }
  0x6a   : > { %4190 = vsyncadd (%p5533_p1), [#allocation10], 4294966272  ;;  %s4454_s4 = scalar_lea.vmem [#allocation11], %s3012_s19  ;;  %p3017_p8 = scmp.ne.s32.totalorder %s4209_s24, 0 }
  0x6c   : > { %338 = sbr.rel (%p3017_p8) target bundleno = 115 (0x73), region = 64 }
  0x71   : > { %v4235_v0 = vmov 0.0  }
  0x72   : > { %339 = vst [vmem:[#allocation2] sm:$0x1] %v4235_v0 }
  0x73 PF: > { %v3798_v1 = vld [vmem:[#allocation6 + $0xe4] ss:$16 sps:$4 sm:$0xff]   ;;  %v3800_v2 = vld [vmem:[#allocation6 + $0xe0] ss:$16 sps:$4 sm:$0xff]   ;;  %v5468_v3 = vmov 0   ;;  %v436_v7 = vlaneseq  ;;  %v4463_v16 = vld [vmem:[%s4440_s16 + $0x78] sm:$0xff]  }
  0x74   : > { %988 = vmatprep.mubr.bf16.mxu0 %v5468_v3  ;;  %1108 = vmatprep.mubr.bf16.mxu1 %v5468_v3  ;;  %v3801_v4 = vld [vmem:[#allocation6 + $0xc4] ss:$16 sps:$4 sm:$0xff]   ;;  %v3803_v5 = vld [vmem:[#allocation6 + $0xc0] ss:$16 sps:$4 sm:$0xff]   ;;  %v4466_v17 = vunpack.c.h.bf16 %v4463_v16  ;;  %v4470_v18 = vld [vmem:[%s4440_s16 + $0x58] sm:$0xff]   ;;  %s3158_s17 = sshll.u32 %s4209_s24, 5 }
  0x75   : > { %956 = vmatprep.subr.bf16.mxu0 %v3798_v1  ;;  %3665 = vmatprep.subr.bf16.mxu1 %v3798_v1  ;;  %v3804_v6 = vld [vmem:[#allocation6 + $0xa4] ss:$16 sps:$4 sm:$0xff]   ;;  %v3806_v8 = vld [vmem:[#allocation6 + $0xa0] ss:$16 sps:$4 sm:$0xff]   ;;  %v4459_v10 = vshrl.u32 %v436_v7, 7  ;;  %v5464_v23 = vunpack.c.h.bf16 %v4470_v18  ;;  %v3339_v31 = vld [vmem:[%s4440_s16 + $0x8] sm:$0xff]  }
  0x76   : > { %957 = vmatpush1.bf16.msra.mxu0 %v3800_v2  ;;  %3673 = vmatpush1.bf16.msra.mxu1 %v3800_v2  ;;  %v3807_v9 = vld [vmem:[#allocation6 + $0x84] ss:$16 sps:$4 sm:$0xff]   ;;  %v3809_v12 = vld [vmem:[#allocation6 + $0x80] ss:$16 sps:$4 sm:$0xff]   ;;  %v435_v25 = vrot.slane %v4466_v17, 7  ;;  %v3351_v32 = vld [vmem:[%s4440_s16 + $0x68] sm:$0xff]   ;;  %v3201_v37 = vunpack.c.l.bf16 %v3339_v31  ;;  %v3202_v41 = vunpack.c.h.bf16 %v3339_v31 }
  0x77   : > { %958 = vmatprep.subr.bf16.mxu0 %v3801_v4  ;;  %3666 = vmatprep.subr.bf16.mxu1 %v3801_v4  ;;  %v3196_v11 = vld [vmem:[%s4440_s16] sm:$0xff]   ;;  %vm438_vm0 = vcmp.lt.s32.totalorder %v4459_v10, 1  ;;  %vm502_vm1 = vcmp.eq.s32.totalorder %v4459_v10, 0  ;;  %v4483_v29 = vrot.slane %v5464_v23, 7  ;;  %v4501_v39 = vld [vmem:[%s5448_s1] ss:$0 sm:$0xff]  ;;  %v3249_v42 = vunpack.c.l.bf16 %v3351_v32 }
  0x78   : > { %v3810_v13 = vld [vmem:[#allocation6 + $0x64] ss:$16 sps:$4 sm:$0xff]   ;;  %v3197_v14 = vunpack.c.l.bf16 %v3196_v11  ;;  %v3198_v15 = vunpack.c.h.bf16 %v3196_v11  ;;  %v3812_v27 = vld [vmem:[#allocation6 + $0x60] ss:$16 sps:$4 sm:$0xff]   ;;  %v406_v48 = vrot.slane %v3201_v37, 7  ;;  %v407_v49 = vrot.slane %v3202_v41, 7 }
  0x79   : > { %v3350_v19 = vld [vmem:[%s4440_s16 + $0x60] sm:$0xff]   ;;  %v3018_v22 = vld [vmem:[#allocation2] ss:$0 sm:$0xff]  ;;  %v3250_v50 = vunpack.c.h.bf16 %v3351_v32  ;;  %v430_v55 = vrot.slane %v3249_v42, 7  ;;  %v4528_v56 = vld [vmem:[%s4440_s16 + $0x10] sm:$0xff]   ;;  %s3159_s12 = sshll.u32 %s4213_s25, 6 }
  0x7a   : > { %959 = vmatpush1.bf16.msra.mxu0 %v3803_v5  ;;  %3674 = vmatpush1.bf16.msra.mxu1 %v3803_v5  ;;  %v404_v20 = vrot.slane %v3197_v14, 7  ;;  %v405_v21 = vrot.slane %v3198_v15, 7  ;;  %v3245_v24 = vunpack.c.l.bf16 %v3350_v19  ;;  %573 = vst [vmem:[#allocation2 - $0x7] sm:$0x80] %v4466_v17  ;;  %v3246_v26 = vunpack.c.h.bf16 %v3350_v19  ;;  %v3813_v33 = vld [vmem:[#allocation6 + $0x44] ss:$16 sps:$4 sm:$0xff]   ;;  %s2878_s3 = sadd.s32 %s3159_s12, %s3158_s17 }
  0x7b   : > { %960 = vmatprep.subr.bf16.mxu0 %v3804_v6  ;;  %3667 = vmatprep.subr.bf16.mxu1 %v3804_v6  ;;  %v3815_v46 = vld [vmem:[#allocation6 + $0x40] ss:$16 sps:$4 sm:$0xff]   ;;  %v3816_v51 = vld [vmem:[#allocation6 + $0x24] ss:$16 sps:$4 sm:$0xff]   ;;  %v467_v58 = vsel %vm438_vm0, %v406_v48, %v407_v49  ;;  %v4536_v60 = vrot.slane %v3250_v50, 7  ;;  %v3205_v4 = vunpack.c.l.bf16 %v4528_v56  ;;  %s3160_s24 = sshll.u32 %s2878_s3, 6 }
  0x7c   : > { %v4479_v28 = vsel %vm438_vm0, %v404_v20, %v405_v21  ;;  %v428_v30 = vrot.slane %v3245_v24, 7  ;;  %v470_v34 = vsel %vm438_vm0, %v435_v25, %v404_v20  ;;  %v429_v36 = vrot.slane %v3246_v26, 7  ;;  %v3020_v61 = vld [vmem:[%s5449_s2] ss:$0 sm:$0xff]  ;;  %v3818_v0 = vld [vmem:[#allocation6 + $0x20] ss:$16 sps:$4 sm:$0xff]  }
  0x7d   : > { %v4492_v35 = vsub.f32 %v3198_v15, %v4479_v28  ;;  %v4496_v38 = vsel %vm502_vm1, %v3018_v22, %v470_v34  ;;  %v468_v59 = vsel %vm438_vm0, %v405_v21, %v406_v48  ;;  %v579_v63 = vsub.f32 %v3202_v41, %v467_v58  ;;  %v3819_v5 = vld [vmem:[#allocation6 + $0x4] ss:$16 sps:$4 sm:$0xff]   ;;  %v3821_v19 = vld [vmem:[#allocation6] ss:$16 sps:$4 sm:$0xff]   ;;  %v3846_v41 = vld [vmem:[#allocation8 + $0x78] sm:$0xff]   ;;  %s2881_s25 = sshll.u32 %s4454_s4, 4  ;;  %s5392_s25 = int_to_ptr.vmem [resolvable:$true] %s2881_s25 }
  0x7e   : > { %961 = vmatpush1.bf16.msra.mxu0 %v3806_v8  ;;  %3675 = vmatpush1.bf16.msra.mxu1 %v3806_v8  ;;  %v4506_v40 = vsel %vm438_vm0, %v4483_v29, %v428_v30  ;;  %v4509_v43 = vsub.f32 %v3197_v14, %v4496_v38  ;;  %v4513_v44 = vsel %vm438_vm0, %v428_v30, %v429_v36  ;;  %v3352_v15 = vld [vmem:[%s4440_s16 + $0x70] sm:$0xff]   ;;  %v3822_v48 = vld [vmem:[#allocation6 + $0xe8] ss:$16 sps:$4 sm:$0xff]   ;;  %v3864_v10 = vld [vmem:[#allocation8 + $0x40] sm:$0xff]   ;;  %s5690_s13 = sld [smem:[#allocation65_spill]]  ;;  %s2866_s26 = scalar_lea.sflag [#allocation5], %s4436_s10 }
  0x7f   : > { %962 = vmatprep.subr.bf16.mxu0 %v3807_v9  ;;  %3668 = vmatprep.subr.bf16.mxu1 %v3807_v9  ;;  %5534 = vst [vmem:[#allocation20_spill] sm:$0xff] %v4506_v40  ;;  %5535 = vst [vmem:[#allocation21_spill] sm:$0xff] %v4513_v44  ;;  %v4516_v45 = vsub.f32 %v3245_v24, %v4506_v40  ;;  %v4519_v47 = vsub.f32 %v3246_v26, %v4513_v44  ;;  %v3206_v9 = vunpack.c.h.bf16 %v4528_v56  ;;  %v3824_v26 = vld [vmem:[#allocation6 + $0xec] ss:$16 sps:$4 sm:$0xff]   ;;  %s4121_s19 = scalar_lea.vmem %s5392_s25, 2048  ;;  %s4237_s20 = smov [#allocation11]  }
  0x80   : > { %v614_v52 = vmul.f32 %v4501_v39, %v4509_v43  ;;  %v615_v53 = vmul.f32 %v4501_v39, %v4492_v35  ;;  %v578_v62 = vsub.f32 %v3201_v37, %v468_v59  ;;  %v4544_v1 = vsel %vm438_vm0, %v430_v55, %v4536_v60  ;;  %p4122_p4 = scmp.ne.s32.totalorder %s5392_s25, %s4121_s19 }
  0x81   : > { %5536 = vst [vmem:[#allocation22_spill] sm:$0xff] %v4516_v45  ;;  %5537 = vst [vmem:[#allocation23_spill] sm:$0xff] %v4519_v47  ;;  %v638_v54 = vmul.f32 %v4501_v39, %v4516_v45  ;;  %v639_v57 = vmul.f32 %v4501_v39, %v4519_v47  ;;  %v4548_v2 = vsel %vm438_vm0, %v429_v36, %v430_v55  ;;  %v408_v24 = vrot.slane %v3205_v4, 7 }
  0x82   : > { %963 = vmatpush1.bf16.msra.mxu0 %v3809_v12  ;;  %3676 = vmatpush1.bf16.msra.mxu1 %v3809_v12  ;;  %5538 = vst [vmem:[#allocation24_spill] sm:$0xff] %v4544_v1  ;;  %5539 = vst [vmem:[#allocation25_spill] sm:$0xff] %v4548_v2  ;;  %v646_v6 = vadd.f32 %v614_v52, %v4496_v38  ;;  %v647_v7 = vadd.f32 %v615_v53, %v4479_v28  ;;  %v409_v32 = vrot.slane %v3206_v9, 7  ;;  %v3827_v52 = vld [vmem:[#allocation6 + $0xcc] ss:$16 sps:$4 sm:$0xff]   ;;  %p4123_p2 = pnand %p4122_p4, %p4396_p6 }
  0x83   : > { %964 = vmatprep.subr.bf16.mxu0 %v3810_v13  ;;  %3669 = vmatprep.subr.bf16.mxu1 %v3810_v13  ;;  %v670_v8 = vadd.f32 %v638_v54, %v4506_v40  ;;  %v671_v11 = vadd.f32 %v639_v57, %v4513_v44  ;;  %v686_v12 = vmul.f32 %v3020_v61, %v578_v62  ;;  %v3253_v36 = vunpack.c.l.bf16 %v3352_v15 }
  0x84   : > { %v687_v13 = vmul.f32 %v3020_v61, %v579_v63  ;;  %v4557_v14 = vsub.f32 %v3249_v42, %v4548_v2  ;;  %v616_v20 = vmul.f32 %v4501_v39, %v578_v62  ;;  %v617_v21 = vmul.f32 %v4501_v39, %v579_v63  ;;  %s5390_s6 = scalar_lea.hbm %s5690_s13, %s3160_s24  ;;  %p4124_p5 = pneg %p4123_p2 }
  0x85   : > { %v4563_v22 = vsub.f32 %v3250_v50, %v4544_v1  ;;  %v3257_v37 = vunpack.c.l.bf16 %v4463_v16  ;;  %v4577_v42 = vpack.c.bf16 %v647_v7, %v646_v6  ;;  %v4589_v54 = vsel %vm438_vm0, %v408_v24, %v409_v32  ;;  %v3825_v7 = vld [vmem:[#allocation6 + $0xc8] ss:$16 sps:$4 sm:$0xff]  }
  0x86   : > { %965 = vmatpush1.bf16.msra.mxu0 %v3812_v27  ;;  %3677 = vmatpush1.bf16.msra.mxu1 %v3812_v27  ;;  %5540 = vst [vmem:[#allocation26_spill] sm:$0xff] %v4557_v14  ;;  %v4565_v27 = vadd.f32 %v686_v12, %v468_v59  ;;  %v4567_v30 = vadd.f32 %v687_v13, %v467_v58  ;;  %v3254_v55 = vunpack.c.h.bf16 %v3352_v15  ;;  %v432_v56 = vrot.slane %v3253_v36, 7  ;;  %v3837_v50 = vld [vmem:[#allocation6 + $0x48] ss:$16 sps:$4 sm:$0xff]  }
  0x87   : > { %966 = vmatprep.subr.bf16.mxu0 %v3813_v33  ;;  %3670 = vmatprep.subr.bf16.mxu1 %v3813_v33  ;;  %5541 = vst [vmem:[#allocation27_spill] sm:$0xff] %v4563_v22  ;;  %v640_v31 = vmul.f32 %v4501_v39, %v4557_v14  ;;  %v4572_v33 = vld [vmem:[%s4440_s16 + $0x18] sm:$0xff]   ;;  %v641_v34 = vmul.f32 %v4501_v39, %v4563_v22  ;;  %v434_v15 = vrot.slane %v3257_v37, 7  ;;  %v3860_v22 = vld [vmem:[#allocation8 + $0x48] sm:$0xff]   ;;  %v3862_v14 = vld [vmem:[#allocation8 + $0xf0] sm:$0xff]  }
  0x88   : > { %v648_v53 = vadd.f32 %v616_v20, %v468_v59  ;;  %v649_v57 = vadd.f32 %v617_v21, %v467_v58  ;;  %v3209_v62 = vunpack.c.l.bf16 %v4572_v33  ;;  %v3210_v63 = vunpack.c.h.bf16 %v4572_v33  ;;  %v3847_v58 = vld [vmem:[#allocation8 + $0x38] sm:$0xff]  }
  0x89   : > { %v672_v61 = vadd.f32 %v640_v31, %v4548_v2  ;;  %v4604_v6 = vsel %vm438_vm0, %v4536_v60, %v432_v56  ;;  %v3828_v33 = vld [vmem:[#allocation6 + $0xa8] ss:$16 sps:$4 sm:$0xff]  }
  0x8a   : > { %967 = vmatpush1.bf16.msra.mxu0 %v3815_v46  ;;  %3678 = vmatpush1.bf16.msra.mxu1 %v3815_v46  ;;  %v4579_v46 = vpack.c.bf16 %v671_v11, %v670_v8  ;;  %5542 = vst [vmem:[#allocation28_spill] sm:$0xff] %v4604_v6  ;;  %v4607_v8 = vsub.f32 %v3206_v9, %v4589_v54  ;;  %v410_v12 = vrot.slane %v3209_v62, 7  ;;  %v411_v13 = vrot.slane %v3210_v63, 7 }
  0x8b   : > { %968 = vmatprep.subr.bf16.mxu0 %v3816_v51  ;;  %3671 = vmatprep.subr.bf16.mxu1 %v3816_v51  ;;  %v4585_v51 = vsel %vm438_vm0, %v407_v49, %v408_v24  ;;  %v673_v49 = vadd.f32 %v641_v34, %v4544_v1  ;;  %v4610_v11 = vsub.f32 %v3253_v36, %v4604_v6  ;;  %v3857_v1 = vld [vmem:[#allocation8 + $0xf8] sm:$0xff]  }
  0x8c   : > { %v4599_v59 = vsub.f32 %v3205_v4, %v4585_v51  ;;  %v3830_v4 = vld [vmem:[#allocation6 + $0xac] ss:$16 sps:$4 sm:$0xff]   ;;  %v4626_v21 = vpack.c.bf16 %v649_v57, %v648_v53  ;;  %v619_v34 = vmul.f32 %v4501_v39, %v4607_v8  ;;  %v4644_v53 = vsel %vm438_vm0, %v409_v32, %v410_v12 }
  0x8d   : > { %5543 = vst [vmem:[#allocation29_spill] sm:$0xff] %v4610_v11  ;;  %v4630_v31 = vpack.c.bf16 %v673_v49, %v672_v61  ;;  %v642_v36 = vmul.f32 %v4501_v39, %v4610_v11  ;;  %v4653_v57 = vsel %vm438_vm0, %v434_v15, %v435_v25  ;;  %v3850_v49 = vld [vmem:[#allocation8 + $0x68] sm:$0xff]  }
  0x8e   : > { %969 = vmatpush1.bf16.msra.mxu0 %v3818_v0  ;;  %3679 = vmatpush1.bf16.msra.mxu1 %v3818_v0  ;;  %v4595_v0 = vld [vmem:[%s4440_s16 + $0x20] sm:$0xff]   ;;  %v618_v24 = vmul.f32 %v4501_v39, %v4599_v59  ;;  %5546 = vst [vmem:[#allocation32_spill] sm:$0xff] %v4653_v57 }
  0x8f   : > { %970 = vmatprep.subr.bf16.mxu0 %v3819_v5  ;;  %3672 = vmatprep.subr.bf16.mxu1 %v3819_v5  ;;  %v433_v5 = vrot.slane %v3254_v55, 7  ;;  %v3213_v9 = vunpack.c.l.bf16 %v4595_v0 }
  0x90   : > { %v650_v32 = vadd.f32 %v618_v24, %v4585_v51 }
  0x91   : > { %v4616_v60 = vsel %vm438_vm0, %v432_v56, %v433_v5  ;;  %v412_v56 = vrot.slane %v3213_v9, 7  ;;  %v4657_v61 = vsel %vm438_vm0, %v433_v5, %v434_v15 }
  0x92   : > { %971 = vmatpush1.bf16.msra.mxu0 %v3821_v19  ;;  %3680 = vmatpush1.bf16.msra.mxu1 %v3821_v19  ;;  %5544 = vst [vmem:[#allocation30_spill] sm:$0xff] %v4616_v60  ;;  %v3848_v19 = vld [vmem:[#allocation8 + $0x70] sm:$0xff]   ;;  %v4623_v20 = vsub.f32 %v3254_v55, %v4616_v60  ;;  %v3214_v55 = vunpack.c.h.bf16 %v4595_v0  ;;  %5547 = vst [vmem:[#allocation33_spill] sm:$0xff] %v4657_v61  ;;  %v4674_v15 = vsub.f32 %v3257_v37, %v4657_v61  ;;  %v3852_v0 = vld [vmem:[#allocation8 + $0x60] sm:$0xff]  }
  0x93   : > { %1149 = vmatprep.subr.bf16.mxu1 %v3824_v26  ;;  %3369 = vmatprep.subr.bf16.mxu0 %v3846_v41  ;;  %v3849_v26 = vld [vmem:[#allocation8 + $0x30] sm:$0xff]   ;;  %v4638_v41 = vsel %vm438_vm0, %v410_v12, %v411_v13  ;;  %v651_v12 = vadd.f32 %v619_v34, %v4589_v54 }
  0x94   : > { %5545 = vst [vmem:[#allocation31_spill] sm:$0xff] %v4623_v20  ;;  %v4666_v25 = vsub.f32 %v3210_v63, %v4638_v41  ;;  %5548 = vst [vmem:[#allocation34_spill] sm:$0xff] %v4674_v15  ;;  %v413_v24 = vrot.slane %v3214_v55, 7  ;;  %v3851_v63 = vld [vmem:[#allocation8 + $0x28] sm:$0xff]  }
  0x95   : > { %989 = vmatmul.mubr.bf16.vlgmr.msra.gmra.mxu0 %v4577_v42  ;;  %1109 = vmatmul.mubr.bf16.vlgmr.msra.gmra.mxu1 %v4579_v46  ;;  %v4683_v34 = vpack.c.bf16 %v651_v12, %v650_v32 }
  0x96   : > { %1150 = vmatpush1.bf16.msra.mxu1 %v3822_v48  ;;  %998 = vmatprep.mubr.bf16.mxu0 %v5468_v3  ;;  %v3833_v48 = vld [vmem:[#allocation6 + $0x8c] ss:$16 sps:$4 sm:$0xff]   ;;  %v621_v37 = vmul.f32 %v4501_v39, %v4666_v25  ;;  %v4701_v32 = vsel %vm438_vm0, %v412_v56, %v413_v24 }
  0x97   : > { %1151 = vmatprep.subr.bf16.mxu1 %v3827_v52  ;;  %1118 = vmatprep.mubr.bf16.mxu1 %v5468_v3  ;;  %v643_v52 = vmul.f32 %v4501_v39, %v4623_v20  ;;  %v4710_v23 = vsub.f32 %v3214_v55, %v4701_v32 }
  0x98   : > { %3370 = vmatpush3.bf16.msra.mxu0 %v3847_v58  ;;  %v3831_v58 = vld [vmem:[#allocation6 + $0x88] ss:$16 sps:$4 sm:$0xff]  }
  0x99   : > { %3371 = vmatprep.subr.bf16.mxu0 %v3848_v19  ;;  %v674_v19 = vadd.f32 %v642_v36, %v4604_v6  ;;  %v675_v5 = vadd.f32 %v643_v52, %v4616_v60  ;;  %v3834_v36 = vld [vmem:[#allocation6 + $0x68] ss:$16 sps:$4 sm:$0xff]  }
  0x9a   : > { %1152 = vmatpush1.bf16.msra.mxu1 %v3825_v7  ;;  %v4663_v7 = vsub.f32 %v3209_v62, %v4644_v53  ;;  %v4678_v62 = vsub.f32 %v4466_v17, %v4653_v57  ;;  %v4691_v17 = vsel %vm438_vm0, %v411_v13, %v412_v56  ;;  %v4713_v56 = vld [vmem:[%s4440_s16 + $0x30] sm:$0xff]  }
  0x9b   : > { %1153 = vmatprep.subr.bf16.mxu1 %v3830_v4  ;;  %v3836_v4 = vld [vmem:[#allocation6 + $0x6c] ss:$16 sps:$4 sm:$0xff]  }
  0x9c   : > { %3372 = vmatpush3.bf16.msra.mxu0 %v3849_v26  ;;  %5549 = vst [vmem:[#allocation35_spill] sm:$0xff] %v4678_v62  ;;  %v3343_v26 = vld [vmem:[%s4440_s16 + $0x28] sm:$0xff]   ;;  %v620_v16 = vmul.f32 %v4501_v39, %v4663_v7  ;;  %v645_v52 = vmul.f32 %v4501_v39, %v4678_v62  ;;  %v4723_v62 = vld [vmem:[%s4440_s16 + $0x50] sm:$0xff]  }
  0x9d   : > { %999 = vmatmul.mubr.bf16.gmra.mxu0 %v4626_v21  ;;  %1119 = vmatmul.mubr.bf16.gmra.mxu1 %v4630_v31  ;;  %v3217_v12 = vunpack.c.l.bf16 %v3343_v26  ;;  %v3218_v13 = vunpack.c.h.bf16 %v3343_v26  ;;  %v3842_v26 = vld [vmem:[#allocation6 + $0x2c] ss:$16 sps:$4 sm:$0xff]   ;;  %v5553_v6 = vunpack.c.h.bf16 %v4723_v62 }
  0x9e   : > { %1154 = vmatpush1.bf16.msra.mxu1 %v3828_v33  ;;  %1008 = vmatprep.mubr.bf16.mxu0 %v5468_v3  ;;  %v4693_v33 = vpack.c.bf16 %v675_v5, %v674_v19  ;;  %v653_v19 = vadd.f32 %v621_v37, %v4638_v41  ;;  %v4707_v5 = vsub.f32 %v3213_v9, %v4691_v17  ;;  %v3853_v9 = vld [vmem:[#allocation8 + $0x20] sm:$0xff]  }
  0x9f   : > { %1155 = vmatprep.subr.bf16.mxu1 %v3833_v48  ;;  %1128 = vmatprep.mubr.bf16.mxu1 %v5468_v3  ;;  %v644_v48 = vmul.f32 %v4501_v39, %v4674_v15  ;;  %v414_v55 = vrot.slane %v3217_v12, 7  ;;  %v415_v37 = vrot.slane %v3218_v13, 7 }
  0xa0   : > { %3373 = vmatprep.subr.bf16.mxu0 %v3850_v49  ;;  %v3839_v49 = vld [vmem:[#allocation6 + $0x4c] ss:$16 sps:$4 sm:$0xff]  }
  0xa1   : > { %3374 = vmatpush3.bf16.msra.mxu0 %v3851_v63  ;;  %v677_v63 = vadd.f32 %v645_v52, %v4653_v57  ;;  %v5472_v52 = vunpack.c.l.bf16 %v4470_v18  ;;  %v4741_v15 = vsel %vm438_vm0, %v413_v24, %v414_v55 }
  0xa2   : > { %1156 = vmatpush1.bf16.msra.mxu1 %v3831_v58  ;;  %v652_v58 = vadd.f32 %v620_v16, %v4644_v53  ;;  %v622_v16 = vmul.f32 %v4501_v39, %v4707_v5  ;;  %3375 = vmatprep.subr.bf16.mxu0 %v3852_v0  ;;  %5551 = vst [vmem:[#allocation37_spill] sm:$0xff] %v4741_v15  ;;  %v3222_v0 = vunpack.c.h.bf16 %v4713_v56 }
  0xa3   : > { %1157 = vmatprep.subr.bf16.mxu1 %v3836_v4  ;;  %v676_v4 = vadd.f32 %v644_v48, %v4657_v61  ;;  %v623_v48 = vmul.f32 %v4501_v39, %v4710_v23  ;;  %v3221_v61 = vunpack.c.l.bf16 %v4713_v56  ;;  %v4752_v24 = vsub.f32 %v3217_v12, %v4741_v15 }
  0xa4   : > { %v4730_v57 = vpack.c.bf16 %v653_v19, %v652_v58  ;;  %v3845_v19 = vld [vmem:[#allocation6 + $0xc] ss:$16 sps:$4 sm:$0xff]   ;;  %v654_v58 = vadd.f32 %v622_v16, %v4691_v17  ;;  %v417_v60 = vrot.slane %v3222_v0, 7  ;;  %v4762_v12 = vrot.slane %v5553_v6, 7 }
  0xa5   : > { %1009 = vmatmul.mubr.bf16.gmra.mxu0 %v4683_v34  ;;  %1129 = vmatmul.mubr.bf16.gmra.mxu1 %v4693_v33  ;;  %v3855_v16 = vld [vmem:[#allocation8 + $0x18] sm:$0xff]   ;;  %v624_v20 = vmul.f32 %v4501_v39, %v4752_v24 }
  0xa6   : > { %1158 = vmatpush1.bf16.msra.mxu1 %v3834_v36  ;;  %1018 = vmatprep.mubr.bf16.mxu0 %v5468_v3  ;;  %v4732_v36 = vpack.c.bf16 %v677_v63, %v676_v4  ;;  %v655_v4 = vadd.f32 %v623_v48, %v4701_v32  ;;  %v426_v63 = vrot.slane %v5472_v52, 7  ;;  %v3843_v48 = vld [vmem:[#allocation6 + $0x8] ss:$16 sps:$4 sm:$0xff]   ;;  %v3856_v52 = vld [vmem:[#allocation8 + $0x50] sm:$0xff]  }
  0xa7   : > { %1159 = vmatprep.subr.bf16.mxu1 %v3839_v49  ;;  %1138 = vmatprep.mubr.bf16.mxu1 %v5468_v3  ;;  %v3840_v49 = vld [vmem:[#allocation6 + $0x28] ss:$16 sps:$4 sm:$0xff]   ;;  %v4737_v3 = vsel %vm438_vm0, %v414_v55, %v415_v37 }
  0xa8   : > { %3376 = vmatpush3.bf16.msra.mxu0 %v3853_v9  ;;  %5550 = vst [vmem:[#allocation36_spill] sm:$0xff] %v4737_v3  ;;  %v4755_v56 = vsub.f32 %v3218_v13, %v4737_v3  ;;  %v3345_v9 = vld [vmem:[%s4440_s16 + $0x38] sm:$0xff]   ;;  %v4767_v13 = vsel %vm438_vm0, %v426_v63, %v4483_v29  ;;  %v4769_v2 = vpack.c.bf16 %v655_v4, %v654_v58  ;;  %v3858_v58 = vld [vmem:[#allocation8 + $0x10] sm:$0xff]  }
  0xa9   : > { %v3854_v55 = vld [vmem:[#allocation8 + $0x58] sm:$0xff]   ;;  %5554 = vst [vmem:[#allocation38_spill] sm:$0xff] %v4767_v13  ;;  %v4782_v29 = vsel %vm438_vm0, %v4762_v12, %v426_v63  ;;  %v3226_v11 = vunpack.c.h.bf16 %v3345_v9  ;;  %v656_v63 = vadd.f32 %v624_v20, %v4741_v15 }
  0xaa   : > { %1160 = vmatpush1.bf16.msra.mxu1 %v3837_v50  ;;  %v5552_v50 = vmov 0   ;;  %3377 = vmatprep.subr.bf16.mxu0 %v3854_v55  ;;  %5556 = vst [vmem:[#allocation40_spill] sm:$0xff] %v4782_v29  ;;  %v3859_v4 = vld [vmem:[#allocation8 + $0xb8] sm:$0xff]  }
  0xab   : > { %1161 = vmatprep.subr.bf16.mxu1 %v3842_v26  ;;  %v416_v26 = vrot.slane %v3221_v61, 7 }
  0xac   : > { %3378 = vmatpush3.bf16.msra.mxu0 %v3855_v16 }
  0xad   : > { %1019 = vmatmul.mubr.bf16.gmra.mxu0 %v4730_v57  ;;  %1139 = vmatmul.mubr.bf16.gmra.mxu1 %v4732_v36  ;;  %v4777_v6 = vsel %vm438_vm0, %v415_v37, %v416_v26  ;;  %v4786_v55 = vsel %vm438_vm0, %v416_v26, %v417_v60 }
  0xae   : > { %1162 = vmatpush1.bf16.msra.mxu1 %v3840_v49  ;;  %1028 = vmatprep.mubr.bf16.mxu0 %v5552_v50  ;;  %v3225_v49 = vunpack.c.l.bf16 %v3345_v9  ;;  %5555 = vst [vmem:[#allocation39_spill] sm:$0xff] %v4777_v6  ;;  %5557 = vst [vmem:[#allocation41_spill] sm:$0xff] %v4786_v55  ;;  %v4789_v37 = vsub.f32 %v3221_v61, %v4777_v6  ;;  %v3346_v9 = vld [vmem:[%s4440_s16 + $0x40] sm:$0xff]   ;;  %v3861_v61 = vld [vmem:[#allocation8 + $0x8] sm:$0xff]  }
  0xaf   : > { %1163 = vmatprep.subr.bf16.mxu1 %v3845_v19  ;;  %1181 = vmatprep.mubr.bf16.mxu1 %v5552_v50  ;;  %v625_v19 = vmul.f32 %v4501_v39, %v4755_v56  ;;  %v3229_v44 = vunpack.c.l.bf16 %v3346_v9 }
  0xb0   : > { %3379 = vmatprep.subr.bf16.mxu0 %v3856_v52  ;;  %5558 = vst [vmem:[#allocation42_spill] sm:$0xff] %v4789_v37  ;;  %v418_v26 = vrot.slane %v3225_v49, 7  ;;  %v3863_v52 = vld [vmem:[#allocation8 + $0xb0] sm:$0xff]   ;;  %v626_v20 = vmul.f32 %v4501_v39, %v4789_v37 }
  0xb1   : > { %v657_v16 = vadd.f32 %v625_v19, %v4737_v3  ;;  %3380 = vmatpush3.bf16.msra.mxu0 %v3858_v58 }
  0xb2   : > { %1164 = vmatpush1.bf16.msra.mxu1 %v3843_v48  ;;  %v4796_v48 = vsub.f32 %v3222_v0, %v4786_v55  ;;  %3381 = vmatprep.subr.bf16.mxu0 %v3860_v22  ;;  %v4809_v19 = vsel %vm438_vm0, %v417_v60, %v418_v26  ;;  %v658_v22 = vadd.f32 %v626_v20, %v4777_v6 }
  0xb3   : > { %3481 = vmatprep.subr.bf16.mxu1 %v3857_v1  ;;  %v419_v1 = vrot.slane %v3226_v11, 7  ;;  %5560 = vst [vmem:[#allocation44_spill] sm:$0xff] %v4809_v19 }
  0xb4   : > { %5559 = vst [vmem:[#allocation43_spill] sm:$0xff] %v4796_v48  ;;  %v627_v0 = vmul.f32 %v4501_v39, %v4796_v48 }
  0xb5   : > { %1029 = vmatmul.mubr.bf16.gmra.mxu0 %v4769_v2  ;;  %1182 = vmatmul.mubr.bf16.vlgmr.msra.gmra.mxu1 %v4577_v42  ;;  %v4801_v42 = vpack.c.bf16 %v657_v16, %v656_v63  ;;  %v4813_v58 = vsel %vm438_vm0, %v418_v26, %v419_v1  ;;  %v420_v16 = vrot.slane %v3229_v44, 7 }
  0xb6   : > { %1038 = vmatprep.mubr.bf16.mxu0 %v5552_v50  ;;  %1191 = vmatprep.mubr.bf16.mxu1 %v5552_v50  ;;  %5561 = vst [vmem:[#allocation45_spill] sm:$0xff] %v4813_v58  ;;  %v659_v63 = vadd.f32 %v627_v0, %v4786_v55  ;;  %v4823_v60 = vsub.f32 %v3226_v11, %v4813_v58 }
  0xb7   : > { %3482 = vmatpush3.bf16.msra.mxu1 %v3859_v4  ;;  %v3230_v4 = vunpack.c.h.bf16 %v3346_v9  ;;  %3382 = vmatpush3.bf16.msra.mxu0 %v3861_v61  ;;  %v3347_v9 = vld [vmem:[%s4440_s16 + $0x48] sm:$0xff]   ;;  %s4125_s16 = sshll.u32 %s4237_s20, 4  ;;  %s4126_s16 = int_to_ptr.vmem [resolvable:$false] %s4125_s16 }
  0xb8   : > { %3483 = vmatprep.subr.bf16.mxu1 %v3862_v14  ;;  %v4816_v14 = vsub.f32 %v3225_v49, %v4809_v19  ;;  %5563 = vst [vmem:[#allocation47_spill] sm:$0xff] %v4823_v60  ;;  %v4828_v49 = vpack.c.bf16 %v659_v63, %v658_v22  ;;  %v3233_v20 = vunpack.c.l.bf16 %v3347_v9  ;;  %v3234_v0 = vunpack.c.h.bf16 %v3347_v9  ;;  %3383 = vmatprep.subr.bf16.mxu0 %v3864_v10  ;;  %s4127_s21 = scalar_lea.vmem %s4126_s16, 4096  ;;  %p4128_p7 = scmp.lt.s32.totalorder %s5392_s25, %s4126_s16 }
  0xb9   : > { %v421_v26 = vrot.slane %v3230_v4, 7  ;;  %p4129_p9 = scmp.lt.s32.totalorder %s4127_s21, %s4121_s19 }
  0xba   : > { %5562 = vst [vmem:[#allocation46_spill] sm:$0xff] %v4816_v14  ;;  %v628_v61 = vmul.f32 %v4501_v39, %v4816_v14  ;;  %v423_v9 = vrot.slane %v3234_v0, 7 }
  0xbb   : > { %3484 = vmatpush3.bf16.msra.mxu1 %v3863_v52  ;;  %v4836_v52 = vsel %vm438_vm0, %v419_v1, %v420_v16  ;;  %v4840_v11 = vsel %vm438_vm0, %v420_v16, %v421_v26  ;;  %v422_v16 = vrot.slane %v3233_v20, 7  ;;  %p4130_p12 = por %p4129_p9, %p4128_p7 }
  0xbc   : > { %5564 = vst [vmem:[#allocation48_spill] sm:$0xff] %v4836_v52  ;;  %5565 = vst [vmem:[#allocation49_spill] sm:$0xff] %v4840_v11  ;;  %v4843_v40 = vsub.f32 %v3229_v44, %v4836_v52  ;;  %v660_v22 = vadd.f32 %v628_v61, %v4809_v19  ;;  %v4850_v1 = vsub.f32 %v3230_v4, %v4840_v11  ;;  %v3237_v61 = vunpack.c.l.bf16 %v4723_v62 }
  0xbd   : > { %1039 = vmatmul.mubr.bf16.gmra.mxu0 %v4801_v42  ;;  %1192 = vmatmul.mubr.bf16.gmra.mxu1 %v4626_v21  ;;  %v629_v21 = vmul.f32 %v4501_v39, %v4823_v60  ;;  %v4865_v4 = vsel %vm438_vm0, %v421_v26, %v422_v16  ;;  %p4131_p11 = pnand %p4130_p12, %p4124_p5 }
  0xbe   : > { %1048 = vmatprep.mubr.bf16.mxu0 %v5552_v50  ;;  %1201 = vmatprep.mubr.bf16.mxu1 %v5552_v50  ;;  %5566 = vst [vmem:[#allocation50_spill] sm:$0xff] %v4843_v40  ;;  %5567 = vst [vmem:[#allocation51_spill] sm:$0xff] %v4850_v1  ;;  %v630_v44 = vmul.f32 %v4501_v39, %v4843_v40  ;;  %v424_v19 = vrot.slane %v3237_v61, 7 }
  0xbf   : > { %v661_v63 = vadd.f32 %v629_v21, %v4813_v58  ;;  %v4861_v21 = vsel %vm438_vm0, %v422_v16, %v423_v9  ;;  %5569 = vst [vmem:[#allocation53_spill] sm:$0xff] %v4865_v4 }
  0xc0   : > { %5568 = vst [vmem:[#allocation52_spill] sm:$0xff] %v4861_v21  ;;  %v662_v45 = vadd.f32 %v630_v44, %v4836_v52  ;;  %v4874_v58 = vsub.f32 %v3234_v0, %v4861_v21  ;;  %v4884_v44 = vsel %vm438_vm0, %v423_v9, %v424_v19 }
  0xc1   : > { %v755_v47 = vpack.c.bf16 %v661_v63, %v660_v22  ;;  %v4871_v63 = vsub.f32 %v3233_v20, %v4865_v4  ;;  %5572 = vst [vmem:[#allocation56_spill] sm:$0xff] %v4884_v44  ;;  %v4889_v20 = vsel %vm438_vm0, %v424_v19, %v4762_v12  ;;  %v4892_v0 = vsub.f32 %v3237_v61, %v4884_v44  ;;  %v3865_v61 = vld [vmem:[#allocation8] sm:$0xff]  }
  0xc2   : > { %5571 = vst [vmem:[#allocation55_spill] sm:$0xff] %v4874_v58  ;;  %5573 = vst [vmem:[#allocation57_spill] sm:$0xff] %v4889_v20  ;;  %3384 = vmatpush3.bf16.msra.mxu0 %v3865_v61 }
  0xc3   : > { %5570 = vst [vmem:[#allocation54_spill] sm:$0xff] %v4871_v63  ;;  %v632_v16 = vmul.f32 %v4501_v39, %v4871_v63  ;;  %5574 = vst [vmem:[#allocation58_spill] sm:$0xff] %v4892_v0  ;;  %v634_v19 = vmul.f32 %v4501_v39, %v4892_v0 }
  0xc5   : > { %1049 = vmatmul.mubr.bf16.gmra.mxu0 %v4828_v49  ;;  %1202 = vmatmul.mubr.bf16.gmra.mxu1 %v4683_v34  ;;  %v631_v34 = vmul.f32 %v4501_v39, %v4850_v1 }
  0xc6   : > { %1058 = vmatprep.mubr.bf16.mxu0 %v5552_v50  ;;  %1211 = vmatprep.mubr.bf16.mxu1 %v5552_v50 }
  0xc7   : > { %v663_v22 = vadd.f32 %v631_v34, %v4840_v11 }
  0xc9   : > { %v756_v26 = vpack.c.bf16 %v663_v22, %v662_v45  ;;  %v664_v45 = vadd.f32 %v632_v16, %v4865_v4  ;;  %v5575_v22 = vunpack.c.h.bf16 %v4723_v62  ;;  %v5577_v16 = vunpack.c.h.bf16 %v4470_v18 }
  0xcb   : > { %v4900_v9 = vsub.f32 %v5575_v22, %v4889_v20  ;;  %v4911_v62 = vsub.f32 %v5577_v16, %v4767_v13  ;;  %v3866_v16 = vld [vmem:[#allocation8 + $0xe8] sm:$0xff]  }
  0xcc   : > { %3485 = vmatprep.subr.bf16.mxu1 %v3866_v16  ;;  %v3875_v16 = vld [vmem:[#allocation8 + $0x90] sm:$0xff]  }
  0xcd   : > { %1059 = vmatmul.mubr.bf16.gmra.mxu0 %v755_v47  ;;  %1212 = vmatmul.mubr.bf16.gmra.mxu1 %v4730_v57  ;;  %v633_v57 = vmul.f32 %v4501_v39, %v4874_v58  ;;  %5576 = vst [vmem:[#allocation59_spill] sm:$0xff] %v4900_v9  ;;  %5578 = vst [vmem:[#allocation60_spill] sm:$0xff] %v4911_v62 }
  0xce   : > { %1068 = vmatprep.mubr.bf16.mxu0 %v5552_v50  ;;  %1221 = vmatprep.mubr.bf16.mxu1 %v5552_v50 }
  0xcf   : > { %v665_v34 = vadd.f32 %v633_v57, %v4861_v21  ;;  %v666_v57 = vadd.f32 %v634_v19, %v4884_v44  ;;  %v3867_v19 = vld [vmem:[#allocation8 + $0xa8] sm:$0xff]  }
  0xd0   : > { %3486 = vmatpush3.bf16.msra.mxu1 %v3867_v19  ;;  %v3876_v19 = vld [vmem:[#allocation8 + $0xc8] sm:$0xff]  }
  0xd1   : > { %v757_v12 = vpack.c.bf16 %v665_v34, %v664_v45  ;;  %v5579_v34 = vunpack.c.l.bf16 %v4470_v18 }
  0xd3   : > { %v4919_v22 = vsub.f32 %v5579_v34, %v4782_v29  ;;  %v3870_v34 = vld [vmem:[#allocation8 + $0xa0] sm:$0xff]  }
  0xd5   : > { %1069 = vmatmul.mubr.bf16.gmra.mxu0 %v756_v26  ;;  %1222 = vmatmul.mubr.bf16.gmra.mxu1 %v4769_v2  ;;  %v635_v2 = vmul.f32 %v4501_v39, %v4900_v9  ;;  %5580 = vst [vmem:[#allocation61_spill] sm:$0xff] %v4919_v22  ;;  %v636_v61 = vmul.f32 %v4501_v39, %v4919_v22 }
  0xd6   : > { %1078 = vmatprep.mubr.bf16.mxu0 %v5552_v50  ;;  %1231 = vmatprep.mubr.bf16.mxu1 %v5552_v50 }
  0xd7   : > { %v667_v45 = vadd.f32 %v635_v2, %v4889_v20  ;;  %v668_v18 = vadd.f32 %v636_v61, %v4782_v29  ;;  %v3873_v61 = vld [vmem:[#allocation8 + $0x98] sm:$0xff]  }
  0xd9   : > { %v758_v10 = vpack.c.bf16 %v667_v45, %v666_v57  ;;  %v4932_v57 = vld [vmem:[#allocation9 + $0x38] sm:$0xff]   ;;  %v3869_v45 = vld [vmem:[#allocation8 + $0xe0] sm:$0xff]  }
  0xda   : > { %3617 = vmatprep.subr.bf16.mxu0 %v4932_v57  ;;  %3487 = vmatprep.subr.bf16.mxu1 %v3869_v45 }
  0xdb   : > { %3488 = vmatpush3.bf16.msra.mxu1 %v3870_v34 }
  0xdd   : > { %1079 = vmatmul.mubr.bf16.gmra.mxu0 %v757_v12  ;;  %1232 = vmatmul.mubr.bf16.gmra.mxu1 %v4801_v42  ;;  %v637_v42 = vmul.f32 %v4501_v39, %v4911_v62 }
  0xde   : > { %1088 = vmatprep.mubr.bf16.mxu0 %v5552_v50  ;;  %1241 = vmatprep.mubr.bf16.mxu1 %v5552_v50 }
  0xdf   : > { %v669_v2 = vadd.f32 %v637_v42, %v4767_v13  ;;  %v3874_v42 = vld [vmem:[#allocation8 + $0xd0] sm:$0xff]  }
  0xe1   : > { %v759_v39 = vpack.c.bf16 %v669_v2, %v668_v18  ;;  %v3877_v18 = vld [vmem:[#allocation8 + $0x88] sm:$0xff]   ;;  %v3879_v2 = vld [vmem:[#allocation8 + $0x80] sm:$0xff]  }
  0xe5   : > { %1089 = vmatmul.mubr.bf16.gmra.mxu0 %v758_v10  ;;  %1242 = vmatmul.mubr.bf16.gmra.mxu1 %v4828_v49  ;;  %v3872_v49 = vld [vmem:[#allocation8 + $0xd8] sm:$0xff]  }
  0xe6   : > { %1098 = vmatprep.mubr.bf16.mxu0 %v5552_v50  ;;  %1251 = vmatprep.mubr.bf16.mxu1 %v5552_v50 }
  0xe7   : > { %3489 = vmatprep.subr.bf16.mxu1 %v3872_v49 }
  0xe8   : > { %3490 = vmatpush3.bf16.msra.mxu1 %v3873_v61 }
  0xe9   : > { %3491 = vmatprep.subr.bf16.mxu1 %v3874_v42 }
  0xec   : > { %3492 = vmatpush3.bf16.msra.mxu1 %v3875_v16 }
  0xed   : > { %1099 = vmatmul.mubr.bf16.gmra.mxu0 %v759_v39  ;;  %1252 = vmatmul.mubr.bf16.gmra.mxu1 %v755_v47  ;;  %v3878_v47 = vld [vmem:[#allocation8 + $0xc0] sm:$0xff]  }
  0xee   : > { %1261 = vmatprep.mubr.bf16.mxu1 %v5552_v50  ;;  %3493 = vmatprep.subr.bf16.mxu1 %v3876_v19 }
  0xf0   : > { %3494 = vmatpush3.bf16.msra.mxu1 %v3877_v18 }
  0xf1   : > { %3495 = vmatprep.subr.bf16.mxu1 %v3878_v47 }
  0xf4   : > { %3496 = vmatpush3.bf16.msra.mxu1 %v3879_v2 }
  0xf5   : > { %1262 = vmatmul.mubr.bf16.gmra.mxu1 %v756_v26 }
  0xf6   : > { %1271 = vmatprep.mubr.bf16.mxu1 %v5552_v50 }
  0xfd   : > { %1272 = vmatmul.mubr.bf16.gmra.mxu1 %v757_v12 }
  0xfe   : > { %1281 = vmatprep.mubr.bf16.mxu1 %v5552_v50 }
 0x105   : > { %1282 = vmatmul.mubr.bf16.gmra.mxu1 %v758_v10 }
 0x106   : > { %1291 = vmatprep.mubr.bf16.mxu1 %v5552_v50 }
 0x10d   : > { %1292 = vmatmul.mubr.bf16.gmra.mxu1 %v759_v39 }
 0x10e   : > { %1301 = vmatprep.mubr.bf16.mxu1 %v5552_v50 }
 0x115   : > { %1302 = vmatmul.mubr.bf16.gmra.mxu1 %v4579_v46 }
 0x116   : > { %1311 = vmatprep.mubr.bf16.mxu1 %v5552_v50 }
 0x11d   : > { %1312 = vmatmul.mubr.bf16.gmra.mxu1 %v4630_v31 }
 0x11e   : > { %1321 = vmatprep.mubr.bf16.mxu1 %v5552_v50 }
 0x125   : > { %1322 = vmatmul.mubr.bf16.gmra.mxu1 %v4693_v33 }
 0x126   : > { %1331 = vmatprep.mubr.bf16.mxu1 %v5552_v50 }
 0x12d   : > { %1332 = vmatmul.mubr.bf16.gmra.mxu1 %v4732_v36 }
 0x155   : > { %v990_v26 = vpop.f32.mrf.mxu0  ;;  %v1110_v12 = vpop.f32.mrf.mxu1 }
 0x156   : > { %v1438_v10 = vmax.f32 %v1110_v12, 0.0  ;;  %v1342_v16 = vmax.f32 %v990_v26, 0.0 }
 0x157   : > { %v992_v39 = vpop.f32.mrf.mxu0  ;;  %v4947_v45 = vpop.f32.mrf.mxu1 }
 0x158   : > { %v4949_v49 = vmul.f32 %v1438_v10, %v1438_v10  ;;  %v1343_v61 = vmax.f32 %v992_v39, 0.0  ;;  %v1470_v10 = vmul.f32 %v1342_v16, %v1342_v16 }
 0x159   : > { %v994_v34 = vpop.f32.mrf.mxu0  ;;  %v1114_v46 = vpop.f32.mrf.mxu1 }
 0x15a   : > { %v1346_v31 = vmax.f32 %v994_v34, 0.0  ;;  %v1442_v42 = vmax.f32 %v1114_v46, 0.0  ;;  %v1471_v12 = vmul.f32 %v1343_v61, %v1343_v61 }
 0x15b   : > { %v996_v19 = vpop.f32.mrf.mxu0  ;;  %v4951_v33 = vpop.f32.mrf.mxu1 }
 0x15c   : > { %v4953_v50 = vmul.f32 %v1442_v42, %v1442_v42  ;;  %v1347_v36 = vmax.f32 %v996_v19, 0.0  ;;  %v1474_v18 = vmul.f32 %v1346_v31, %v1346_v31  ;;  %v3871_v42 = vld [vmem:[#allocation9 + $0x30] sm:$0xff]  }
 0x15d   : > { %v1000_v47 = vpop.f32.mrf.mxu0  ;;  %v1120_v2 = vpop.f32.mrf.mxu1 }
 0x15e   : > { %v1475_v29 = vmul.f32 %v1347_v36, %v1347_v36  ;;  %v1446_v62 = vmax.f32 %v1120_v2, 0.0  ;;  %v1598_v46 = vpack.c.bf16 %v1474_v18, %v1470_v10  ;;  %v1350_v61 = vmax.f32 %v1000_v47, 0.0 }
 0x15f   : > { %v1002_v39 = vpop.f32.mrf.mxu0  ;;  %v4957_v34 = vpop.f32.mrf.mxu1 }
 0x160   : > { %v1599_v26 = vpack.c.bf16 %v1475_v29, %v1471_v12  ;;  %v4959_v44 = vmul.f32 %v1446_v62, %v1446_v62  ;;  %v1351_v31 = vmax.f32 %v1002_v39, 0.0  ;;  %v3880_v62 = vld [vmem:[#allocation9 + $0x28] sm:$0xff]   ;;  %v1478_v47 = vmul.f32 %v1350_v61, %v1350_v61 }
 0x161   : > { %v1004_v22 = vpop.f32.mrf.mxu0  ;;  %v1124_v20 = vpop.f32.mrf.mxu1 }
 0x162   : > { %v1354_v19 = vmax.f32 %v1004_v22, 0.0  ;;  %v1450_v21 = vmax.f32 %v1124_v20, 0.0  ;;  %1950 = vmatprep.mubr.bf16.mxu0 %v1599_v26  ;;  %v1479_v12 = vmul.f32 %v1351_v31, %v1351_v31 }
 0x163   : > { %v1006_v4 = vpop.f32.mrf.mxu0  ;;  %v4961_v13 = vpop.f32.mrf.mxu1  ;;  %1951 = vmatmul.mubr.bf16.vlgmr.msra.gmra.mxu0 %v1598_v46 }
 0x164   : > { %v4963_v16 = vmul.f32 %v1450_v21, %v1450_v21  ;;  %v1355_v36 = vmax.f32 %v1006_v4, 0.0  ;;  %3618 = vmatpush3.bf16.msra.mxu0 %v4932_v57  ;;  %v1482_v29 = vmul.f32 %v1354_v19, %v1354_v19  ;;  %v3881_v19 = vld [vmem:[#allocation9 + $0x20] sm:$0xff]  }
 0x165   : > { %v1010_v18 = vpop.f32.mrf.mxu0  ;;  %v1130_v2 = vpop.f32.mrf.mxu1  ;;  %3619 = vmatprep.subr.bf16.mxu0 %v3871_v42 }
 0x166   : > { %v1483_v22 = vmul.f32 %v1355_v36, %v1355_v36  ;;  %v1454_v10 = vmax.f32 %v1130_v2, 0.0  ;;  %v1602_v4 = vpack.c.bf16 %v1482_v29, %v1478_v47  ;;  %v1358_v20 = vmax.f32 %v1010_v18, 0.0  ;;  %v3882_v47 = vld [vmem:[#allocation9 + $0x18] sm:$0xff]  }
 0x167   : > { %v1012_v39 = vpop.f32.mrf.mxu0  ;;  %v4968_v26 = vpop.f32.mrf.mxu1 }
 0x168   : > { %v1603_v21 = vpack.c.bf16 %v1483_v22, %v1479_v12  ;;  %3620 = vmatpush3.bf16.msra.mxu0 %v3871_v42  ;;  %v4970_v9 = vmul.f32 %v1454_v10, %v1454_v10  ;;  %v1359_v0 = vmax.f32 %v1012_v39, 0.0 }
 0x169   : > { %v1014_v46 = vpop.f32.mrf.mxu0  ;;  %v1134_v57 = vpop.f32.mrf.mxu1  ;;  %3621 = vmatprep.subr.bf16.mxu0 %v3880_v62 }
 0x16a   : > { %v1362_v31 = vmax.f32 %v1014_v46, 0.0  ;;  %v1458_v58 = vmax.f32 %v1134_v57, 0.0  ;;  %1958 = vmatprep.mubr.bf16.mxu0 %v1603_v21  ;;  %v1487_v10 = vmul.f32 %v1359_v0, %v1359_v0  ;;  %v1486_v21 = vmul.f32 %v1358_v20, %v1358_v20 }
 0x16b   : > { %v1016_v36 = vpop.f32.mrf.mxu0  ;;  %v4972_v61 = vpop.f32.mrf.mxu1  ;;  %1959 = vmatmul.mubr.bf16.gmra.mxu0 %v1602_v4 }
 0x16c   : > { %v4974_v2 = vmul.f32 %v1458_v58, %v1458_v58  ;;  %v1363_v12 = vmax.f32 %v1016_v36, 0.0  ;;  %3622 = vmatpush3.bf16.msra.mxu0 %v3880_v62  ;;  %v1490_v42 = vmul.f32 %v1362_v31, %v1362_v31  ;;  %v3883_v31 = vld [vmem:[#allocation9 + $0x10] sm:$0xff]  }
 0x16d   : > { %v1020_v29 = vpop.f32.mrf.mxu0  ;;  %v1140_v22 = vpop.f32.mrf.mxu1  ;;  %3623 = vmatprep.subr.bf16.mxu0 %v3881_v19 }
 0x16e   : > { %v1491_v46 = vmul.f32 %v1363_v12, %v1363_v12  ;;  %v1462_v18 = vmax.f32 %v1140_v22, 0.0  ;;  %v1606_v58 = vpack.c.bf16 %v1490_v42, %v1486_v21  ;;  %v1366_v39 = vmax.f32 %v1020_v29, 0.0  ;;  %v3884_v21 = vld [vmem:[#allocation9 + $0x8] sm:$0xff]  }
 0x16f   : > { %v1022_v57 = vpop.f32.mrf.mxu0  ;;  %v4978_v63 = vpop.f32.mrf.mxu1 }
 0x170   : > { %v1607_v4 = vpack.c.bf16 %v1491_v46, %v1487_v10  ;;  %3624 = vmatpush3.bf16.msra.mxu0 %v3881_v19  ;;  %v4980_v11 = vmul.f32 %v1462_v18, %v1462_v18  ;;  %v1367_v52 = vmax.f32 %v1022_v57, 0.0 }
 0x171   : > { %v1024_v36 = vpop.f32.mrf.mxu0  ;;  %v1144_v62 = vpop.f32.mrf.mxu1  ;;  %3625 = vmatprep.subr.bf16.mxu0 %v3882_v47 }
 0x172   : > { %v1370_v0 = vmax.f32 %v1024_v36, 0.0  ;;  %v1466_v1 = vmax.f32 %v1144_v62, 0.0  ;;  %1966 = vmatprep.mubr.bf16.mxu0 %v1607_v4  ;;  %v1495_v18 = vmul.f32 %v1367_v52, %v1367_v52  ;;  %v1494_v4 = vmul.f32 %v1366_v39, %v1366_v39 }
 0x173   : > { %v1026_v12 = vpop.f32.mrf.mxu0  ;;  %v4982_v20 = vpop.f32.mrf.mxu1  ;;  %1967 = vmatmul.mubr.bf16.gmra.mxu0 %v1606_v58 }
 0x174   : > { %v4984_v22 = vmul.f32 %v1466_v1, %v1466_v1  ;;  %v1371_v10 = vmax.f32 %v1026_v12, 0.0  ;;  %3626 = vmatpush3.bf16.msra.mxu0 %v3882_v47  ;;  %v1498_v19 = vmul.f32 %v1370_v0, %v1370_v0  ;;  %v3885_v0 = vld [vmem:[#allocation9] sm:$0xff]  }
 0x175   : > { %v1030_v42 = vpop.f32.mrf.mxu0  ;;  %v1183_v46 = vpop.f32.mrf.mxu1  ;;  %3627 = vmatprep.subr.bf16.mxu0 %v3883_v31 }
 0x176   : > { %v1499_v36 = vmul.f32 %v1371_v10, %v1371_v10  ;;  %v1344_v29 = vmax.f32 %v1183_v46, 0.0  ;;  %v1610_v1 = vpack.c.bf16 %v1498_v19, %v1494_v4  ;;  %v1374_v52 = vmax.f32 %v1030_v42, 0.0 }
 0x177   : > { %v1032_v62 = vpop.f32.mrf.mxu0  ;;  %v1185_v40 = vpop.f32.mrf.mxu1 }
 0x178   : > { %v1345_v60 = vmax.f32 %v1185_v40, 0.0  ;;  %v1611_v58 = vpack.c.bf16 %v1499_v36, %v1495_v18  ;;  %3628 = vmatpush3.bf16.msra.mxu0 %v3883_v31  ;;  %v1375_v14 = vmax.f32 %v1032_v62, 0.0  ;;  %v1472_v3 = vmul.f32 %v1344_v29, %v1344_v29 }
 0x179   : > { %v1034_v12 = vpop.f32.mrf.mxu0  ;;  %v1187_v47 = vpop.f32.mrf.mxu1  ;;  %3629 = vmatprep.subr.bf16.mxu0 %v3884_v21 }
 0x17a   : > { %v1378_v55 = vmax.f32 %v1034_v12, 0.0  ;;  %v1348_v6 = vmax.f32 %v1187_v47, 0.0  ;;  %1974 = vmatprep.mubr.bf16.mxu0 %v1611_v58  ;;  %v1473_v39 = vmul.f32 %v1345_v60, %v1345_v60  ;;  %v1503_v36 = vmul.f32 %v1375_v14, %v1375_v14 }
 0x17b   : > { %v1036_v57 = vpop.f32.mrf.mxu0  ;;  %v1189_v10 = vpop.f32.mrf.mxu1  ;;  %1975 = vmatmul.mubr.bf16.gmra.mxu0 %v1610_v1  ;;  %v1502_v12 = vmul.f32 %v1374_v52, %v1374_v52 }
 0x17c   : > { %v1476_v46 = vmul.f32 %v1348_v6, %v1348_v6  ;;  %v1379_v15 = vmax.f32 %v1036_v57, 0.0  ;;  %v1349_v40 = vmax.f32 %v1189_v10, 0.0  ;;  %3630 = vmatpush3.bf16.msra.mxu0 %v3884_v21  ;;  %v1506_v31 = vmul.f32 %v1378_v55, %v1378_v55 }
 0x17d   : > { %v1040_v19 = vpop.f32.mrf.mxu0  ;;  %v1193_v18 = vpop.f32.mrf.mxu1  ;;  %3631 = vmatprep.subr.bf16.mxu0 %v3885_v0 }
 0x17e   : > { %v1507_v4 = vmul.f32 %v1379_v15, %v1379_v15  ;;  %v1477_v62 = vmul.f32 %v1349_v40, %v1349_v40  ;;  %v1600_v47 = vpack.c.bf16 %v1476_v46, %v1472_v3  ;;  %v1352_v58 = vmax.f32 %v1193_v18, 0.0 }
 0x17f   : > { %v1042_v42 = vpop.f32.mrf.mxu0  ;;  %v1195_v29 = vpop.f32.mrf.mxu1  ;;  %v1614_v6 = vpack.c.bf16 %v1506_v31, %v1502_v12  ;;  %v1382_v14 = vmax.f32 %v1040_v19, 0.0 }
 0x180   : > { %v1353_v48 = vmax.f32 %v1195_v29, 0.0  ;;  %v1615_v37 = vpack.c.bf16 %v1507_v4, %v1503_v36  ;;  %v1601_v1 = vpack.c.bf16 %v1477_v62, %v1473_v39  ;;  %3632 = vmatpush3.bf16.msra.mxu0 %v3885_v0  ;;  %v1383_v21 = vmax.f32 %v1042_v42, 0.0 }
 0x181   : > { %v1044_v60 = vpop.f32.mrf.mxu0  ;;  %v1197_v57 = vpop.f32.mrf.mxu1  ;;  %v1480_v15 = vmul.f32 %v1352_v58, %v1352_v58  ;;  %v1510_v42 = vmul.f32 %v1382_v14, %v1382_v14 }
 0x182   : > { %v1386_v55 = vmax.f32 %v1044_v60, 0.0  ;;  %v1356_v10 = vmax.f32 %v1197_v57, 0.0  ;;  %1982 = vmatprep.mubr.bf16.mxu0 %v1615_v37  ;;  %2111 = vmatprep.mubr.bf16.mxu1 %v1601_v1  ;;  %v1481_v3 = vmul.f32 %v1353_v48, %v1353_v48  ;;  %v1511_v4 = vmul.f32 %v1383_v21, %v1383_v21 }
 0x183   : > { %v1046_v40 = vpop.f32.mrf.mxu0  ;;  %v1199_v52 = vpop.f32.mrf.mxu1  ;;  %1983 = vmatmul.mubr.bf16.gmra.mxu0 %v1614_v6  ;;  %2112 = vmatmul.mubr.bf16.vlgmr.msra.gmra.mxu1 %v1600_v47 }
 0x184   : > { %v1484_v46 = vmul.f32 %v1356_v10, %v1356_v10  ;;  %v1387_v18 = vmax.f32 %v1046_v40, 0.0  ;;  %v1357_v36 = vmax.f32 %v1199_v52, 0.0  ;;  %v1514_v39 = vmul.f32 %v1386_v55, %v1386_v55 }
 0x185   : > { %v1050_v0 = vpop.f32.mrf.mxu0  ;;  %v1203_v31 = vpop.f32.mrf.mxu1 }
 0x186   : > { %v1515_v62 = vmul.f32 %v1387_v18, %v1387_v18  ;;  %v1485_v12 = vmul.f32 %v1357_v36, %v1357_v36  ;;  %v1604_v29 = vpack.c.bf16 %v1484_v46, %v1480_v15  ;;  %v1360_v37 = vmax.f32 %v1203_v31, 0.0 }
 0x187   : > { %v1052_v1 = vpop.f32.mrf.mxu0  ;;  %v1205_v19 = vpop.f32.mrf.mxu1  ;;  %v1618_v6 = vpack.c.bf16 %v1514_v39, %v1510_v42  ;;  %v1390_v55 = vmax.f32 %v1050_v0, 0.0 }
 0x188   : > { %v1361_v58 = vmax.f32 %v1205_v19, 0.0  ;;  %v1619_v60 = vpack.c.bf16 %v1515_v62, %v1511_v4  ;;  %v1605_v57 = vpack.c.bf16 %v1485_v12, %v1481_v3  ;;  %v1391_v10 = vmax.f32 %v1052_v1, 0.0 }
 0x189   : > { %v1054_v47 = vpop.f32.mrf.mxu0  ;;  %v1207_v48 = vpop.f32.mrf.mxu1  ;;  %v1488_v21 = vmul.f32 %v1360_v37, %v1360_v37  ;;  %v1518_v1 = vmul.f32 %v1390_v55, %v1390_v55 }
 0x18a   : > { %v1394_v40 = vmax.f32 %v1054_v47, 0.0  ;;  %v1364_v52 = vmax.f32 %v1207_v48, 0.0  ;;  %1990 = vmatprep.mubr.bf16.mxu0 %v1619_v60  ;;  %2119 = vmatprep.mubr.bf16.mxu1 %v1605_v57  ;;  %v1489_v14 = vmul.f32 %v1361_v58, %v1361_v58  ;;  %v1519_v62 = vmul.f32 %v1391_v10, %v1391_v10 }
 0x18b   : > { %v1056_v18 = vpop.f32.mrf.mxu0  ;;  %v1209_v36 = vpop.f32.mrf.mxu1  ;;  %1991 = vmatmul.mubr.bf16.gmra.mxu0 %v1618_v6  ;;  %2120 = vmatmul.mubr.bf16.gmra.mxu1 %v1604_v29 }
 0x18c   : > { %v1492_v15 = vmul.f32 %v1364_v52, %v1364_v52  ;;  %v1395_v46 = vmax.f32 %v1056_v18, 0.0  ;;  %v1365_v31 = vmax.f32 %v1209_v36, 0.0  ;;  %v1522_v4 = vmul.f32 %v1394_v40, %v1394_v40 }
 0x18d   : > { %v1060_v3 = vpop.f32.mrf.mxu0  ;;  %v1213_v39 = vpop.f32.mrf.mxu1 }
 0x18e   : > { %v1523_v12 = vmul.f32 %v1395_v46, %v1395_v46  ;;  %v1493_v42 = vmul.f32 %v1365_v31, %v1365_v31  ;;  %v1608_v19 = vpack.c.bf16 %v1492_v15, %v1488_v21  ;;  %v1368_v60 = vmax.f32 %v1213_v39, 0.0 }
 0x18f   : > { %v1062_v57 = vpop.f32.mrf.mxu0  ;;  %v1215_v0 = vpop.f32.mrf.mxu1  ;;  %v1622_v6 = vpack.c.bf16 %v1522_v4, %v1518_v1  ;;  %v1398_v40 = vmax.f32 %v1060_v3, 0.0 }
 0x190   : > { %v1369_v37 = vmax.f32 %v1215_v0, 0.0  ;;  %v1623_v47 = vpack.c.bf16 %v1523_v12, %v1519_v62  ;;  %v1609_v48 = vpack.c.bf16 %v1493_v42, %v1489_v14  ;;  %v1399_v52 = vmax.f32 %v1062_v57, 0.0 }
 0x191   : > { %v1064_v29 = vpop.f32.mrf.mxu0  ;;  %v1217_v58 = vpop.f32.mrf.mxu1  ;;  %v1496_v10 = vmul.f32 %v1368_v60, %v1368_v60  ;;  %v1526_v57 = vmul.f32 %v1398_v40, %v1398_v40 }
 0x192   : > { %v1402_v18 = vmax.f32 %v1064_v29, 0.0  ;;  %v1372_v36 = vmax.f32 %v1217_v58, 0.0  ;;  %1998 = vmatprep.mubr.bf16.mxu0 %v1623_v47  ;;  %2127 = vmatprep.mubr.bf16.mxu1 %v1609_v48  ;;  %v1497_v55 = vmul.f32 %v1369_v37, %v1369_v37  ;;  %v1527_v12 = vmul.f32 %v1399_v52, %v1399_v52 }
 0x193   : > { %v1066_v46 = vpop.f32.mrf.mxu0  ;;  %v1219_v31 = vpop.f32.mrf.mxu1  ;;  %1999 = vmatmul.mubr.bf16.gmra.mxu0 %v1622_v6  ;;  %2128 = vmatmul.mubr.bf16.gmra.mxu1 %v1608_v19 }
 0x194   : > { %v1500_v21 = vmul.f32 %v1372_v36, %v1372_v36  ;;  %v1403_v15 = vmax.f32 %v1066_v46, 0.0  ;;  %v1373_v39 = vmax.f32 %v1219_v31, 0.0  ;;  %v1530_v62 = vmul.f32 %v1402_v18, %v1402_v18 }
 0x195   : > { %v1070_v14 = vpop.f32.mrf.mxu0  ;;  %v1223_v4 = vpop.f32.mrf.mxu1 }
 0x196   : > { %v1531_v42 = vmul.f32 %v1403_v15, %v1403_v15  ;;  %v1501_v1 = vmul.f32 %v1373_v39, %v1373_v39  ;;  %v1612_v0 = vpack.c.bf16 %v1500_v21, %v1496_v10  ;;  %v1376_v47 = vmax.f32 %v1223_v4, 0.0 }
 0x197   : > { %v1072_v48 = vpop.f32.mrf.mxu0  ;;  %v1225_v3 = vpop.f32.mrf.mxu1  ;;  %v1626_v6 = vpack.c.bf16 %v1530_v62, %v1526_v57  ;;  %v1406_v18 = vmax.f32 %v1070_v14, 0.0 }
 0x198   : > { %v1377_v60 = vmax.f32 %v1225_v3, 0.0  ;;  %v1627_v29 = vpack.c.bf16 %v1531_v42, %v1527_v12  ;;  %v1613_v58 = vpack.c.bf16 %v1501_v1, %v1497_v55  ;;  %v1407_v36 = vmax.f32 %v1072_v48, 0.0 }
 0x199   : > { %v1074_v19 = vpop.f32.mrf.mxu0  ;;  %v1227_v37 = vpop.f32.mrf.mxu1  ;;  %v1504_v52 = vmul.f32 %v1376_v47, %v1376_v47  ;;  %v1534_v48 = vmul.f32 %v1406_v18, %v1406_v18 }
 0x19a   : > { %v1410_v46 = vmax.f32 %v1074_v19, 0.0  ;;  %v1380_v31 = vmax.f32 %v1227_v37, 0.0  ;;  %2006 = vmatprep.mubr.bf16.mxu0 %v1627_v29  ;;  %2135 = vmatprep.mubr.bf16.mxu1 %v1613_v58  ;;  %v1505_v40 = vmul.f32 %v1377_v60, %v1377_v60  ;;  %v1535_v42 = vmul.f32 %v1407_v36, %v1407_v36 }
 0x19b   : > { %v1076_v15 = vpop.f32.mrf.mxu0  ;;  %v1229_v39 = vpop.f32.mrf.mxu1  ;;  %2007 = vmatmul.mubr.bf16.gmra.mxu0 %v1626_v6  ;;  %2136 = vmatmul.mubr.bf16.gmra.mxu1 %v1612_v0 }
 0x19c   : > { %v1508_v10 = vmul.f32 %v1380_v31, %v1380_v31  ;;  %v1411_v21 = vmax.f32 %v1076_v15, 0.0  ;;  %v1381_v4 = vmax.f32 %v1229_v39, 0.0  ;;  %v1538_v12 = vmul.f32 %v1410_v46, %v1410_v46 }
 0x19d   : > { %v1080_v55 = vpop.f32.mrf.mxu0  ;;  %v1233_v62 = vpop.f32.mrf.mxu1 }
 0x19e   : > { %v1539_v1 = vmul.f32 %v1411_v21, %v1411_v21  ;;  %v1509_v57 = vmul.f32 %v1381_v4, %v1381_v4  ;;  %v1616_v3 = vpack.c.bf16 %v1508_v10, %v1504_v52  ;;  %v1384_v29 = vmax.f32 %v1233_v62, 0.0 }
 0x19f   : > { %v1082_v58 = vpop.f32.mrf.mxu0  ;;  %v1235_v14 = vpop.f32.mrf.mxu1  ;;  %v1630_v6 = vpack.c.bf16 %v1538_v12, %v1534_v48  ;;  %v1414_v46 = vmax.f32 %v1080_v55, 0.0 }
 0x1a0   : > { %v1631_v47 = vpack.c.bf16 %v1539_v1, %v1535_v42  ;;  %v1617_v19 = vpack.c.bf16 %v1509_v57, %v1505_v40  ;;  %v1385_v37 = vmax.f32 %v1235_v14, 0.0  ;;  %v1415_v31 = vmax.f32 %v1082_v58, 0.0 }
 0x1a1   : > { %v1084_v0 = vpop.f32.mrf.mxu0  ;;  %v1237_v60 = vpop.f32.mrf.mxu1  ;;  %v1512_v36 = vmul.f32 %v1384_v29, %v1384_v29  ;;  %v1542_v58 = vmul.f32 %v1414_v46, %v1414_v46 }
 0x1a2   : > { %v1418_v15 = vmax.f32 %v1084_v0, 0.0  ;;  %v1388_v39 = vmax.f32 %v1237_v60, 0.0  ;;  %2014 = vmatprep.mubr.bf16.mxu0 %v1631_v47  ;;  %2143 = vmatprep.mubr.bf16.mxu1 %v1617_v19  ;;  %v1513_v18 = vmul.f32 %v1385_v37, %v1385_v37  ;;  %v1543_v1 = vmul.f32 %v1415_v31, %v1415_v31 }
 0x1a3   : > { %v1086_v21 = vpop.f32.mrf.mxu0  ;;  %v1239_v4 = vpop.f32.mrf.mxu1  ;;  %2015 = vmatmul.mubr.bf16.gmra.mxu0 %v1630_v6  ;;  %2144 = vmatmul.mubr.bf16.gmra.mxu1 %v1616_v3 }
 0x1a4   : > { %v1516_v52 = vmul.f32 %v1388_v39, %v1388_v39  ;;  %v1419_v10 = vmax.f32 %v1086_v21, 0.0  ;;  %v1389_v62 = vmax.f32 %v1239_v4, 0.0  ;;  %v1546_v40 = vmul.f32 %v1418_v15, %v1418_v15 }
 0x1a5   : > { %v1090_v42 = vpop.f32.mrf.mxu0  ;;  %v1243_v12 = vpop.f32.mrf.mxu1 }
 0x1a6   : > { %v1547_v57 = vmul.f32 %v1419_v10, %v1419_v10  ;;  %v1517_v48 = vmul.f32 %v1389_v62, %v1389_v62  ;;  %v1620_v14 = vpack.c.bf16 %v1516_v52, %v1512_v36  ;;  %v1392_v47 = vmax.f32 %v1243_v12, 0.0 }
 0x1a7   : > { %v1092_v19 = vpop.f32.mrf.mxu0  ;;  %v1245_v55 = vpop.f32.mrf.mxu1  ;;  %v1634_v6 = vpack.c.bf16 %v1546_v40, %v1542_v58  ;;  %v1422_v15 = vmax.f32 %v1090_v42, 0.0 }
 0x1a8   : > { %v1635_v29 = vpack.c.bf16 %v1547_v57, %v1543_v1  ;;  %v1621_v0 = vpack.c.bf16 %v1517_v48, %v1513_v18  ;;  %v1393_v60 = vmax.f32 %v1245_v55, 0.0  ;;  %v1423_v39 = vmax.f32 %v1092_v19, 0.0 }
 0x1a9   : > { %v1094_v3 = vpop.f32.mrf.mxu0  ;;  %v1247_v37 = vpop.f32.mrf.mxu1  ;;  %v1520_v31 = vmul.f32 %v1392_v47, %v1392_v47  ;;  %v1550_v19 = vmul.f32 %v1422_v15, %v1422_v15 }
 0x1aa   : > { %v1426_v21 = vmax.f32 %v1094_v3, 0.0  ;;  %v1396_v4 = vmax.f32 %v1247_v37, 0.0  ;;  %2022 = vmatprep.mubr.bf16.mxu0 %v1635_v29  ;;  %2151 = vmatprep.mubr.bf16.mxu1 %v1621_v0  ;;  %v1521_v46 = vmul.f32 %v1393_v60, %v1393_v60  ;;  %v1551_v57 = vmul.f32 %v1423_v39, %v1423_v39 }
 0x1ab   : > { %v1096_v10 = vpop.f32.mrf.mxu0  ;;  %v1249_v62 = vpop.f32.mrf.mxu1  ;;  %2023 = vmatmul.mubr.bf16.gmra.mxu0 %v1634_v6  ;;  %2152 = vmatmul.mubr.bf16.gmra.mxu1 %v1620_v14  ;;  %v1439_v14 = vmax.f32 %v4947_v45, 0.0 }
 0x1ac   : > { %v1524_v36 = vmul.f32 %v1396_v4, %v1396_v4  ;;  %v1427_v52 = vmax.f32 %v1096_v10, 0.0  ;;  %v1397_v12 = vmax.f32 %v1249_v62, 0.0  ;;  %v1554_v18 = vmul.f32 %v1426_v21, %v1426_v21 }
 0x1ad   : > { %v1100_v1 = vpop.f32.mrf.mxu0  ;;  %v1253_v40 = vpop.f32.mrf.mxu1  ;;  %v1443_v21 = vmax.f32 %v4951_v33, 0.0 }
 0x1ae   : > { %v1555_v48 = vmul.f32 %v1427_v52, %v1427_v52  ;;  %v1525_v58 = vmul.f32 %v1397_v12, %v1397_v12  ;;  %v1624_v55 = vpack.c.bf16 %v1524_v36, %v1520_v31  ;;  %v1400_v29 = vmax.f32 %v1253_v40, 0.0 }
 0x1af   : > { %v1102_v0 = vpop.f32.mrf.mxu0  ;;  %v1255_v42 = vpop.f32.mrf.mxu1  ;;  %v1638_v60 = vpack.c.bf16 %v1554_v18, %v1550_v19  ;;  %v1430_v15 = vmax.f32 %v1100_v1, 0.0  ;;  %v1567_v18 = vmul.f32 %v1439_v14, %v1439_v14 }
 0x1b0   : > { %v1639_v47 = vpack.c.bf16 %v1555_v48, %v1551_v57  ;;  %v1625_v3 = vpack.c.bf16 %v1525_v58, %v1521_v46  ;;  %v1401_v37 = vmax.f32 %v1255_v42, 0.0  ;;  %v1431_v10 = vmax.f32 %v1102_v0, 0.0 }
 0x1b1   : > { %v1104_v6 = vpop.f32.mrf.mxu0  ;;  %v1257_v4 = vpop.f32.mrf.mxu1  ;;  %v1528_v31 = vmul.f32 %v1400_v29, %v1400_v29  ;;  %v1571_v58 = vmul.f32 %v1443_v21, %v1443_v21  ;;  %v1558_v42 = vmul.f32 %v1430_v15, %v1430_v15 }
 0x1b2   : > { %v1434_v62 = vmax.f32 %v1104_v6, 0.0  ;;  %v1404_v39 = vmax.f32 %v1257_v4, 0.0  ;;  %2030 = vmatprep.mubr.bf16.mxu0 %v1639_v47  ;;  %2159 = vmatprep.mubr.bf16.mxu1 %v1625_v3  ;;  %v1529_v46 = vmul.f32 %v1401_v37, %v1401_v37  ;;  %v1559_v33 = vmul.f32 %v1431_v10, %v1431_v10 }
 0x1b3   : > { %v1106_v36 = vpop.f32.mrf.mxu0  ;;  %v1259_v52 = vpop.f32.mrf.mxu1  ;;  %2031 = vmatmul.mubr.bf16.gmra.mxu0 %v1638_v60  ;;  %2160 = vmatmul.mubr.bf16.gmra.mxu1 %v1624_v55  ;;  %v1447_v37 = vmax.f32 %v4957_v34, 0.0  ;;  %v1647_v21 = vpack.c.bf16 %v1571_v58, %v1567_v18  ;;  %v1455_v18 = vmax.f32 %v4968_v26, 0.0  ;;  %v1459_v58 = vmax.f32 %v4972_v61, 0.0 }
 0x1b4   : > { %v1532_v12 = vmul.f32 %v1404_v39, %v1404_v39  ;;  %v1435_v40 = vmax.f32 %v1106_v36, 0.0  ;;  %v1405_v45 = vmax.f32 %v1259_v52, 0.0  ;;  %v1562_v57 = vmul.f32 %v1434_v62, %v1434_v62 }
 0x1b5   : > { %v1263_v48 = vpop.f32.mrf.mxu1  ;;  %v1451_v39 = vmax.f32 %v4961_v13, 0.0 }
 0x1b6   : > { %v1563_v19 = vmul.f32 %v1435_v40, %v1435_v40  ;;  %v1533_v0 = vmul.f32 %v1405_v45, %v1405_v45  ;;  %v1628_v47 = vpack.c.bf16 %v1532_v12, %v1528_v31  ;;  %v1408_v3 = vmax.f32 %v1263_v48, 0.0 }
 0x1b7   : > { %v1265_v1 = vpop.f32.mrf.mxu1  ;;  %v1642_v60 = vpack.c.bf16 %v1562_v57, %v1558_v42  ;;  %v1579_v12 = vmul.f32 %v1451_v39, %v1451_v39 }
 0x1b8   : > { %v1643_v29 = vpack.c.bf16 %v1563_v19, %v1559_v33  ;;  %v1629_v6 = vpack.c.bf16 %v1533_v0, %v1529_v46  ;;  %v1409_v4 = vmax.f32 %v1265_v1, 0.0  ;;  %v1536_v10 = vmul.f32 %v1408_v3, %v1408_v3 }
 0x1b9   : > { %v1267_v55 = vpop.f32.mrf.mxu1  ;;  %v1575_v46 = vmul.f32 %v1447_v37, %v1447_v37  ;;  %v5581_v3 = vpack.c.bf16 %v4953_v50, %v4949_v49  ;;  %v1467_v49 = vmax.f32 %v4982_v20, 0.0 }
 0x1ba   : > { %v1412_v14 = vmax.f32 %v1267_v55, 0.0  ;;  %2038 = vmatprep.mubr.bf16.mxu0 %v1643_v29  ;;  %2167 = vmatprep.mubr.bf16.mxu1 %v1629_v6  ;;  %v1537_v15 = vmul.f32 %v1409_v4, %v1409_v4  ;;  %v1587_v55 = vmul.f32 %v1459_v58, %v1459_v58 }
 0x1bb   : > { %v1269_v62 = vpop.f32.mrf.mxu1  ;;  %2039 = vmatmul.mubr.bf16.gmra.mxu0 %v1642_v60  ;;  %2168 = vmatmul.mubr.bf16.gmra.mxu1 %v1628_v47  ;;  %v1651_v0 = vpack.c.bf16 %v1579_v12, %v1575_v46  ;;  %v1583_v60 = vmul.f32 %v1455_v18, %v1455_v18 }
 0x1bc   : > { %v1540_v31 = vmul.f32 %v1412_v14, %v1412_v14  ;;  %v1413_v36 = vmax.f32 %v1269_v62, 0.0  ;;  %2046 = vmatprep.mubr.bf16.mxu0 %v1647_v21  ;;  %v1463_v62 = vmax.f32 %v4978_v63, 0.0 }
 0x1bd   : > { %v1273_v52 = vpop.f32.mrf.mxu1 }
 0x1be   : > { %v1541_v40 = vmul.f32 %v1413_v36, %v1413_v36  ;;  %v1632_v45 = vpack.c.bf16 %v1540_v31, %v1536_v10  ;;  %v1416_v34 = vmax.f32 %v1273_v52, 0.0  ;;  %v5582_v52 = vpack.c.bf16 %v4963_v16, %v4959_v44 }
 0x1bf   : > { %v1275_v57 = vpop.f32.mrf.mxu1 }
 0x1c0   : > { %v1633_v13 = vpack.c.bf16 %v1541_v40, %v1537_v15  ;;  %v1417_v48 = vmax.f32 %v1275_v57, 0.0  ;;  %v1544_v42 = vmul.f32 %v1416_v34, %v1416_v34  ;;  %v1655_v15 = vpack.c.bf16 %v1587_v55, %v1583_v60 }
 0x1c1   : > { %v1277_v33 = vpop.f32.mrf.mxu1  ;;  %v1591_v34 = vmul.f32 %v1463_v62, %v1463_v62  ;;  %v1595_v57 = vmul.f32 %v1467_v49, %v1467_v49 }
 0x1c2   : > { %v1420_v19 = vmax.f32 %v1277_v33, 0.0  ;;  %2175 = vmatprep.mubr.bf16.mxu1 %v1633_v13  ;;  %v1545_v1 = vmul.f32 %v1417_v48, %v1417_v48  ;;  %v5005_v33 = vld [vmem:[%s5449_s2] ss:$0 sm:$0xff] }
 0x1c3   : > { %v1279_v47 = vpop.f32.mrf.mxu1  ;;  %2047 = vmatmul.mubr.bf16.gmra.mxu0 %v5581_v3  ;;  %2176 = vmatmul.mubr.bf16.gmra.mxu1 %v1632_v45  ;;  %v684_v44 = vmul.f32 %v5005_v33, %v4509_v43  ;;  %v685_v58 = vmul.f32 %v5005_v33, %v4492_v35 }
 0x1c4   : > { %v1548_v29 = vmul.f32 %v1420_v19, %v1420_v19  ;;  %v1421_v6 = vmax.f32 %v1279_v47, 0.0  ;;  %2054 = vmatprep.mubr.bf16.mxu0 %v1651_v0 }
 0x1c5   : > { %v1283_v4 = vpop.f32.mrf.mxu1  ;;  %v717_v60 = vadd.f32 %v685_v58, %v4479_v28  ;;  %v5584_v28 = vpack.c.bf16 %v4984_v22, %v4980_v11  ;;  %v691_v11 = vmul.f32 %v5005_v33, %v4666_v25  ;;  %v5585_v25 = vpack.c.bf16 %v4567_v30, %v4565_v27 }
 0x1c6   : > { %v1549_v26 = vmul.f32 %v1421_v6, %v1421_v6  ;;  %v1636_v37 = vpack.c.bf16 %v1548_v29, %v1544_v42  ;;  %v1424_v61 = vmax.f32 %v1283_v4, 0.0  ;;  %v1659_v42 = vpack.c.bf16 %v1595_v57, %v1591_v34 }
 0x1c7   : > { %v1285_v39 = vpop.f32.mrf.mxu1  ;;  %v716_v29 = vadd.f32 %v684_v44, %v4496_v38  ;;  %v689_v38 = vmul.f32 %v5005_v33, %v4607_v8 }
 0x1c8   : > { %v1637_v14 = vpack.c.bf16 %v1549_v26, %v1545_v1  ;;  %v1425_v21 = vmax.f32 %v1285_v39, 0.0  ;;  %v1552_v31 = vmul.f32 %v1424_v61, %v1424_v61  ;;  %v5583_v1 = vpack.c.bf16 %v4974_v2, %v4970_v9 }
 0x1c9   : > { %v1287_v10 = vpop.f32.mrf.mxu1  ;;  %v688_v39 = vmul.f32 %v5005_v33, %v4599_v59  ;;  %v2240_v2 = vpack.c.bf16 %v717_v60, %v716_v29 }
 0x1ca   : > { %v1428_v50 = vmax.f32 %v1287_v10, 0.0  ;;  %2183 = vmatprep.mubr.bf16.mxu1 %v1637_v14  ;;  %v1553_v46 = vmul.f32 %v1425_v21, %v1425_v21 }
 0x1cb   : > { %v1289_v36 = vpop.f32.mrf.mxu1  ;;  %2055 = vmatmul.mubr.bf16.gmra.mxu0 %v5582_v52  ;;  %2184 = vmatmul.mubr.bf16.gmra.mxu1 %v1636_v37 }
 0x1cc   : > { %v1556_v12 = vmul.f32 %v1428_v50, %v1428_v50  ;;  %v1429_v40 = vmax.f32 %v1289_v36, 0.0  ;;  %2062 = vmatprep.mubr.bf16.mxu0 %v1655_v15  ;;  %v720_v50 = vadd.f32 %v688_v39, %v4585_v51  ;;  %v721_v36 = vadd.f32 %v689_v38, %v4589_v54  ;;  %v5591_v38 = vld [vmem:[#allocation41_spill] sm:$0xff] }
 0x1cd   : > { %v1293_v45 = vpop.f32.mrf.mxu1  ;;  %v692_v51 = vmul.f32 %v5005_v33, %v4707_v5  ;;  %v693_v54 = vmul.f32 %v5005_v33, %v4710_v23  ;;  %v723_v5 = vadd.f32 %v691_v11, %v4638_v41  ;;  %v5595_v11 = vld [vmem:[#allocation51_spill] sm:$0xff] }
 0x1ce   : > { %v1557_v63 = vmul.f32 %v1429_v40, %v1429_v40  ;;  %v1640_v13 = vpack.c.bf16 %v1556_v12, %v1552_v31  ;;  %v1432_v20 = vmax.f32 %v1293_v45, 0.0  ;;  %v2242_v57 = vpack.c.bf16 %v721_v36, %v720_v50  ;;  %v5593_v36 = vld [vmem:[#allocation47_spill] sm:$0xff] }
 0x1cf   : > { %v1295_v48 = vpop.f32.mrf.mxu1  ;;  %v724_v44 = vadd.f32 %v692_v51, %v4691_v17  ;;  %v725_v23 = vadd.f32 %v693_v54, %v4701_v32  ;;  %v701_v51 = vmul.f32 %v5005_v33, %v5595_v11 }
 0x1d0   : > { %v1641_v16 = vpack.c.bf16 %v1557_v63, %v1553_v46  ;;  %v1433_v18 = vmax.f32 %v1295_v48, 0.0  ;;  %v1560_v47 = vmul.f32 %v1432_v20, %v1432_v20  ;;  %v690_v46 = vmul.f32 %v5005_v33, %v4663_v7 }
 0x1d1   : > { %v1297_v19 = vpop.f32.mrf.mxu1 }
 0x1d2   : > { %v1436_v0 = vmax.f32 %v1297_v19, 0.0  ;;  %2191 = vmatprep.mubr.bf16.mxu1 %v1641_v16  ;;  %v1561_v6 = vmul.f32 %v1433_v18, %v1433_v18  ;;  %v722_v7 = vadd.f32 %v690_v46, %v4644_v53  ;;  %v694_v53 = vmul.f32 %v5005_v33, %v4752_v24  ;;  %v5588_v24 = vld [vmem:[#allocation37_spill] sm:$0xff] }
 0x1d3   : > { %v1299_v3 = vpop.f32.mrf.mxu1  ;;  %2063 = vmatmul.mubr.bf16.gmra.mxu0 %v5583_v1  ;;  %2192 = vmatmul.mubr.bf16.gmra.mxu1 %v1640_v13 }
 0x1d4   : > { %v1564_v43 = vmul.f32 %v1436_v0, %v1436_v0  ;;  %v1437_v4 = vmax.f32 %v1299_v3, 0.0  ;;  %2070 = vmatprep.mubr.bf16.mxu0 %v1659_v42  ;;  %v695_v42 = vmul.f32 %v5005_v33, %v4755_v56  ;;  %v2243_v41 = vpack.c.bf16 %v723_v5, %v722_v7  ;;  %v5586_v3 = vld [vmem:[#allocation42_spill] sm:$0xff]  ;;  %v5597_v7 = vld [vmem:[#allocation45_spill] sm:$0xff] }
 0x1d5   : > { %v1303_v35 = vpop.f32.mrf.mxu1  ;;  %v696_v17 = vmul.f32 %v5005_v33, %v5586_v3  ;;  %v5602_v3 = vld [vmem:[#allocation58_spill] sm:$0xff] }
 0x1d6   : > { %v1565_v55 = vmul.f32 %v1437_v4, %v1437_v4  ;;  %v1644_v26 = vpack.c.bf16 %v1564_v43, %v1560_v47  ;;  %v1440_v37 = vmax.f32 %v1303_v35, 0.0  ;;  %v5587_v43 = vld [vmem:[#allocation43_spill] sm:$0xff]  ;;  %v726_v35 = vadd.f32 %v694_v53, %v5588_v24  ;;  %v5600_v53 = vld [vmem:[#allocation54_spill] sm:$0xff] }
 0x1d7   : > { %v1305_v61 = vpop.f32.mrf.mxu1  ;;  %v697_v32 = vmul.f32 %v5005_v33, %v5587_v43 }
 0x1d8   : > { %v1645_v14 = vpack.c.bf16 %v1565_v55, %v1561_v6  ;;  %v1441_v9 = vmax.f32 %v1305_v61, 0.0  ;;  %v1568_v62 = vmul.f32 %v1440_v37, %v1440_v37  ;;  %v2244_v6 = vpack.c.bf16 %v725_v23, %v724_v44  ;;  %v5589_v55 = vld [vmem:[#allocation36_spill] sm:$0xff]  ;;  %v5590_v61 = vld [vmem:[#allocation39_spill] sm:$0xff] }
 0x1d9   : > { %v1307_v21 = vpop.f32.mrf.mxu1  ;;  %v727_v56 = vadd.f32 %v695_v42, %v5589_v55  ;;  %v728_v39 = vadd.f32 %v696_v17, %v5590_v61  ;;  %v702_v42 = vmul.f32 %v5005_v33, %v5600_v53  ;;  %v704_v17 = vmul.f32 %v5005_v33, %v5602_v3  ;;  %v5609_v61 = vld [vmem:[#allocation60_spill] sm:$0xff] }
 0x1da   : > { %v1444_v10 = vmax.f32 %v1307_v21, 0.0  ;;  %2199 = vmatprep.mubr.bf16.mxu1 %v1645_v14  ;;  %v1569_v15 = vmul.f32 %v1441_v9, %v1441_v9  ;;  %v729_v21 = vadd.f32 %v697_v32, %v5591_v38  ;;  %v5605_v32 = vld [vmem:[#allocation52_spill] sm:$0xff]  ;;  %v5611_v38 = vld [vmem:[#allocation23_spill] sm:$0xff] }
 0x1db   : > { %v1309_v49 = vpop.f32.mrf.mxu1  ;;  %2071 = vmatmul.mubr.bf16.gmra.mxu0 %v5584_v28  ;;  %2200 = vmatmul.mubr.bf16.gmra.mxu1 %v1644_v26  ;;  %v5592_v28 = vld [vmem:[#allocation46_spill] sm:$0xff] }
 0x1dc   : > { %v1572_v59 = vmul.f32 %v1444_v10, %v1444_v10  ;;  %v1445_v31 = vmax.f32 %v1309_v49, 0.0  ;;  %3633 = vmatprep.mubr.bf16.mxu0 %v2240_v2  ;;  %v2245_v49 = vpack.c.bf16 %v727_v56, %v726_v35  ;;  %v698_v50 = vmul.f32 %v5005_v33, %v5592_v28  ;;  %v5607_v35 = vld [vmem:[#allocation57_spill] sm:$0xff] }
 0x1dd   : > { %v1313_v52 = vpop.f32.mrf.mxu1 }
 0x1de   : > { %v1573_v8 = vmul.f32 %v1445_v31, %v1445_v31  ;;  %v1648_v12 = vpack.c.bf16 %v1572_v59, %v1568_v62  ;;  %v1448_v40 = vmax.f32 %v1313_v52, 0.0  ;;  %v699_v52 = vmul.f32 %v5005_v33, %v5593_v36 }
 0x1df   : > { %v1315_v45 = vpop.f32.mrf.mxu1 }
 0x1e0   : > { %v1649_v22 = vpack.c.bf16 %v1573_v8, %v1569_v15  ;;  %v1449_v34 = vmax.f32 %v1315_v45, 0.0  ;;  %v1576_v20 = vmul.f32 %v1448_v40, %v1448_v40  ;;  %v5594_v8 = vld [vmem:[#allocation50_spill] sm:$0xff]  ;;  %v2246_v45 = vpack.c.bf16 %v729_v21, %v728_v39 }
 0x1e1   : > { %v1317_v63 = vpop.f32.mrf.mxu1  ;;  %v700_v46 = vmul.f32 %v5005_v33, %v5594_v8  ;;  %v707_v39 = vmul.f32 %v5005_v33, %v5609_v61  ;;  %v709_v21 = vmul.f32 %v5005_v33, %v5611_v38 }
 0x1e2   : > { %v1452_v13 = vmax.f32 %v1317_v63, 0.0  ;;  %2207 = vmatprep.mubr.bf16.mxu1 %v1649_v22  ;;  %v1577_v16 = vmul.f32 %v1449_v34, %v1449_v34 }
 0x1e3   : > { %v1319_v48 = vpop.f32.mrf.mxu1  ;;  %2208 = vmatmul.mubr.bf16.gmra.mxu1 %v1648_v12  ;;  %3634 = vmatmul.mubr.bf16.vlgmr.msra.gmra.mxu0 %v5585_v25 }
 0x1e4   : > { %v1580_v18 = vmul.f32 %v1452_v13, %v1452_v13  ;;  %v1453_v58 = vmax.f32 %v1319_v48, 0.0  ;;  %3637 = vmatprep.mubr.bf16.mxu0 %v2242_v57  ;;  %v5596_v57 = vld [vmem:[#allocation44_spill] sm:$0xff] }
 0x1e5   : > { %v1323_v19 = vpop.f32.mrf.mxu1  ;;  %v730_v54 = vadd.f32 %v698_v50, %v5596_v57  ;;  %v5598_v48 = vld [vmem:[#allocation48_spill] sm:$0xff] }
 0x1e6   : > { %v1581_v0 = vmul.f32 %v1453_v58, %v1453_v58  ;;  %v1652_v27 = vpack.c.bf16 %v1580_v18, %v1576_v20  ;;  %v1456_v30 = vmax.f32 %v1323_v19, 0.0  ;;  %v731_v20 = vadd.f32 %v699_v52, %v5597_v7  ;;  %v5599_v18 = vld [vmem:[#allocation49_spill] sm:$0xff]  ;;  %v5614_v50 = vld [vmem:[#allocation20_spill] sm:$0xff]  ;;  %v5616_v52 = vld [vmem:[#allocation26_spill] sm:$0xff] }
 0x1e7   : > { %v1325_v47 = vpop.f32.mrf.mxu1  ;;  %v732_v25 = vadd.f32 %v700_v46, %v5598_v48  ;;  %v733_v58 = vadd.f32 %v701_v51, %v5599_v18  ;;  %v710_v8 = vmul.f32 %v5005_v33, %v5616_v52  ;;  %v5617_v46 = vld [vmem:[#allocation27_spill] sm:$0xff] }
 0x1e8   : > { %v1653_v1 = vpack.c.bf16 %v1581_v0, %v1577_v16  ;;  %v1457_v29 = vmax.f32 %v1325_v47, 0.0  ;;  %v1584_v26 = vmul.f32 %v1456_v30, %v1456_v30  ;;  %v2247_v0 = vpack.c.bf16 %v731_v20, %v730_v54  ;;  %v5619_v51 = vld [vmem:[#allocation31_spill] sm:$0xff]  ;;  %v5621_v54 = vld [vmem:[#allocation24_spill] sm:$0xff]  ;;  %v5623_v20 = vld [vmem:[#allocation30_spill] sm:$0xff] }
 0x1e9   : > { %v1327_v4 = vpop.f32.mrf.mxu1 }
 0x1ea   : > { %v1460_v60 = vmax.f32 %v1327_v4, 0.0  ;;  %2215 = vmatprep.mubr.bf16.mxu1 %v1653_v1  ;;  %v1585_v14 = vmul.f32 %v1457_v29, %v1457_v29  ;;  %v5603_v1 = vld [vmem:[#allocation59_spill] sm:$0xff] }
 0x1eb   : > { %v1329_v37 = vpop.f32.mrf.mxu1  ;;  %2216 = vmatmul.mubr.bf16.gmra.mxu1 %v1652_v27  ;;  %3638 = vmatmul.mubr.bf16.gmra.mxu0 %v2243_v41  ;;  %v5601_v27 = vld [vmem:[#allocation55_spill] sm:$0xff]  ;;  %v2248_v41 = vpack.c.bf16 %v733_v58, %v732_v25  ;;  %v705_v29 = vmul.f32 %v5005_v33, %v5603_v1 }
 0x1ec   : > { %v1588_v9 = vmul.f32 %v1460_v60, %v1460_v60  ;;  %v1461_v2 = vmax.f32 %v1329_v37, 0.0  ;;  %3641 = vmatprep.mubr.bf16.mxu0 %v2244_v6  ;;  %v703_v30 = vmul.f32 %v5005_v33, %v5601_v27  ;;  %v5604_v6 = vld [vmem:[#allocation53_spill] sm:$0xff]  ;;  %v5606_v60 = vld [vmem:[#allocation56_spill] sm:$0xff] }
 0x1ed   : > { %v1333_v10 = vpop.f32.mrf.mxu1  ;;  %v734_v43 = vadd.f32 %v702_v42, %v5604_v6  ;;  %v736_v24 = vadd.f32 %v704_v17, %v5606_v60  ;;  %v737_v55 = vadd.f32 %v705_v29, %v5607_v35 }
 0x1ee   : > { %v1589_v62 = vmul.f32 %v1461_v2, %v1461_v2  ;;  %v1656_v15 = vpack.c.bf16 %v1588_v9, %v1584_v26  ;;  %v1464_v59 = vmax.f32 %v1333_v10, 0.0  ;;  %v735_v4 = vadd.f32 %v703_v30, %v5605_v32  ;;  %v5608_v26 = vld [vmem:[#allocation61_spill] sm:$0xff]  ;;  %v5610_v9 = vld [vmem:[#allocation22_spill] sm:$0xff]  ;;  %v5612_v10 = vld [vmem:[#allocation40_spill] sm:$0xff] }
 0x1ef   : > { %v1335_v31 = vpop.f32.mrf.mxu1  ;;  %v706_v37 = vmul.f32 %v5005_v33, %v5608_v26  ;;  %v708_v2 = vmul.f32 %v5005_v33, %v5610_v9 }
 0x1f0   : > { %v1657_v12 = vpack.c.bf16 %v1589_v62, %v1585_v14  ;;  %v1465_v40 = vmax.f32 %v1335_v31, 0.0  ;;  %v1592_v63 = vmul.f32 %v1464_v59, %v1464_v59  ;;  %v2249_v56 = vpack.c.bf16 %v735_v4, %v734_v43  ;;  %v5615_v59 = vld [vmem:[#allocation21_spill] sm:$0xff] }
 0x1f1   : > { %v1337_v22 = vpop.f32.mrf.mxu1  ;;  %v2250_v14 = vpack.c.bf16 %v737_v55, %v736_v24  ;;  %v738_v62 = vadd.f32 %v706_v37, %v5612_v10  ;;  %v741_v31 = vadd.f32 %v709_v21, %v5615_v59 }
 0x1f2   : > { %v1468_v34 = vmax.f32 %v1337_v22, 0.0  ;;  %2223 = vmatprep.mubr.bf16.mxu1 %v1657_v12  ;;  %v1593_v5 = vmul.f32 %v1465_v40, %v1465_v40  ;;  %v711_v12 = vmul.f32 %v5005_v33, %v5617_v46  ;;  %v713_v22 = vmul.f32 %v5005_v33, %v5619_v51 }
 0x1f3   : > { %v1339_v13 = vpop.f32.mrf.mxu1  ;;  %2224 = vmatmul.mubr.bf16.gmra.mxu1 %v1656_v15  ;;  %3642 = vmatmul.mubr.bf16.gmra.mxu0 %v2245_v49  ;;  %v5613_v49 = vld [vmem:[#allocation38_spill] sm:$0xff]  ;;  %v740_v15 = vadd.f32 %v708_v2, %v5614_v50 }
 0x1f4   : > { %v1596_v44 = vmul.f32 %v1468_v34, %v1468_v34  ;;  %v1469_v16 = vmax.f32 %v1339_v13, 0.0  ;;  %3645 = vmatprep.mubr.bf16.mxu0 %v2246_v45  ;;  %v739_v28 = vadd.f32 %v707_v39, %v5613_v49  ;;  %v5618_v45 = vld [vmem:[#allocation29_spill] sm:$0xff]  ;;  %v5622_v13 = vld [vmem:[#allocation28_spill] sm:$0xff]  ;;  %v745_v48 = vadd.f32 %v713_v22, %v5623_v20 }
 0x1f5   : > { %v2252_v40 = vpack.c.bf16 %v741_v31, %v740_v15  ;;  %v712_v11 = vmul.f32 %v5005_v33, %v5618_v45  ;;  %v5620_v34 = vld [vmem:[#allocation25_spill] sm:$0xff] }
 0x1f6   : > { %v1597_v23 = vmul.f32 %v1469_v16, %v1469_v16  ;;  %v1660_v19 = vpack.c.bf16 %v1596_v44, %v1592_v63  ;;  %v2251_v36 = vpack.c.bf16 %v739_v28, %v738_v62  ;;  %v742_v57 = vadd.f32 %v710_v8, %v5620_v34  ;;  %v5625_v16 = vld [vmem:[#allocation35_spill] sm:$0xff] }
 0x1f7   : > { %v743_v63 = vadd.f32 %v711_v12, %v5621_v54  ;;  %v744_v7 = vadd.f32 %v712_v11, %v5622_v13  ;;  %v715_v18 = vmul.f32 %v5005_v33, %v5625_v16 }
 0x1f8   : > { %v1661_v47 = vpack.c.bf16 %v1597_v23, %v1593_v5  ;;  %v5624_v5 = vld [vmem:[#allocation34_spill] sm:$0xff]  ;;  %v5626_v23 = vld [vmem:[#allocation33_spill] sm:$0xff] }
 0x1f9   : > { %v2253_v25 = vpack.c.bf16 %v743_v63, %v742_v57  ;;  %v714_v44 = vmul.f32 %v5005_v33, %v5624_v5  ;;  %v2254_v58 = vpack.c.bf16 %v745_v48, %v744_v7 }
 0x1fa   : > { %2231 = vmatprep.mubr.bf16.mxu1 %v1661_v47 }
 0x1fb   : > { %2232 = vmatmul.mubr.bf16.gmra.mxu1 %v1660_v19  ;;  %3646 = vmatmul.mubr.bf16.gmra.mxu0 %v2247_v0  ;;  %v746_v19 = vadd.f32 %v714_v44, %v5626_v23  ;;  %v5627_v0 = vld [vmem:[#allocation32_spill] sm:$0xff] }
 0x1fc   : > { %3649 = vmatprep.mubr.bf16.mxu0 %v2248_v41  ;;  %v747_v53 = vadd.f32 %v715_v18, %v5627_v0 }
 0x1fe   : > { %v2255_v42 = vpack.c.bf16 %v747_v53, %v746_v19 }
 0x203   : > { %3650 = vmatmul.mubr.bf16.gmra.mxu0 %v2249_v56 }
 0x204   : > { %3653 = vmatprep.mubr.bf16.mxu0 %v2250_v14 }
 0x20b   : > { %3654 = vmatmul.mubr.bf16.gmra.mxu0 %v2251_v36 }
 0x20c   : > { %3657 = vmatprep.mubr.bf16.mxu0 %v2252_v40 }
 0x213   : > { %3658 = vmatmul.mubr.bf16.gmra.mxu0 %v2253_v25 }
 0x214   : > { %3661 = vmatprep.mubr.bf16.mxu0 %v2254_v58 }
 0x21b   : > { %3662 = vmatmul.mubr.bf16.gmra.mxu0 %v2255_v42 }
 0x223   : > { %v3385_v27 = vpop.f32.mrf.mxu0 }
 0x225   : > { %v3386_v30 = vpop.f32.mrf.mxu0 }
 0x226   : > { %v3387_v47 = vadd.f32 %v3386_v30, %v3385_v27 }
 0x227   : > { %v3388_v41 = vpop.f32.mrf.mxu0 }
 0x229   : > { %v3389_v3 = vpop.f32.mrf.mxu0 }
 0x22a   : > { %v3390_v17 = vadd.f32 %v3389_v3, %v3388_v41 }
 0x22b   : > { %v3391_v1 = vpop.f32.mrf.mxu0 }
 0x22d   : > { %v3392_v29 = vpop.f32.mrf.mxu0 }
 0x22e   : > { %v5106_v6 = vadd.f32 %v3392_v29, %v3391_v1 }
 0x22f   : > { %v3394_v33 = vpop.f32.mrf.mxu0 }
 0x231   : > { %v3395_v43 = vpop.f32.mrf.mxu0 }
 0x232   : > { %v5108_v32 = vadd.f32 %v3395_v43, %v3394_v33 }
 0x233   : > { %v3397_v4 = vpop.f32.mrf.mxu0 }
 0x235   : > { %v3398_v60 = vpop.f32.mrf.mxu0 }
 0x236   : > { %v5110_v24 = vadd.f32 %v3398_v60, %v3397_v4 }
 0x237   : > { %v3400_v35 = vpop.f32.mrf.mxu0 }
 0x239   : > { %v3401_v55 = vpop.f32.mrf.mxu0 }
 0x23a   : > { %v5112_v56 = vadd.f32 %v3401_v55, %v3400_v35 }
 0x23b   : > { %v3403_v26 = vpop.f32.mrf.mxu0 }
 0x23d   : > { %v3404_v37 = vpop.f32.mrf.mxu0 }
 0x23e   : > { %v5114_v61 = vadd.f32 %v3404_v37, %v3403_v26 }
 0x23f   : > { %v3406_v39 = vpop.f32.mrf.mxu0 }
 0x241   : > { %v3407_v14 = vpop.f32.mrf.mxu0 }
 0x242   : > { %v5116_v9 = vadd.f32 %v3407_v14, %v3406_v39 }
 0x243   : > { %v3409_v2 = vpop.f32.mrf.mxu0  ;;  %v3497_v38 = vpop.f32.mrf.mxu1 }
 0x245   : > { %v3410_v21 = vpop.f32.mrf.mxu0  ;;  %v3498_v10 = vpop.f32.mrf.mxu1 }
 0x246   : > { %v5118_v62 = vadd.f32 %v3410_v21, %v3409_v2  ;;  %v3499_v49 = vadd.f32 %v3498_v10, %v3497_v38 }
 0x247   : > { %v3412_v28 = vpop.f32.mrf.mxu0  ;;  %v3500_v50 = vpop.f32.mrf.mxu1 }
 0x248   : > { %v5120_v15 = vadd.f32 %v3499_v49, %v3387_v47 }
 0x249   : > { %v3413_v59 = vpop.f32.mrf.mxu0  ;;  %v3501_v31 = vpop.f32.mrf.mxu1 }
 0x24a   : > { %v5122_v36 = vadd.f32 %v3413_v59, %v3412_v28  ;;  %v3502_v52 = vadd.f32 %v3501_v31, %v3500_v50 }
 0x24b   : > { %v3415_v8 = vpop.f32.mrf.mxu0  ;;  %v5124_v46 = vpop.f32.mrf.mxu1 }
 0x24c   : > { %v5126_v12 = vadd.f32 %v3502_v52, %v3390_v17 }
 0x24d   : > { %v3416_v40 = vpop.f32.mrf.mxu0  ;;  %v5128_v45 = vpop.f32.mrf.mxu1 }
 0x24e   : > { %v5130_v11 = vadd.f32 %v3416_v40, %v3415_v8 }
 0x24f   : > { %v3418_v51 = vpop.f32.mrf.mxu0  ;;  %v5132_v22 = vpop.f32.mrf.mxu1 }
 0x251   : > { %v3419_v34 = vpop.f32.mrf.mxu0  ;;  %v5134_v57 = vpop.f32.mrf.mxu1 }
 0x252   : > { %v5136_v54 = vadd.f32 %v3419_v34, %v3418_v51 }
 0x253   : > { %v3421_v63 = vpop.f32.mrf.mxu0  ;;  %v5138_v13 = vpop.f32.mrf.mxu1 }
 0x255   : > { %v3422_v7 = vpop.f32.mrf.mxu0  ;;  %v5140_v20 = vpop.f32.mrf.mxu1 }
 0x256   : > { %v5142_v48 = vadd.f32 %v3422_v7, %v3421_v63 }
 0x257   : > { %v3424_v25 = vpop.f32.mrf.mxu0  ;;  %v5144_v5 = vpop.f32.mrf.mxu1 }
 0x259   : > { %v3425_v44 = vpop.f32.mrf.mxu0  ;;  %v5146_v16 = vpop.f32.mrf.mxu1 }
 0x25a   : > { %v5148_v18 = vadd.f32 %v3425_v44, %v3424_v25 }
 0x25b   : > { %v3427_v58 = vpop.f32.mrf.mxu0  ;;  %v5150_v23 = vpop.f32.mrf.mxu1 }
 0x25d   : > { %v3428_v19 = vpop.f32.mrf.mxu0  ;;  %v5152_v0 = vpop.f32.mrf.mxu1 }
 0x25e   : > { %v5154_v53 = vadd.f32 %v3428_v19, %v3427_v58 }
 0x25f   : > { %v3430_v42 = vpop.f32.mrf.mxu0  ;;  %v5156_v27 = vpop.f32.mrf.mxu1 }
 0x261   : > { %v3431_v30 = vpop.f32.mrf.mxu0  ;;  %v5158_v47 = vpop.f32.mrf.mxu1 }
 0x262   : > { %v5160_v41 = vadd.f32 %v3431_v30, %v3430_v42 }
 0x263   : > { %v3433_v3 = vpop.f32.mrf.mxu0  ;;  %v5162_v17 = vpop.f32.mrf.mxu1 }
 0x265   : > { %v3434_v1 = vpop.f32.mrf.mxu0  ;;  %v5164_v29 = vpop.f32.mrf.mxu1 }
 0x266   : > { %v5166_v33 = vadd.f32 %v3434_v1, %v3433_v3 }
 0x267   : > { %v3436_v43 = vpop.f32.mrf.mxu0  ;;  %v5168_v4 = vpop.f32.mrf.mxu1 }
 0x268   : > { %5628 = vst [vmem:[#allocation42_spill] sm:$0xff] %v5166_v33 }
 0x269   : > { %v3437_v60 = vpop.f32.mrf.mxu0  ;;  %v5170_v35 = vpop.f32.mrf.mxu1 }
 0x26a   : > { %v5172_v55 = vadd.f32 %v3437_v60, %v3436_v43 }
 0x26b   : > { %v3439_v26 = vpop.f32.mrf.mxu0  ;;  %v5174_v37 = vpop.f32.mrf.mxu1 }
 0x26c   : > { %5629 = vst [vmem:[#allocation43_spill] sm:$0xff] %v5172_v55 }
 0x26d   : > { %v3440_v39 = vpop.f32.mrf.mxu0  ;;  %v5176_v14 = vpop.f32.mrf.mxu1 }
 0x26e   : > { %v5178_v2 = vadd.f32 %v3440_v39, %v3439_v26 }
 0x26f   : > { %v3442_v38 = vpop.f32.mrf.mxu0  ;;  %v5180_v21 = vpop.f32.mrf.mxu1 }
 0x270   : > { %5630 = vst [vmem:[#allocation37_spill] sm:$0xff] %v5178_v2 }
 0x271   : > { %v3443_v10 = vpop.f32.mrf.mxu0  ;;  %v5182_v49 = vpop.f32.mrf.mxu1 }
 0x272   : > { %v5184_v28 = vadd.f32 %v3443_v10, %v3442_v38 }
 0x273   : > { %v3445_v50 = vpop.f32.mrf.mxu0  ;;  %v5186_v59 = vpop.f32.mrf.mxu1 }
 0x274   : > { %5631 = vst [vmem:[#allocation36_spill] sm:$0xff] %v5184_v28 }
 0x275   : > { %v3446_v31 = vpop.f32.mrf.mxu0  ;;  %v5188_v52 = vpop.f32.mrf.mxu1 }
 0x276   : > { %v5190_v8 = vadd.f32 %v3446_v31, %v3445_v50 }
 0x277   : > { %v3448_v40 = vpop.f32.mrf.mxu0  ;;  %v5192_v51 = vpop.f32.mrf.mxu1 }
 0x278   : > { %5632 = vst [vmem:[#allocation39_spill] sm:$0xff] %v5190_v8 }
 0x279   : > { %v3449_v34 = vpop.f32.mrf.mxu0  ;;  %v5194_v63 = vpop.f32.mrf.mxu1 }
 0x27a   : > { %v5196_v7 = vadd.f32 %v3449_v34, %v3448_v40 }
 0x27b   : > { %v3451_v25 = vpop.f32.mrf.mxu0  ;;  %v5198_v44 = vpop.f32.mrf.mxu1 }
 0x27c   : > { %5633 = vst [vmem:[#allocation41_spill] sm:$0xff] %v5196_v7 }
 0x27d   : > { %v3452_v58 = vpop.f32.mrf.mxu0  ;;  %v5200_v19 = vpop.f32.mrf.mxu1 }
 0x27e   : > { %v5202_v42 = vadd.f32 %v3452_v58, %v3451_v25 }
 0x27f   : > { %v3454_v30 = vpop.f32.mrf.mxu0  ;;  %v5204_v3 = vpop.f32.mrf.mxu1 }
 0x280   : > { %5634 = vst [vmem:[#allocation46_spill] sm:$0xff] %v5202_v42 }
 0x281   : > { %v3455_v1 = vpop.f32.mrf.mxu0  ;;  %v5206_v43 = vpop.f32.mrf.mxu1 }
 0x282   : > { %v5208_v60 = vadd.f32 %v3455_v1, %v3454_v30 }
 0x283   : > { %v3457_v26 = vpop.f32.mrf.mxu0  ;;  %v5210_v39 = vpop.f32.mrf.mxu1 }
 0x284   : > { %5635 = vst [vmem:[#allocation47_spill] sm:$0xff] %v5208_v60  ;;  %5636 = vst [vmem:[#allocation50_spill] sm:$0xff] %v5210_v39 }
 0x285   : > { %v3458_v38 = vpop.f32.mrf.mxu0  ;;  %v5212_v10 = vpop.f32.mrf.mxu1 }
 0x286   : > { %5637 = vst [vmem:[#allocation51_spill] sm:$0xff] %v5212_v10  ;;  %v5214_v50 = vadd.f32 %v3458_v38, %v3457_v26 }
 0x287   : > { %v3460_v31 = vpop.f32.mrf.mxu0  ;;  %v5216_v40 = vpop.f32.mrf.mxu1 }
 0x288   : > { %5638 = vst [vmem:[#allocation44_spill] sm:$0xff] %v5214_v50  ;;  %5639 = vst [vmem:[#allocation45_spill] sm:$0xff] %v5216_v40 }
 0x289   : > { %v3461_v34 = vpop.f32.mrf.mxu0  ;;  %v5218_v25 = vpop.f32.mrf.mxu1 }
 0x28a   : > { %5640 = vst [vmem:[#allocation48_spill] sm:$0xff] %v5218_v25  ;;  %v5220_v58 = vadd.f32 %v3461_v34, %v3460_v31 }
 0x28b   : > { %v3463_v7 = vpop.f32.mrf.mxu0  ;;  %v5222_v8 = vpop.f32.mrf.mxu1 }
 0x28c   : > { %5641 = vst [vmem:[#allocation49_spill] sm:$0xff] %v5220_v58 }
 0x28d   : > { %v3464_v30 = vpop.f32.mrf.mxu0  ;;  %v5226_v42 = vpop.f32.mrf.mxu1 }
 0x28e   : > { %v5224_v1 = vadd.f32 %v3464_v30, %v3463_v7 }
 0x28f   : > { %v3466_v60 = vpop.f32.mrf.mxu0  ;;  %v5230_v50 = vpop.f32.mrf.mxu1 }
 0x290   : > { %5642 = vst [vmem:[#allocation54_spill] sm:$0xff] %v5224_v1 }
 0x291   : > { %v3467_v55 = vpop.f32.mrf.mxu0  ;;  %v5234_v34 = vpop.f32.mrf.mxu1 }
 0x292   : > { %v5228_v26 = vadd.f32 %v3467_v55, %v3466_v60  ;;  %5645 = vst [vmem:[#allocation59_spill] sm:$0xff] %v5234_v34 }
 0x293   : > { %v3469_v38 = vpop.f32.mrf.mxu0  ;;  %v5238_v30 = vpop.f32.mrf.mxu1 }
 0x294   : > { %5643 = vst [vmem:[#allocation55_spill] sm:$0xff] %v5228_v26  ;;  %5647 = vst [vmem:[#allocation52_spill] sm:$0xff] %v5238_v30 }
 0x295   : > { %v3470_v33 = vpop.f32.mrf.mxu0  ;;  %v5242_v60 = vpop.f32.mrf.mxu1 }
 0x296   : > { %v5232_v28 = vadd.f32 %v3470_v33, %v3469_v38  ;;  %5649 = vst [vmem:[#allocation57_spill] sm:$0xff] %v5242_v60 }
 0x297   : > { %v3472_v31 = vpop.f32.mrf.mxu0  ;;  %v5246_v38 = vpop.f32.mrf.mxu1 }
 0x298   : > { %5644 = vst [vmem:[#allocation58_spill] sm:$0xff] %v5232_v28  ;;  %5651 = vst [vmem:[#allocation60_spill] sm:$0xff] %v5246_v38 }
 0x299   : > { %v3473_v58 = vpop.f32.mrf.mxu0 }
 0x29a   : > { %v5236_v2 = vadd.f32 %v3473_v58, %v3472_v31 }
 0x29b   : > { %v3475_v7 = vpop.f32.mrf.mxu0 }
 0x29c   : > { %5646 = vst [vmem:[#allocation53_spill] sm:$0xff] %v5236_v2  ;;  %v5248_v2 = vpop.f32.mrf.mxu1 }
 0x29d   : > { %v3476_v1 = vpop.f32.mrf.mxu0  ;;  %5652 = vst [vmem:[#allocation22_spill] sm:$0xff] %v5248_v2 }
 0x29e   : > { %v5240_v25 = vadd.f32 %v3476_v1, %v3475_v7  ;;  %v5250_v60 = vpop.f32.mrf.mxu1 }
 0x29f   : > { %v3478_v55 = vpop.f32.mrf.mxu0  ;;  %5653 = vst [vmem:[#allocation23_spill] sm:$0xff] %v5250_v60 }
 0x2a0   : > { %5648 = vst [vmem:[#allocation56_spill] sm:$0xff] %v5240_v25  ;;  %v5252_v38 = vpop.f32.mrf.mxu1 }
 0x2a1   : > { %v3479_v26 = vpop.f32.mrf.mxu0  ;;  %5654 = vst [vmem:[#allocation40_spill] sm:$0xff] %v5252_v38 }
 0x2a2   : > { %v5244_v40 = vadd.f32 %v3479_v26, %v3478_v55 }
 0x2a3   : > { %v3635_v33 = vpop.f32.mrf.mxu0 }
 0x2a4   : > { %5650 = vst [vmem:[#allocation61_spill] sm:$0xff] %v5244_v40  ;;  %v3095_v28 = vmul.f32 -1.442695, %v3635_v33 }
 0x2a5   : > { %v2354_v10 = vpop.f32.mrf.mxu0 }
 0x2a6   : > { %3886 = vpow2.f32 %v3095_v28  ;;  %v3093_v58 = vmul.f32 -1.442695, %v2354_v10 }
 0x2a7   : > { %v3636_v31 = vpop.f32.mrf.mxu0 }
 0x2a8   : > { %3888 = vpow2.f32 %v3093_v58  ;;  %v3096_v30 = vmul.f32 -1.442695, %v3636_v31 }
 0x2a9   : > { %v2357_v1 = vpop.f32.mrf.mxu0 }
 0x2aa   : > { %3890 = vpow2.f32 %v3096_v30  ;;  %v3094_v7 = vmul.f32 -1.442695, %v2357_v1  ;;  %v5254_v30 = vpop.f32.mrf.mxu1 }
 0x2ab   : > { %v3639_v25 = vpop.f32.mrf.mxu0  ;;  %5655 = vst [vmem:[#allocation38_spill] sm:$0xff] %v5254_v30 }
 0x2ac   : > { %3892 = vpow2.f32 %v3094_v7  ;;  %v3099_v26 = vmul.f32 -1.442695, %v3639_v25 }
 0x2ad   : > { %v2370_v55 = vpop.f32.mrf.mxu0 }
 0x2ae   : > { %3894 = vpow2.f32 %v3099_v26  ;;  %v3097_v40 = vmul.f32 -1.442695, %v2370_v55 }
 0x2af   : > { %v3640_v33 = vpop.f32.mrf.mxu0 }
 0x2b0   : > { %3896 = vpow2.f32 %v3097_v40  ;;  %v3100_v28 = vmul.f32 -1.442695, %v3640_v33  ;;  %v5256_v40 = vpop.f32.mrf.mxu1 }
 0x2b1   : > { %v2373_v10 = vpop.f32.mrf.mxu0  ;;  %5656 = vst [vmem:[#allocation20_spill] sm:$0xff] %v5256_v40 }
 0x2b2   : > { %3898 = vpow2.f32 %v3100_v28  ;;  %v3098_v58 = vmul.f32 -1.442695, %v2373_v10 }
 0x2b3   : > { %v3887_v31 = vpop.eup %3886  ;;  %v3643_v2 = vpop.f32.mrf.mxu0 }
 0x2b4   : > { %v2579_v1 = vadd.f32 1.0, %v3887_v31  ;;  %3900 = vpow2.f32 %v3098_v58  ;;  %v3103_v60 = vmul.f32 -1.442695, %v3643_v2 }
 0x2b5   : > { %v3889_v7 = vpop.eup %3888  ;;  %v2386_v25 = vpop.f32.mrf.mxu0 }
 0x2b6   : > { %3902 = vrcp.f32 %v2579_v1  ;;  %v2577_v26 = vadd.f32 1.0, %v3889_v7  ;;  %v3101_v55 = vmul.f32 -1.442695, %v2386_v25  ;;  %v5258_v1 = vpop.f32.mrf.mxu1 }
 0x2b7   : > { %v3891_v39 = vpop.eup %3890  ;;  %3904 = vpow2.f32 %v3103_v60  ;;  %v3644_v38 = vpop.f32.mrf.mxu0 }
 0x2b8   : > { %3906 = vrcp.f32 %v2577_v26  ;;  %v2580_v33 = vadd.f32 1.0, %v3891_v39  ;;  %v3104_v28 = vmul.f32 -1.442695, %v3644_v38 }
 0x2b9   : > { %v3893_v10 = vpop.eup %3892  ;;  %3908 = vpow2.f32 %v3101_v55  ;;  %v2389_v34 = vpop.f32.mrf.mxu0 }
 0x2ba   : > { %3910 = vrcp.f32 %v2580_v33  ;;  %v2578_v31 = vadd.f32 1.0, %v3893_v10  ;;  %v3102_v58 = vmul.f32 -1.442695, %v2389_v34  ;;  %v5260_v33 = vpop.f32.mrf.mxu1 }
 0x2bb   : > { %v3895_v2 = vpop.eup %3894  ;;  %3912 = vpow2.f32 %v3104_v28  ;;  %v3647_v30 = vpop.f32.mrf.mxu0  ;;  %5657 = vst [vmem:[#allocation21_spill] sm:$0xff] %v5260_v33 }
 0x2bc   : > { %3914 = vrcp.f32 %v2578_v31  ;;  %v2583_v7 = vadd.f32 1.0, %v3895_v2  ;;  %v3107_v60 = vmul.f32 -1.442695, %v3647_v30  ;;  %v3505_v31 = vadd.f32 %v5128_v45, %v5124_v46  ;;  %v5266_v33 = vpop.f32.mrf.mxu1 }
 0x2bd   : > { %v3897_v25 = vpop.eup %3896  ;;  %3916 = vpow2.f32 %v3102_v58  ;;  %v2402_v40 = vpop.f32.mrf.mxu0  ;;  %v3508_v58 = vadd.f32 %v5134_v57, %v5132_v22  ;;  %5658 = vst [vmem:[#allocation26_spill] sm:$0xff] %v5266_v33 }
 0x2be   : > { %3918 = vrcp.f32 %v2583_v7  ;;  %v2581_v39 = vadd.f32 1.0, %v3897_v25  ;;  %v3105_v38 = vmul.f32 -1.442695, %v2402_v40  ;;  %v5274_v33 = vpop.f32.mrf.mxu1 }
 0x2bf   : > { %v3899_v26 = vpop.eup %3898  ;;  %3920 = vpow2.f32 %v3107_v60  ;;  %v3648_v55 = vpop.f32.mrf.mxu0  ;;  %v2125_v22 = vadd.f32 %v3508_v58, %v5108_v32 }
 0x2c0   : > { %3922 = vrcp.f32 %v2581_v39  ;;  %v2584_v34 = vadd.f32 1.0, %v3899_v26  ;;  %v3108_v28 = vmul.f32 -1.442695, %v3648_v55 }
 0x2c1   : > { %v3901_v10 = vpop.eup %3900  ;;  %3924 = vpow2.f32 %v3105_v38  ;;  %v2405_v30 = vpop.f32.mrf.mxu0  ;;  %v2122_v38 = vadd.f32 %v3505_v31, %v5106_v6  ;;  %v3520_v31 = vadd.f32 %v5158_v47, %v5156_v27 }
 0x2c2   : > { %3926 = vrcp.f32 %v2584_v34  ;;  %v2582_v2 = vadd.f32 1.0, %v3901_v10  ;;  %v3106_v40 = vmul.f32 -1.442695, %v2405_v30  ;;  %v3517_v10 = vadd.f32 %v5152_v0, %v5150_v23 }
 0x2c3   : > { %v3903_v7 = vpop.eup %3902  ;;  %3928 = vpow2.f32 %v3108_v28  ;;  %v3651_v60 = vpop.f32.mrf.mxu0  ;;  %v3511_v28 = vadd.f32 %v5140_v20, %v5138_v13 }
 0x2c4   : > { %v3905_v25 = vpop.eup %3904  ;;  %3930 = vrcp.f32 %v2582_v2  ;;  %v3111_v39 = vmul.f32 -1.442695, %v3651_v60 }
 0x2c5   : > { %v3907_v26 = vpop.eup %3906  ;;  %v2587_v55 = vadd.f32 1.0, %v3905_v25  ;;  %3932 = vpow2.f32 %v3106_v40  ;;  %v2418_v46 = vpop.f32.mrf.mxu0  ;;  %v2675_v40 = vmul.f32 %v3903_v7, %v2122_v38 }
 0x2c6   : > { %v3909_v45 = vpop.eup %3908  ;;  %3934 = vpow2.f32 %v3111_v39  ;;  %v3109_v57 = vmul.f32 -1.442695, %v2418_v46  ;;  %v2673_v13 = vmul.f32 %v3907_v26, %v5120_v15  ;;  %v3514_v46 = vadd.f32 %v5146_v16, %v5144_v5  ;;  %v5283_v26 = vpop.f32.mrf.mxu1 }
 0x2c7   : > { %v3911_v34 = vpop.eup %3910  ;;  %3936 = vrcp.f32 %v2587_v55  ;;  %v2585_v30 = vadd.f32 1.0, %v3909_v45  ;;  %v3652_v2 = vpop.f32.mrf.mxu0  ;;  %v2138_v5 = vadd.f32 %v3517_v10, %v5114_v61  ;;  %v2141_v16 = vadd.f32 %v3520_v31, %v5116_v9 }
 0x2c8   : > { %v3913_v60 = vpop.eup %3912  ;;  %v2676_v25 = vmul.f32 %v3911_v34, %v2125_v22  ;;  %3938 = vpow2.f32 %v3109_v57  ;;  %v3112_v6 = vmul.f32 -1.442695, %v3652_v2  ;;  %v3526_v10 = vadd.f32 %v5170_v35, %v5168_v4 }
 0x2c9   : > { %v3915_v32 = vpop.eup %3914  ;;  %3940 = vrcp.f32 %v2585_v30  ;;  %v2588_v20 = vadd.f32 1.0, %v3913_v60  ;;  %v2421_v23 = vpop.f32.mrf.mxu0 }
 0x2ca   : > { %v3917_v0 = vpop.eup %3916  ;;  %v3267_v58 = vpack.c.bf16 %v2676_v25, %v2675_v40  ;;  %v2674_v39 = vmul.f32 %v3915_v32, %v5126_v12  ;;  %3942 = vpow2.f32 %v3112_v6  ;;  %v3110_v7 = vmul.f32 -1.442695, %v2421_v23 }
 0x2cb   : > { %v3919_v55 = vpop.eup %3918  ;;  %3944 = vrcp.f32 %v2588_v20  ;;  %v2586_v45 = vadd.f32 1.0, %v3917_v0  ;;  %v3655_v27 = vpop.f32.mrf.mxu0  ;;  %v2130_v12 = vadd.f32 %v3511_v28, %v5110_v24  ;;  %v2133_v40 = vadd.f32 %v3514_v46, %v5112_v56 }
 0x2cc   : > { %v3921_v47 = vpop.eup %3920  ;;  %3354 = vst [vmem:[%s4454_s4 + $0x8] sm:$0xff] %v3267_v58   ;;  %v3262_v15 = vpack.c.bf16 %v2674_v39, %v2673_v13  ;;  %3946 = vpow2.f32 %v3110_v7  ;;  %v3115_v38 = vmul.f32 -1.442695, %v3655_v27  ;;  %v3523_v25 = vadd.f32 %v5164_v29, %v5162_v17  ;;  %v5292_v13 = vpop.f32.mrf.mxu1 }
 0x2cd   : > { %v3923_v22 = vpop.eup %3922  ;;  %3948 = vrcp.f32 %v2586_v45  ;;  %v2591_v57 = vadd.f32 1.0, %v3921_v47  ;;  %v2434_v34 = vpop.f32.mrf.mxu0  ;;  %v2679_v32 = vmul.f32 %v3919_v55, %v2138_v5  ;;  %v3529_v7 = vadd.f32 %v5176_v14, %v5174_v37 }
 0x2ce   : > { %v3925_v30 = vpop.eup %3924  ;;  %3263 = vst [vmem:[%s4454_s4] sm:$0xff] %v3262_v15   ;;  %3950 = vpow2.f32 %v3115_v38  ;;  %v3113_v2 = vmul.f32 -1.442695, %v2434_v34  ;;  %v2677_v31 = vmul.f32 %v3923_v22, %v2130_v12  ;;  %v3532_v55 = vadd.f32 %v5182_v49, %v5180_v21  ;;  %v5300_v45 = vpop.f32.mrf.mxu1 }
 0x2cf   : > { %v3927_v60 = vpop.eup %3926  ;;  %3952 = vrcp.f32 %v2591_v57  ;;  %v2589_v6 = vadd.f32 1.0, %v3925_v30  ;;  %v3656_v24 = vpop.f32.mrf.mxu0  ;;  %v2146_v37 = vadd.f32 %v3523_v25, %v5118_v62  ;;  %v2149_v57 = vadd.f32 %v3526_v10, %v5122_v36 }
 0x2d0   : > { %v3929_v28 = vpop.eup %3928  ;;  %v2680_v20 = vmul.f32 %v3927_v60, %v2141_v16  ;;  %3954 = vpow2.f32 %v3113_v2  ;;  %v3116_v61 = vmul.f32 -1.442695, %v3656_v24  ;;  %v2154_v34 = vadd.f32 %v3529_v7, %v5130_v11  ;;  %v5310_v60 = vpop.f32.mrf.mxu1 }
 0x2d1   : > { %v3931_v9 = vpop.eup %3930  ;;  %3956 = vrcp.f32 %v2589_v6  ;;  %v2592_v56 = vadd.f32 1.0, %v3929_v28  ;;  %v2437_v23 = vpop.f32.mrf.mxu0  ;;  %v2157_v30 = vadd.f32 %v3532_v55, %v5136_v54  ;;  %v3535_v2 = vadd.f32 %v5188_v52, %v5186_v59 }
 0x2d2   : > { %v3933_v17 = vpop.eup %3932  ;;  %v3277_v29 = vpack.c.bf16 %v2680_v20, %v2679_v32  ;;  %v2678_v0 = vmul.f32 %v3931_v9, %v2133_v40  ;;  %3958 = vpow2.f32 %v3116_v61  ;;  %v3114_v58 = vmul.f32 -1.442695, %v2437_v23 }
 0x2d3   : > { %v3935_v39 = vpop.eup %3934  ;;  %3960 = vrcp.f32 %v2592_v56  ;;  %v2590_v4 = vadd.f32 1.0, %v3933_v17  ;;  %v3659_v35 = vpop.f32.mrf.mxu0  ;;  %v3541_v6 = vadd.f32 %v5200_v19, %v5198_v44  ;;  %v3544_v28 = vadd.f32 %v5206_v43, %v5204_v3 }
 0x2d4   : > { %v3937_v46 = vpop.eup %3936  ;;  %3356 = vst [vmem:[%s4454_s4 + $0x18] sm:$0xff] %v3277_v29   ;;  %v3272_v27 = vpack.c.bf16 %v2678_v0, %v2677_v31  ;;  %v2595_v47 = vadd.f32 1.0, %v3935_v39  ;;  %3962 = vpow2.f32 %v3114_v58  ;;  %v3119_v15 = vmul.f32 -1.442695, %v3659_v35  ;;  %v5318_v19 = vpop.f32.mrf.mxu1 }
 0x2d5   : > { %v3939_v38 = vpop.eup %3938  ;;  %3964 = vrcp.f32 %v2590_v4  ;;  %v2450_v22 = vpop.f32.mrf.mxu0  ;;  %v2683_v36 = vmul.f32 %v3937_v46, %v2154_v34  ;;  %v3538_v44 = vadd.f32 %v5194_v63, %v5192_v51  ;;  %v2162_v7 = vadd.f32 %v3535_v2, %v5142_v48  ;;  %v5663_v2 = vld [vmem:[#allocation48_spill] sm:$0xff] }
 0x2d6   : > { %v3941_v12 = vpop.eup %3940  ;;  %3355 = vst [vmem:[%s4454_s4 + $0x10] sm:$0xff] %v3272_v27   ;;  %3966 = vrcp.f32 %v2595_v47  ;;  %v2593_v14 = vadd.f32 1.0, %v3939_v38  ;;  %v3117_v21 = vmul.f32 -1.442695, %v2450_v22  ;;  %v2170_v51 = vadd.f32 %v3541_v6, %v5154_v53  ;;  %v5326_v46 = vpop.f32.mrf.mxu1 }
 0x2d7   : > { %v3943_v49 = vpop.eup %3942  ;;  %3968 = vpow2.f32 %v3119_v15  ;;  %v3660_v5 = vpop.f32.mrf.mxu0  ;;  %v2681_v20 = vmul.f32 %v3941_v12, %v2146_v37  ;;  %v2173_v63 = vadd.f32 %v3544_v28, %v5160_v41  ;;  %v2165_v35 = vadd.f32 %v3538_v44, %v5148_v18  ;;  %v5659_v12 = vld [vmem:[#allocation59_spill] sm:$0xff] }
 0x2d8   : > { %v3945_v16 = vpop.eup %3944  ;;  %3970 = vrcp.f32 %v2593_v14  ;;  %v2596_v62 = vadd.f32 1.0, %v3943_v49  ;;  %v3120_v40 = vmul.f32 -1.442695, %v3660_v5  ;;  %v3553_v38 = vadd.f32 %v5226_v42, %v5222_v8  ;;  %v5660_v8 = vld [vmem:[#allocation50_spill] sm:$0xff]  ;;  %v5661_v42 = vld [vmem:[#allocation51_spill] sm:$0xff] }
 0x2d9   : > { %v3947_v25 = vpop.eup %3946  ;;  %v2684_v24 = vmul.f32 %v3945_v16, %v2157_v30  ;;  %3972 = vpow2.f32 %v3117_v21  ;;  %v2453_v11 = vpop.f32.mrf.mxu0  ;;  %v3556_v37 = vadd.f32 %v5659_v12, %v5230_v50  ;;  %v3547_v5 = vadd.f32 %v5661_v42, %v5660_v8  ;;  %v5662_v16 = vld [vmem:[#allocation45_spill] sm:$0xff] }
 0x2da   : > { %v3949_v54 = vpop.eup %3948  ;;  %3974 = vrcp.f32 %v2596_v62  ;;  %v2594_v59 = vadd.f32 1.0, %v3947_v25  ;;  %v3118_v52 = vmul.f32 -1.442695, %v2453_v11  ;;  %v3550_v62 = vadd.f32 %v5663_v2, %v5662_v16  ;;  %v5679_v2 = vld [vmem:[#allocation41_spill] sm:$0xff] }
 0x2db   : > { %v3951_v32 = vpop.eup %3950  ;;  %v3287_v61 = vpack.c.bf16 %v2684_v24, %v2683_v36  ;;  %v2682_v9 = vmul.f32 %v3949_v54, %v2149_v57  ;;  %3976 = vpow2.f32 %v3120_v40  ;;  %v3663_v10 = vpop.f32.mrf.mxu0  ;;  %v5664_v24 = vld [vmem:[#allocation37_spill] sm:$0xff]  ;;  %v5665_v54 = vld [vmem:[#allocation36_spill] sm:$0xff] }
 0x2dc   : > { %v3953_v31 = vpop.eup %3952  ;;  %3978 = vrcp.f32 %v2594_v59  ;;  %v2599_v56 = vadd.f32 1.0, %v3951_v32  ;;  %v3123_v3 = vmul.f32 -1.442695, %v3663_v10  ;;  %v5336_v40 = vpop.f32.mrf.mxu1  ;;  %v2186_v11 = vadd.f32 %v3553_v38, %v5664_v24 }
 0x2dd   : > { %v3955_v43 = vpop.eup %3954  ;;  %3358 = vst [vmem:[%s4454_s4 + $0x28] sm:$0xff] %v3287_v61   ;;  %v3282_v23 = vpack.c.bf16 %v2682_v9, %v2681_v20  ;;  %3980 = vpow2.f32 %v3118_v52  ;;  %v2466_v17 = vpop.f32.mrf.mxu0  ;;  %v2687_v48 = vmul.f32 %v3953_v31, %v2170_v51  ;;  %v2189_v28 = vadd.f32 %v3556_v37, %v5665_v54  ;;  %v5666_v20 = vld [vmem:[#allocation42_spill] sm:$0xff]  ;;  %v5667_v9 = vld [vmem:[#allocation43_spill] sm:$0xff] }
 0x2de   : > { %v3957_v29 = vpop.eup %3956  ;;  %3982 = vrcp.f32 %v2599_v56  ;;  %v2597_v0 = vadd.f32 1.0, %v3955_v43  ;;  %v3121_v58 = vmul.f32 -1.442695, %v2466_v17  ;;  %v2178_v61 = vadd.f32 %v3547_v5, %v5666_v20  ;;  %v5344_v31 = vpop.f32.mrf.mxu1  ;;  %v5668_v43 = vld [vmem:[#allocation23_spill] sm:$0xff] }
 0x2df   : > { %v3959_v39 = vpop.eup %3958  ;;  %3357 = vst [vmem:[%s4454_s4 + $0x20] sm:$0xff] %v3282_v23   ;;  %3984 = vpow2.f32 %v3123_v3  ;;  %v3664_v55 = vpop.f32.mrf.mxu0  ;;  %v2685_v49 = vmul.f32 %v3957_v29, %v2162_v7  ;;  %v2181_v10 = vadd.f32 %v3550_v62, %v5667_v9  ;;  %v5669_v23 = vld [vmem:[#allocation40_spill] sm:$0xff]  ;;  %v5670_v29 = vld [vmem:[#allocation38_spill] sm:$0xff]  ;;  %v5678_v5 = vld [vmem:[#allocation39_spill] sm:$0xff] }
 0x2e0   : > { %v3961_v4 = vpop.eup %3960  ;;  %3986 = vrcp.f32 %v2597_v0  ;;  %v2600_v27 = vadd.f32 1.0, %v3959_v39  ;;  %v3124_v47 = vmul.f32 -1.442695, %v3664_v55  ;;  %v3565_v17 = vadd.f32 %v5669_v23, %v5668_v43  ;;  %v5671_v0 = vld [vmem:[#allocation20_spill] sm:$0xff] }
 0x2e1   : > { %v3963_v15 = vpop.eup %3962  ;;  %v2688_v22 = vmul.f32 %v3961_v4, %v2173_v63  ;;  %3988 = vpow2.f32 %v3121_v58  ;;  %v2469_v53 = vpop.f32.mrf.mxu0  ;;  %v3568_v58 = vadd.f32 %v5671_v0, %v5670_v29  ;;  %v5684_v0 = vld [vmem:[#allocation44_spill] sm:$0xff] }
 0x2e2   : > { %v3965_v41 = vpop.eup %3964  ;;  %3990 = vrcp.f32 %v2600_v27  ;;  %v2598_v18 = vadd.f32 1.0, %v3963_v15  ;;  %v3122_v14 = vmul.f32 -1.442695, %v2469_v53  ;;  %v5673_v15 = vld [vmem:[#allocation57_spill] sm:$0xff] }
 0x2e3   : > { %v3967_v21 = vpop.eup %3966  ;;  %v3297_v57 = vpack.c.bf16 %v2688_v22, %v2687_v48  ;;  %v2686_v34 = vmul.f32 %v3965_v41, %v2165_v35  ;;  %3992 = vpow2.f32 %v3124_v47  ;;  %v5672_v47 = vld [vmem:[#allocation52_spill] sm:$0xff]  ;;  %v5675_v22 = vld [vmem:[#allocation22_spill] sm:$0xff]  ;;  %v3587_v41 = vpop.f32.mrf.mxu1 }
 0x2e4   : > { %v3969_v30 = vpop.eup %3968  ;;  %3994 = vrcp.f32 %v2598_v18  ;;  %v2691_v44 = vmul.f32 %v3967_v21, %v2186_v11  ;;  %v3559_v38 = vadd.f32 %v5673_v15, %v5672_v47  ;;  %v5674_v48 = vld [vmem:[#allocation60_spill] sm:$0xff]  ;;  %v5676_v21 = vld [vmem:[#allocation46_spill] sm:$0xff]  ;;  %v3583_v47 = vadd.f32 %v5326_v46, %v5318_v19  ;;  %v5689_v46 = vld [vmem:[#allocation53_spill] sm:$0xff] }
 0x2e5   : > { %v3971_v50 = vpop.eup %3970  ;;  %3360 = vst [vmem:[%s4454_s4 + $0x38] sm:$0xff] %v3297_v57   ;;  %v3292_v25 = vpack.c.bf16 %v2686_v34, %v2685_v49  ;;  %v2603_v6 = vadd.f32 1.0, %v3969_v30  ;;  %3996 = vpow2.f32 %v3122_v14  ;;  %v3562_v53 = vadd.f32 %v5675_v22, %v5674_v48  ;;  %v5677_v57 = vld [vmem:[#allocation47_spill] sm:$0xff] }
 0x2e6   : > { %v3973_v36 = vpop.eup %3972  ;;  %v2689_v51 = vmul.f32 %v3971_v50, %v2178_v61  ;;  %v2202_v49 = vadd.f32 %v3565_v17, %v5676_v21  ;;  %v2205_v34 = vadd.f32 %v3568_v58, %v5677_v57  ;;  %v2194_v16 = vadd.f32 %v3559_v38, %v5678_v5  ;;  %v3588_v50 = vpop.f32.mrf.mxu1 }
 0x2e7   : > { %v3975_v59 = vpop.eup %3974  ;;  %3359 = vst [vmem:[%s4454_s4 + $0x30] sm:$0xff] %v3292_v25   ;;  %v2601_v52 = vadd.f32 1.0, %v3973_v36  ;;  %3998 = vrcp.f32 %v2603_v6  ;;  %v2197_v62 = vadd.f32 %v3562_v53, %v5679_v2  ;;  %v3586_v15 = vadd.f32 %v5344_v31, %v5336_v40  ;;  %v5686_v53 = vld [vmem:[#allocation56_spill] sm:$0xff] }
 0x2e8   : > { %v3977_v32 = vpop.eup %3976  ;;  %v2692_v56 = vmul.f32 %v3975_v59, %v2189_v28  ;;  %v3590_v61 = vpop.f32.mrf.mxu1 }
 0x2e9   : > { %v3979_v3 = vpop.eup %3978  ;;  %v2604_v39 = vadd.f32 1.0, %v3977_v32  ;;  %4000 = vrcp.f32 %v2601_v52  ;;  %v3577_v52 = vadd.f32 %v5292_v13, %v5283_v26  ;;  %v3580_v32 = vadd.f32 %v5310_v60, %v5300_v45  ;;  %v5682_v26 = vld [vmem:[#allocation54_spill] sm:$0xff]  ;;  %v5683_v45 = vld [vmem:[#allocation55_spill] sm:$0xff] }
 0x2ea   : > { %v3981_v7 = vpop.eup %3980  ;;  %v3307_v63 = vpack.c.bf16 %v2692_v56, %v2691_v44  ;;  %v2690_v55 = vmul.f32 %v3979_v3, %v2181_v10  ;;  %v5680_v10 = vld [vmem:[#allocation21_spill] sm:$0xff]  ;;  %v5681_v56 = vld [vmem:[#allocation26_spill] sm:$0xff]  ;;  %v3591_v29 = vpop.f32.mrf.mxu1  ;;  %v2229_v21 = vadd.f32 %v3586_v15, %v5689_v46 }
 0x2eb   : > { %v3983_v4 = vpop.eup %3982  ;;  %4002 = vrcp.f32 %v2604_v39  ;;  %v2602_v35 = vadd.f32 1.0, %v3981_v7  ;;  %v3571_v44 = vadd.f32 %v5680_v10, %v5258_v1  ;;  %v3574_v3 = vadd.f32 %v5274_v33, %v5681_v56  ;;  %v5685_v39 = vld [vmem:[#allocation49_spill] sm:$0xff] }
 0x2ec   : > { %v3985_v27 = vpop.eup %3984  ;;  %3362 = vst [vmem:[%s4454_s4 + $0x48] sm:$0xff] %v3307_v63   ;;  %v3302_v12 = vpack.c.bf16 %v2690_v55, %v2689_v51  ;;  %v2695_v25 = vmul.f32 %v3983_v4, %v2202_v49  ;;  %v2218_v13 = vadd.f32 %v3577_v52, %v5682_v26  ;;  %v2221_v60 = vadd.f32 %v3580_v32, %v5683_v45 }
 0x2ed   : > { %v3987_v37 = vpop.eup %3986  ;;  %4004 = vrcp.f32 %v2602_v35  ;;  %v2607_v18 = vadd.f32 1.0, %v3985_v27  ;;  %v2210_v58 = vadd.f32 %v3571_v44, %v5684_v0  ;;  %v2213_v1 = vadd.f32 %v3574_v3, %v5685_v39 }
 0x2ee   : > { %v3989_v14 = vpop.eup %3988  ;;  %3361 = vst [vmem:[%s4454_s4 + $0x40] sm:$0xff] %v3302_v12   ;;  %v2693_v54 = vmul.f32 %v3987_v37, %v2194_v16  ;;  %v3589_v63 = vadd.f32 %v3588_v50, %v3587_v41  ;;  %v3592_v55 = vadd.f32 %v3591_v29, %v3590_v61  ;;  %v5687_v12 = vld [vmem:[#allocation61_spill] sm:$0xff] }
 0x2ef   : > { %v3991_v30 = vpop.eup %3990  ;;  %v2605_v8 = vadd.f32 1.0, %v3989_v14  ;;  %4006 = vrcp.f32 %v2607_v18  ;;  %v5688_v14 = vld [vmem:[#allocation58_spill] sm:$0xff] }
 0x2f0   : > { %v3993_v42 = vpop.eup %3992  ;;  %v2696_v6 = vmul.f32 %v3991_v30, %v2205_v34  ;;  %v2234_v41 = vadd.f32 %v3589_v63, %v5686_v53  ;;  %v2237_v37 = vadd.f32 %v3592_v55, %v5687_v12  ;;  %v2226_v19 = vadd.f32 %v3583_v47, %v5688_v14 }
 0x2f1   : > { %v3995_v36 = vpop.eup %3994  ;;  %v2608_v24 = vadd.f32 1.0, %v3993_v42  ;;  %4008 = vrcp.f32 %v2605_v8 }
 0x2f2   : > { %v3997_v11 = vpop.eup %3996  ;;  %v3317_v28 = vpack.c.bf16 %v2696_v6, %v2695_v25  ;;  %v2694_v59 = vmul.f32 %v3995_v36, %v2197_v62 }
 0x2f3   : > { %4010 = vrcp.f32 %v2608_v24  ;;  %v2606_v20 = vadd.f32 1.0, %v3997_v11 }
 0x2f4   : > { %3364 = vst [vmem:[%s4454_s4 + $0x58] sm:$0xff] %v3317_v28   ;;  %v3312_v9 = vpack.c.bf16 %v2694_v59, %v2693_v54  ;;  %v3999_v43 = vpop.eup %3998 }
 0x2f5   : > { %4012 = vrcp.f32 %v2606_v20  ;;  %v2699_v7 = vmul.f32 %v3999_v43, %v2218_v13 }
 0x2f6   : > { %3363 = vst [vmem:[%s4454_s4 + $0x50] sm:$0xff] %v3312_v9   ;;  %v4001_v23 = vpop.eup %4000 }
 0x2f7   : > { %v2697_v4 = vmul.f32 %v4001_v23, %v2210_v58 }
 0x2f8   : > { %v4003_v17 = vpop.eup %4002 }
 0x2f9   : > { %v2700_v51 = vmul.f32 %v4003_v17, %v2221_v60 }
 0x2fa   : > { %v4005_v33 = vpop.eup %4004 }
 0x2fb   : > { %v3327_v35 = vpack.c.bf16 %v2700_v51, %v2699_v7  ;;  %v2698_v27 = vmul.f32 %v4005_v33, %v2213_v1 }
 0x2fc   : > { %v4007_v48 = vpop.eup %4006 }
 0x2fd   : > { %3366 = vst [vmem:[%s4454_s4 + $0x68] sm:$0xff] %v3327_v35   ;;  %v3322_v38 = vpack.c.bf16 %v2698_v27, %v2697_v4  ;;  %v2703_v49 = vmul.f32 %v4007_v48, %v2234_v41 }
 0x2fe   : > { %v4009_v22 = vpop.eup %4008 }
 0x2ff   : > { %3365 = vst [vmem:[%s4454_s4 + $0x60] sm:$0xff] %v3322_v38   ;;  %v2701_v57 = vmul.f32 %v4009_v22, %v2226_v19 }
 0x300   : > { %v4011_v18 = vpop.eup %4010 }
 0x301   : > { %v2704_v40 = vmul.f32 %v4011_v18, %v2237_v37 }
 0x302   : > { %v4013_v31 = vpop.eup %4012 }
 0x303   : > { %v3337_v34 = vpack.c.bf16 %v2704_v40, %v2703_v49  ;;  %v2702_v30 = vmul.f32 %v4013_v31, %v2229_v21 }
 0x305   : > { %3368 = vst [vmem:[%s4454_s4 + $0x78] sm:$0xff] %v3337_v34   ;;  %v3332_v8 = vpack.c.bf16 %v2702_v30, %v2701_v57 }
 0x307   : > { %3367 = vst [vmem:[%s4454_s4 + $0x70] sm:$0xff] %v3332_v8  }
 0x308   : > { %4134 = shalt.err (!%p4131_p11)
}
 0x309   : > { %s4135_s4 = scalar_lea.hbm %s5390_s6, 2048  ;;  %s4139_s11 = scalar_lea.hbm %s5690_s13, 8192 }
 0x30a   : > { %p4136_p13 = scmp.ne.s32.totalorder %s5390_s6, %s4135_s4  ;;  %p4140_p10 = scmp.lt.s32.totalorder %s5390_s6, %s5690_s13 }
 0x30b   : > { %p4141_p1 = scmp.lt.s32.totalorder %s4139_s11, %s4135_s4 }
 0x30c   : > { %p4137_p3 = pnand %p4136_p13, %p4396_p6 }
 0x30d   : > { %p4142_p8 = por %p4141_p1, %p4140_p10 }
 0x30e   : > { %p4138_p0 = pneg %p4137_p3 }
 0x310   : > { %p4143_p4 = pnand %p4142_p8, %p4138_p0 }
 0x312   : > { %4146 = shalt.err (!%p4143_p4)
}
 0x313   : > { %s4238_s17 = smov 64   ;;  %s4239_s12 = smov 4  }
 0x314   : > { %3695 = dma.vmem_to_hbm [thread:$0]  (%p4396_p6), %s5392_s25, 2048, %s5390_s6, %s2866_s26, %s4238_s17, %s4238_s17, %s4239_s12  }
 0x315 PF: > { %s5691_s3 = sld [smem:[#allocation16_spill]]  ;;  %p3722_p2 = scmp.ge.s32.totalorder %s4225_s28, 2 }
 0x316   : > { %s5692_s24 = sld [smem:[#allocation18_spill]] }
 0x31b   : > { %s2896_s15 = sand.u32 1, %s5691_s3  }
 0x31c   : > { %p5693_p5 = scmp.ne.s32.totalorder %s5692_s24, 0  ;;  %s2897_s14 = scalar_lea.sflag [#allocation5], %s2896_s15 }
 0x31e   : > { %p3712_p7 = pnand %p3722_p2, %p5693_p5 }
 0x320   : > { %p3713_p9 = pneg %p3712_p7 }
 0x322   : > { %4192 = dma.done.wait (%p3713_p9), %s2897_s14, 2048  }
 0x323   : > { %4194 = vsyncadd (%p3713_p9), %s2897_s14, 4294965248  ;;  %s24_s28 = sadd.s32 1, %s4225_s28   ;;  %s5694_s24 = sld [smem:[#allocation17_spill]] }
 0x324   : > { %p21_p12 = scmp.ge.s32.totalorder %s24_s28, 6   ;;  %s5695_s26 = sld [smem:[#allocation19_spill]] }
 0x325   : > { %s5696_s21 = smov %s4201_s22  ;;  %s5697_s22 = smov %s4205_s23 }
 0x326   : > { %s5698_s23 = smov %s4413_s5  ;;  %s5699_s25 = smov %s4221_s27 }
 0x327   : > { %s5700_s27 = smov %s5706_s30  ;;  %23 = sbr.rel (!%p21_p12) target bundleno = 14 (0xe), region = 105 }
 0x32c   :  { %2902 = vsyncpa [#allocation4], 1 }
 0x32d   :  { %2904 = vsyncpa [#allocation4 + $0x1], 1 }
 0x32e   :  { %2905 = vsyncpa [#allocation7], 1 }
 0x32f   :  { %2906 = vsyncpa [#allocation10], 1 }
 0x330   :  { %2907 = vsyncpa [#allocation5], 1 }
 0x331   :  { %2909 = vsyncpa [#allocation5 + $0x1], 1 }

</bundles_post_ra>
